<compile_context>
chip_gen: v6e
topology: v6e:2x2x1
jax: 0.10.0
libtpu: 0.0.40
codegen_flags: <defaults>
</compile_context>

<pallas_src>
import numpy as np
import jax
import jax.numpy as jnp
from jax.experimental import pallas as pl
from jax.experimental.pallas import tpu as pltpu


def _prelu(x, a):
    # torch.nn.PReLU: x if x > 0 else a * x
    return jnp.where(x > 0, x, a * x)


def _fold_z_into_weights(w, C, G):
    """Fold the 3 z-offsets of a 3x3x3 kernel into banded (G*C, G*C) matrices.

    w: (27, Cin, Cout) with tap order k = (dx*3 + dy)*3 + dz.
    Returns (9, G*C, G*C) where tap t = dx*3 + dy and
      out[t, zi*C + ci, zo*C + co] = w[t*3 + dz, ci, co]   with zi = zo + dz - 1
    for 0 <= zi < G; out-of-range z taps are omitted (input is zero there).
    """
    sel = np.zeros((3, G, G), np.float32)
    for dz in range(3):
        for zo in range(G):
            zi = zo + dz - 1
            if 0 <= zi < G:
                sel[dz, zi, zo] = 1.0
    w9 = jnp.asarray(w, jnp.float32).reshape(9, 3, C, C)
    wz = jnp.einsum('dio,tdce->ticoe', jnp.asarray(sel), w9)
    return wz.reshape(9, G * C, G * C)


def _block_kernel(dense_ref, res_ref, mask_ref, w1_ref, b1_ref, w2_ref, b2_ref,
                  alpha_ref, out_ref, buf_ref):
    Bblk, G, _, GC = dense_ref.shape     # GC = G * C (fused, lane-dense)
    Gp = G + 2
    R = G * G
    M = Bblk * R                         # batch folded into the matmul M dim

    a1 = alpha_ref[0, 0]
    a2 = alpha_ref[0, 1]

    # Zero the (x,y) halo of the padded scratch exactly once; the interior is
    # fully overwritten every step and the halo never changes.
    @pl.when(pl.program_id(0) == 0)
    def _():
        buf_ref[...] = jnp.zeros(buf_ref.shape, buf_ref.dtype)

    # ---- pad the bf16 input over (x, y) in VMEM (no HBM round trip) ---------
    buf_ref[:, pl.ds(1, G), pl.ds(1, G), :] = dense_ref[...]

    def conv(src, w_ref, b_row):
        # 3x3x3 conv with the z taps folded into the banded weight
        # (K = N = G*C = lane-dense); the 9 (dx, dy) taps accumulate in f32.
        acc = b_row                                            # (1, GC) f32
        t = 0
        for dx in range(3):
            for dy in range(3):
                s = src[:, dx:dx + G, dy:dy + G, :].reshape(M, GC)   # bf16
                acc = acc + jnp.dot(s, w_ref[t],
                                    preferred_element_type=jnp.float32)
                t += 1
        return acc                                             # (M, GC) f32

    # ---- conv1 + bias + PReLU1 + occupancy mask -----------------------------
    y1 = _prelu(conv(buf_ref[...], w1_ref, b1_ref[...]), a1) * mask_ref[...]

    # ---- re-pad masked y1 into the same scratch (halo already zero) ---------
    buf_ref[:, pl.ds(1, G), pl.ds(1, G), :] = (
        y1.reshape(Bblk, G, G, GC).astype(buf_ref.dtype))

    # ---- conv2 + bias + residual + PReLU2, lane-dense (M, GC) store ---------
    y2 = conv(buf_ref[...], w2_ref, b2_ref[...]) + res_ref[...]
    out_ref[...] = _prelu(y2, a2)


def block_forward(feats, coords, B, G, params):
    """feats: (P, C) float32, coords: (P, 4) int32 as (batch, x, y, z).
    Coordinates are assumed unique (duplicates would overwrite, not add)."""
    C = feats.shape[-1]
    R = G * G
    GC = G * C
    w1, b1, a1, w2, b2, a2 = params
    bi, xi, yi, zi = coords[:, 0], coords[:, 1], coords[:, 2], coords[:, 3]

    # ---- glue: sparse -> dense voxelization (assumes unique coordinates) ----
    dense = jnp.zeros((B, G, G, G, C), jnp.float32).at[bi, xi, yi, zi].set(feats)
    occ = jnp.zeros((B, G, G, G), jnp.float32).at[bi, xi, yi, zi].set(1.0)

    dense_b = dense.reshape(B, G, G, GC).astype(jnp.bfloat16)   # MXU operand
    res = dense.reshape(B * R, GC)                              # residual, f32
    mask_e = jnp.repeat(occ, C, axis=-1).reshape(B * R, GC)     # fused layout

    # banded weights: z taps folded into K (= N = G*C), bf16 for the MXU
    w1z = _fold_z_into_weights(w1, C, G).astype(jnp.bfloat16)
    w2z = _fold_z_into_weights(w2, C, G).astype(jnp.bfloat16)
    b1e = jnp.tile(b1.astype(jnp.float32), G).reshape(1, GC)
    b2e = jnp.tile(b2.astype(jnp.float32), G).reshape(1, GC)
    alphas = jnp.stack([a1, a2]).astype(jnp.float32).reshape(1, 2)

    # Fold batches into the matmul M dim (target M in [128, 256]); when the
    # grid has >1 step prefer an even step count so v7x's two cores get work.
    divisors = [d for d in range(1, B + 1) if B % d == 0 and d * R <= 256]
    B_blk = divisors[-1] if divisors else 1
    if B // B_blk > 1 and (B // B_blk) % 2:
        even = [d for d in divisors if (B // d) % 2 == 0]
        if even:
            B_blk = even[-1]
    n_steps = B // B_blk
    Mb = B_blk * R

    flops = 2 * 2 * 9 * B * R * GC * GC          # banded MXU work, both convs
    bytes_accessed = (dense_b.size * 2 + res.size * 4 + mask_e.size * 4
                      + w1z.size * 2 + w2z.size * 2
                      + b1e.size * 4 + b2e.size * 4 + B * R * GC * 4)

    out = pl.pallas_call(
        _block_kernel,
        out_shape=jax.ShapeDtypeStruct((B * R, GC), jnp.float32),
        grid=(n_steps,),
        in_specs=[
            pl.BlockSpec((B_blk, G, G, GC), lambda b: (b, 0, 0, 0)),   # dense
            pl.BlockSpec((Mb, GC), lambda b: (b, 0)),                  # res
            pl.BlockSpec((Mb, GC), lambda b: (b, 0)),                  # mask
            pl.BlockSpec((9, GC, GC), lambda b: (0, 0, 0)),            # w1z
            pl.BlockSpec((1, GC), lambda b: (0, 0)),                   # b1e
            pl.BlockSpec((9, GC, GC), lambda b: (0, 0, 0)),            # w2z
            pl.BlockSpec((1, GC), lambda b: (0, 0)),                   # b2e
            pl.BlockSpec((1, 2), lambda b: (0, 0),
                         memory_space=pltpu.MemorySpace.SMEM),         # alphas
        ],
        out_specs=pl.BlockSpec((Mb, GC), lambda b: (b, 0)),
        scratch_shapes=[pltpu.VMEM((B_blk, G + 2, G + 2, GC), jnp.bfloat16)],
        compiler_params=pltpu.CompilerParams(
            dimension_semantics=("parallel",),
            vmem_limit_bytes=32 * 1024 * 1024),
        cost_estimate=pl.CostEstimate(flops=flops, transcendentals=0,
                                      bytes_accessed=bytes_accessed),
    )(dense_b, res, mask_e, w1z, b1e, w2z, b2e, alphas)

    # ---- glue: gather dense result back at the sparse coordinates -----------
    out_dense = out.reshape(B, G, G, G, C)
    return out_dense[bi, xi, yi, zi]


def ref_forward(feats, coords, B, G, params):
    """Pure-JAX reference with identical semantics (bf16 MXU inputs, f32 acc)."""
    C = feats.shape[-1]
    w1, b1, a1, w2, b2, a2 = params
    bi, xi, yi, zi = coords[:, 0], coords[:, 1], coords[:, 2], coords[:, 3]
    dense = jnp.zeros((B, G, G, G, C), jnp.float32).at[bi, xi, yi, zi].set(feats)
    mask = jnp.zeros((B, G, G, G, 1), jnp.float32).at[bi, xi, yi, zi, 0].set(1.0)

    def conv(d, w, bias):
        dp = jnp.pad(d, ((0, 0), (1, 1), (1, 1), (1, 1), (0, 0)))
        acc = jnp.zeros(d.shape, jnp.float32)
        k = 0
        for dx in range(3):
            for dy in range(3):
                for dz in range(3):
                    sh = dp[:, dx:dx + G, dy:dy + G, dz:dz + G, :]
                    acc = acc + jnp.einsum(
                        'bxyzc,cd->bxyzd',
                        sh.astype(jnp.bfloat16), w[k].astype(jnp.bfloat16),
                        preferred_element_type=jnp.float32)
                    k += 1
        return acc + bias

    y1 = _prelu(conv(dense, w1, b1), a1) * mask
    y2 = conv(y1.astype(jnp.bfloat16).astype(jnp.float32), w2, b2)
    out = _prelu(y2 + dense, a2)
    return out[bi, xi, yi, zi]


if __name__ == "__main__":
    B, G, C, N = 2, 8, 16, 64  # batch, voxel grid side, channels, points/batch
    key = jax.random.PRNGKey(0)
    kc, kf, kw1, kb1, kw2, kb2 = jax.random.split(key, 6)

    # deterministic distinct sparse coordinates per batch element
    coords_list = []
    for b in range(B):
        kb = jax.random.fold_in(kc, b)
        flat = jax.random.choice(kb, G * G * G, (N,), replace=False)
        xs = (flat // (G * G)).astype(jnp.int32)
        ys = ((flat // G) % G).astype(jnp.int32)
        zs = (flat % G).astype(jnp.int32)
        bb = jnp.full((N,), b, jnp.int32)
        coords_list.append(jnp.stack([bb, xs, ys, zs], axis=1))
    coords = jnp.concatenate(coords_list, axis=0)           # (P, 4)
    feats = jax.random.normal(kf, (B * N, C), jnp.float32)  # (P, C)

    # deterministic synthetic parameters (spnn.Conv3d: 27 offset weights + bias)
    w1 = 0.1 * jax.random.normal(kw1, (27, C, C), jnp.float32)
    b1 = 0.1 * jax.random.normal(kb1, (C,), jnp.float32)
    w2 = 0.1 * jax.random.normal(kw2, (27, C, C), jnp.float32)
    b2 = 0.1 * jax.random.normal(kb2, (C,), jnp.float32)
    a1 = jnp.float32(0.25)  # nn.PReLU() default init (scalar PReLU)
    a2 = jnp.float32(0.25)
    params = (w1, b1, a1, w2, b2, a2)

    out = jax.block_until_ready(block_forward(feats, coords, B, G, params))
    ref = jax.block_until_ready(ref_forward(feats, coords, B, G, params))

    err = float(jnp.max(jnp.abs(out - ref)))
    # bf16 MXU inputs (f32 accumulation): allow for bf16 rounding of the
    # intermediate activations + accumulation-order differences.
    assert jnp.allclose(out, ref, atol=1e-2, rtol=1e-2), f"max abs err {err}"
    print("KERNEL_OK")
</pallas_src>

<mosaic_0001>
module attributes {stable_mosaic.version = 11 : i64} {
  func.func @_block_kernel(%arg0: i32, %arg1: memref<2x8x8x128xbf16, #tpu.memory_space<vmem>>, %arg2: memref<128x128xf32, #tpu.memory_space<vmem>>, %arg3: memref<128x128xf32, #tpu.memory_space<vmem>>, %arg4: memref<9x128x128xbf16, #tpu.memory_space<vmem>>, %arg5: memref<1x128xf32, #tpu.memory_space<vmem>>, %arg6: memref<9x128x128xbf16, #tpu.memory_space<vmem>>, %arg7: memref<1x128xf32, #tpu.memory_space<vmem>>, %arg8: memref<1x2xf32, #tpu.memory_space<smem>>, %arg9: memref<128x128xf32, #tpu.memory_space<vmem>>, %arg10: memref<2x10x10x128xbf16, #tpu.memory_space<vmem>>) attributes {dimension_semantics = [#tpu.dimension_semantics<parallel>], iteration_bounds = array<i64: 1>, scalar_prefetch = 0 : i64, scratch_operands = 1 : i64, tpu.core_type = #tpu.core_type<tc>, window_params = [{transform_indices = @transform_0, window_bounds = array<i64: 2, 8, 8, 128>}, {transform_indices = @transform_1, window_bounds = array<i64: 128, 128>}, {transform_indices = @transform_2, window_bounds = array<i64: 128, 128>}, {pipeline_mode = #tpu.pipeline_mode<synchronous>, transform_indices = @transform_3, window_bounds = array<i64: 9, 128, 128>}, {pipeline_mode = #tpu.pipeline_mode<synchronous>, transform_indices = @transform_4, window_bounds = array<i64: 1, 128>}, {pipeline_mode = #tpu.pipeline_mode<synchronous>, transform_indices = @transform_5, window_bounds = array<i64: 9, 128, 128>}, {pipeline_mode = #tpu.pipeline_mode<synchronous>, transform_indices = @transform_6, window_bounds = array<i64: 1, 128>}, {transform_indices = @transform_7, window_bounds = array<i64: 1, 2>}, {transform_indices = @transform_8, window_bounds = array<i64: 128, 128>}]} {
    %c0 = arith.constant 0 : index
    %c0_0 = arith.constant 0 : index
    %0 = memref.load %arg8[%c0, %c0_0] : memref<1x2xf32, #tpu.memory_space<smem>>
    %c0_1 = arith.constant 0 : index
    %c1 = arith.constant 1 : index
    %1 = memref.load %arg8[%c0_1, %c1] : memref<1x2xf32, #tpu.memory_space<smem>>
    %c0_i32 = arith.constant 0 : i32
    %2 = arith.cmpi eq, %arg0, %c0_i32 : i32
    %3 = arith.extui %2 : i1 to i32
    %c0_i32_2 = arith.constant 0 : i32
    %4 = arith.cmpi ne, %3, %c0_i32_2 : i32
    scf.if %4 {
      %cst_99 = arith.constant 0.000000e+00 : bf16
      %139 = vector.broadcast %cst_99 : bf16 to vector<2x10x10x128xbf16>
      %c0_100 = arith.constant 0 : index
      %c0_101 = arith.constant 0 : index
      %c0_102 = arith.constant 0 : index
      %c0_103 = arith.constant 0 : index
      %140 = vector.load %arg10[%c0_100, %c0_101, %c0_102, %c0_103] : memref<2x10x10x128xbf16, #tpu.memory_space<vmem>>, vector<2x10x10x128xbf16>
      tpu.vector_store %arg10[%c0_100, %c0_101, %c0_102, %c0_103], %139 {strides = array<i32>} : memref<2x10x10x128xbf16, #tpu.memory_space<vmem>>, vector<2x10x10x128xbf16>,
    } else {
    }
    %c0_3 = arith.constant 0 : index
    %c0_4 = arith.constant 0 : index
    %c0_5 = arith.constant 0 : index
    %c0_6 = arith.constant 0 : index
    %5 = vector.load %arg1[%c0_3, %c0_4, %c0_5, %c0_6] : memref<2x8x8x128xbf16, #tpu.memory_space<vmem>>, vector<2x8x8x128xbf16>
    %c0_7 = arith.constant 0 : index
    %c1_8 = arith.constant 1 : index
    %c1_9 = arith.constant 1 : index
    %c0_10 = arith.constant 0 : index
    %6 = vector.load %arg10[%c0_7, %c1_8, %c1_9, %c0_10] : memref<2x10x10x128xbf16, #tpu.memory_space<vmem>>, vector<2x8x8x128xbf16>
    tpu.vector_store %arg10[%c0_7, %c1_8, %c1_9, %c0_10], %5 {strides = array<i32>} : memref<2x10x10x128xbf16, #tpu.memory_space<vmem>>, vector<2x8x8x128xbf16>,
    %c0_11 = arith.constant 0 : index
    %c0_12 = arith.constant 0 : index
    %c0_13 = arith.constant 0 : index
    %c0_14 = arith.constant 0 : index
    %7 = vector.load %arg10[%c0_11, %c0_12, %c0_13, %c0_14] : memref<2x10x10x128xbf16, #tpu.memory_space<vmem>>, vector<2x10x10x128xbf16>
    %c0_15 = arith.constant 0 : index
    %c0_16 = arith.constant 0 : index
    %8 = vector.load %arg5[%c0_15, %c0_16] : memref<1x128xf32, #tpu.memory_space<vmem>>, vector<1x128xf32>
    %9 = vector.extract_strided_slice %7 {offsets = [0, 0, 0, 0], sizes = [2, 8, 8, 128], strides = [1, 1, 1, 1]} : vector<2x10x10x128xbf16> to vector<2x8x8x128xbf16>
    %10 = vector.shape_cast %9 : vector<2x8x8x128xbf16> to vector<128x128xbf16>
    %c0_17 = arith.constant 0 : index
    %c0_18 = arith.constant 0 : index
    %c0_19 = arith.constant 0 : index
    %11 = vector.load %arg4[%c0_17, %c0_18, %c0_19] : memref<9x128x128xbf16, #tpu.memory_space<vmem>>, vector<1x128x128xbf16>
    %12 = vector.shape_cast %11 : vector<1x128x128xbf16> to vector<128x128xbf16>
    %cst = arith.constant dense<0.000000e+00> : vector<128x128xf32>
    %13 = tpu.matmul %10, %12, %cst {dimension_numbers = #tpu.dot_dimension_numbers<[1], [0], [0], [1], [0, 0, 1, 1], [], []>} : vector<128x128xbf16>, vector<128x128xbf16>, vector<128x128xf32> -> vector<128x128xf32>
    %14 = vector.broadcast %8 : vector<1x128xf32> to vector<128x128xf32>
    %15 = arith.addf %14, %13 : vector<128x128xf32>
    %16 = vector.extract_strided_slice %7 {offsets = [0, 0, 1, 0], sizes = [2, 8, 8, 128], strides = [1, 1, 1, 1]} : vector<2x10x10x128xbf16> to vector<2x8x8x128xbf16>
    %17 = vector.shape_cast %16 : vector<2x8x8x128xbf16> to vector<128x128xbf16>
    %c1_20 = arith.constant 1 : index
    %c0_21 = arith.constant 0 : index
    %c0_22 = arith.constant 0 : index
    %18 = vector.load %arg4[%c1_20, %c0_21, %c0_22] : memref<9x128x128xbf16, #tpu.memory_space<vmem>>, vector<1x128x128xbf16>
    %19 = vector.shape_cast %18 : vector<1x128x128xbf16> to vector<128x128xbf16>
    %cst_23 = arith.constant dense<0.000000e+00> : vector<128x128xf32>
    %20 = tpu.matmul %17, %19, %cst_23 {dimension_numbers = #tpu.dot_dimension_numbers<[1], [0], [0], [1], [0, 0, 1, 1], [], []>} : vector<128x128xbf16>, vector<128x128xbf16>, vector<128x128xf32> -> vector<128x128xf32>
    %21 = arith.addf %15, %20 : vector<128x128xf32>
    %22 = vector.extract_strided_slice %7 {offsets = [0, 0, 2, 0], sizes = [2, 8, 8, 128], strides = [1, 1, 1, 1]} : vector<2x10x10x128xbf16> to vector<2x8x8x128xbf16>
    %23 = vector.shape_cast %22 : vector<2x8x8x128xbf16> to vector<128x128xbf16>
    %c2 = arith.constant 2 : index
    %c0_24 = arith.constant 0 : index
    %c0_25 = arith.constant 0 : index
    %24 = vector.load %arg4[%c2, %c0_24, %c0_25] : memref<9x128x128xbf16, #tpu.memory_space<vmem>>, vector<1x128x128xbf16>
    %25 = vector.shape_cast %24 : vector<1x128x128xbf16> to vector<128x128xbf16>
    %cst_26 = arith.constant dense<0.000000e+00> : vector<128x128xf32>
    %26 = tpu.matmul %23, %25, %cst_26 {dimension_numbers = #tpu.dot_dimension_numbers<[1], [0], [0], [1], [0, 0, 1, 1], [], []>} : vector<128x128xbf16>, vector<128x128xbf16>, vector<128x128xf32> -> vector<128x128xf32>
    %27 = arith.addf %21, %26 : vector<128x128xf32>
    %28 = vector.extract_strided_slice %7 {offsets = [0, 1, 0, 0], sizes = [2, 8, 8, 128], strides = [1, 1, 1, 1]} : vector<2x10x10x128xbf16> to vector<2x8x8x128xbf16>
    %29 = vector.shape_cast %28 : vector<2x8x8x128xbf16> to vector<128x128xbf16>
    %c3 = arith.constant 3 : index
    %c0_27 = arith.constant 0 : index
    %c0_28 = arith.constant 0 : index
    %30 = vector.load %arg4[%c3, %c0_27, %c0_28] : memref<9x128x128xbf16, #tpu.memory_space<vmem>>, vector<1x128x128xbf16>
    %31 = vector.shape_cast %30 : vector<1x128x128xbf16> to vector<128x128xbf16>
    %cst_29 = arith.constant dense<0.000000e+00> : vector<128x128xf32>
    %32 = tpu.matmul %29, %31, %cst_29 {dimension_numbers = #tpu.dot_dimension_numbers<[1], [0], [0], [1], [0, 0, 1, 1], [], []>} : vector<128x128xbf16>, vector<128x128xbf16>, vector<128x128xf32> -> vector<128x128xf32>
    %33 = arith.addf %27, %32 : vector<128x128xf32>
    %34 = vector.extract_strided_slice %7 {offsets = [0, 1, 1, 0], sizes = [2, 8, 8, 128], strides = [1, 1, 1, 1]} : vector<2x10x10x128xbf16> to vector<2x8x8x128xbf16>
    %35 = vector.shape_cast %34 : vector<2x8x8x128xbf16> to vector<128x128xbf16>
    %c4 = arith.constant 4 : index
    %c0_30 = arith.constant 0 : index
    %c0_31 = arith.constant 0 : index
    %36 = vector.load %arg4[%c4, %c0_30, %c0_31] : memref<9x128x128xbf16, #tpu.memory_space<vmem>>, vector<1x128x128xbf16>
    %37 = vector.shape_cast %36 : vector<1x128x128xbf16> to vector<128x128xbf16>
    %cst_32 = arith.constant dense<0.000000e+00> : vector<128x128xf32>
    %38 = tpu.matmul %35, %37, %cst_32 {dimension_numbers = #tpu.dot_dimension_numbers<[1], [0], [0], [1], [0, 0, 1, 1], [], []>} : vector<128x128xbf16>, vector<128x128xbf16>, vector<128x128xf32> -> vector<128x128xf32>
    %39 = arith.addf %33, %38 : vector<128x128xf32>
    %40 = vector.extract_strided_slice %7 {offsets = [0, 1, 2, 0], sizes = [2, 8, 8, 128], strides = [1, 1, 1, 1]} : vector<2x10x10x128xbf16> to vector<2x8x8x128xbf16>
    %41 = vector.shape_cast %40 : vector<2x8x8x128xbf16> to vector<128x128xbf16>
    %c5 = arith.constant 5 : index
    %c0_33 = arith.constant 0 : index
    %c0_34 = arith.constant 0 : index
    %42 = vector.load %arg4[%c5, %c0_33, %c0_34] : memref<9x128x128xbf16, #tpu.memory_space<vmem>>, vector<1x128x128xbf16>
    %43 = vector.shape_cast %42 : vector<1x128x128xbf16> to vector<128x128xbf16>
    %cst_35 = arith.constant dense<0.000000e+00> : vector<128x128xf32>
    %44 = tpu.matmul %41, %43, %cst_35 {dimension_numbers = #tpu.dot_dimension_numbers<[1], [0], [0], [1], [0, 0, 1, 1], [], []>} : vector<128x128xbf16>, vector<128x128xbf16>, vector<128x128xf32> -> vector<128x128xf32>
    %45 = arith.addf %39, %44 : vector<128x128xf32>
    %46 = vector.extract_strided_slice %7 {offsets = [0, 2, 0, 0], sizes = [2, 8, 8, 128], strides = [1, 1, 1, 1]} : vector<2x10x10x128xbf16> to vector<2x8x8x128xbf16>
    %47 = vector.shape_cast %46 : vector<2x8x8x128xbf16> to vector<128x128xbf16>
    %c6 = arith.constant 6 : index
    %c0_36 = arith.constant 0 : index
    %c0_37 = arith.constant 0 : index
    %48 = vector.load %arg4[%c6, %c0_36, %c0_37] : memref<9x128x128xbf16, #tpu.memory_space<vmem>>, vector<1x128x128xbf16>
    %49 = vector.shape_cast %48 : vector<1x128x128xbf16> to vector<128x128xbf16>
    %cst_38 = arith.constant dense<0.000000e+00> : vector<128x128xf32>
    %50 = tpu.matmul %47, %49, %cst_38 {dimension_numbers = #tpu.dot_dimension_numbers<[1], [0], [0], [1], [0, 0, 1, 1], [], []>} : vector<128x128xbf16>, vector<128x128xbf16>, vector<128x128xf32> -> vector<128x128xf32>
    %51 = arith.addf %45, %50 : vector<128x128xf32>
    %52 = vector.extract_strided_slice %7 {offsets = [0, 2, 1, 0], sizes = [2, 8, 8, 128], strides = [1, 1, 1, 1]} : vector<2x10x10x128xbf16> to vector<2x8x8x128xbf16>
    %53 = vector.shape_cast %52 : vector<2x8x8x128xbf16> to vector<128x128xbf16>
    %c7 = arith.constant 7 : index
    %c0_39 = arith.constant 0 : index
    %c0_40 = arith.constant 0 : index
    %54 = vector.load %arg4[%c7, %c0_39, %c0_40] : memref<9x128x128xbf16, #tpu.memory_space<vmem>>, vector<1x128x128xbf16>
    %55 = vector.shape_cast %54 : vector<1x128x128xbf16> to vector<128x128xbf16>
    %cst_41 = arith.constant dense<0.000000e+00> : vector<128x128xf32>
    %56 = tpu.matmul %53, %55, %cst_41 {dimension_numbers = #tpu.dot_dimension_numbers<[1], [0], [0], [1], [0, 0, 1, 1], [], []>} : vector<128x128xbf16>, vector<128x128xbf16>, vector<128x128xf32> -> vector<128x128xf32>
    %57 = arith.addf %51, %56 : vector<128x128xf32>
    %58 = vector.extract_strided_slice %7 {offsets = [0, 2, 2, 0], sizes = [2, 8, 8, 128], strides = [1, 1, 1, 1]} : vector<2x10x10x128xbf16> to vector<2x8x8x128xbf16>
    %59 = vector.shape_cast %58 : vector<2x8x8x128xbf16> to vector<128x128xbf16>
    %c8 = arith.constant 8 : index
    %c0_42 = arith.constant 0 : index
    %c0_43 = arith.constant 0 : index
    %60 = vector.load %arg4[%c8, %c0_42, %c0_43] : memref<9x128x128xbf16, #tpu.memory_space<vmem>>, vector<1x128x128xbf16>
    %61 = vector.shape_cast %60 : vector<1x128x128xbf16> to vector<128x128xbf16>
    %cst_44 = arith.constant dense<0.000000e+00> : vector<128x128xf32>
    %62 = tpu.matmul %59, %61, %cst_44 {dimension_numbers = #tpu.dot_dimension_numbers<[1], [0], [0], [1], [0, 0, 1, 1], [], []>} : vector<128x128xbf16>, vector<128x128xbf16>, vector<128x128xf32> -> vector<128x128xf32>
    %63 = arith.addf %57, %62 : vector<128x128xf32>
    %cst_45 = arith.constant 0.000000e+00 : f32
    %64 = vector.broadcast %cst_45 : f32 to vector<128x128xf32>
    %65 = arith.cmpf ogt, %63, %64 : vector<128x128xf32>
    %66 = vector.broadcast %0 : f32 to vector<128x128xf32>
    %67 = arith.mulf %66, %63 : vector<128x128xf32>
    %68 = arith.select %65, %63, %67 : vector<128x128xi1>, vector<128x128xf32>
    %c0_46 = arith.constant 0 : index
    %c0_47 = arith.constant 0 : index
    %69 = vector.load %arg3[%c0_46, %c0_47] : memref<128x128xf32, #tpu.memory_space<vmem>>, vector<128x128xf32>
    %70 = arith.mulf %68, %69 : vector<128x128xf32>
    %71 = vector.shape_cast %70 : vector<128x128xf32> to vector<2x8x8x128xf32>
    %72 = arith.truncf %71 : vector<2x8x8x128xf32> to vector<2x8x8x128xbf16>
    %c0_48 = arith.constant 0 : index
    %c1_49 = arith.constant 1 : index
    %c1_50 = arith.constant 1 : index
    %c0_51 = arith.constant 0 : index
    %73 = vector.load %arg10[%c0_48, %c1_49, %c1_50, %c0_51] : memref<2x10x10x128xbf16, #tpu.memory_space<vmem>>, vector<2x8x8x128xbf16>
    tpu.vector_store %arg10[%c0_48, %c1_49, %c1_50, %c0_51], %72 {strides = array<i32>} : memref<2x10x10x128xbf16, #tpu.memory_space<vmem>>, vector<2x8x8x128xbf16>,
    %c0_52 = arith.constant 0 : index
    %c0_53 = arith.constant 0 : index
    %c0_54 = arith.constant 0 : index
    %c0_55 = arith.constant 0 : index
    %74 = vector.load %arg10[%c0_52, %c0_53, %c0_54, %c0_55] : memref<2x10x10x128xbf16, #tpu.memory_space<vmem>>, vector<2x10x10x128xbf16>
    %c0_56 = arith.constant 0 : index
    %c0_57 = arith.constant 0 : index
    %75 = vector.load %arg7[%c0_56, %c0_57] : memref<1x128xf32, #tpu.memory_space<vmem>>, vector<1x128xf32>
    %76 = vector.extract_strided_slice %74 {offsets = [0, 0, 0, 0], sizes = [2, 8, 8, 128], strides = [1, 1, 1, 1]} : vector<2x10x10x128xbf16> to vector<2x8x8x128xbf16>
    %77 = vector.shape_cast %76 : vector<2x8x8x128xbf16> to vector<128x128xbf16>
    %c0_58 = arith.constant 0 : index
    %c0_59 = arith.constant 0 : index
    %c0_60 = arith.constant 0 : index
    %78 = vector.load %arg6[%c0_58, %c0_59, %c0_60] : memref<9x128x128xbf16, #tpu.memory_space<vmem>>, vector<1x128x128xbf16>
    %79 = vector.shape_cast %78 : vector<1x128x128xbf16> to vector<128x128xbf16>
    %cst_61 = arith.constant dense<0.000000e+00> : vector<128x128xf32>
    %80 = tpu.matmul %77, %79, %cst_61 {dimension_numbers = #tpu.dot_dimension_numbers<[1], [0], [0], [1], [0, 0, 1, 1], [], []>} : vector<128x128xbf16>, vector<128x128xbf16>, vector<128x128xf32> -> vector<128x128xf32>
    %81 = vector.broadcast %75 : vector<1x128xf32> to vector<128x128xf32>
    %82 = arith.addf %81, %80 : vector<128x128xf32>
    %83 = vector.extract_strided_slice %74 {offsets = [0, 0, 1, 0], sizes = [2, 8, 8, 128], strides = [1, 1, 1, 1]} : vector<2x10x10x128xbf16> to vector<2x8x8x128xbf16>
    %84 = vector.shape_cast %83 : vector<2x8x8x128xbf16> to vector<128x128xbf16>
    %c1_62 = arith.constant 1 : index
    %c0_63 = arith.constant 0 : index
    %c0_64 = arith.constant 0 : index
    %85 = vector.load %arg6[%c1_62, %c0_63, %c0_64] : memref<9x128x128xbf16, #tpu.memory_space<vmem>>, vector<1x128x128xbf16>
    %86 = vector.shape_cast %85 : vector<1x128x128xbf16> to vector<128x128xbf16>
    %cst_65 = arith.constant dense<0.000000e+00> : vector<128x128xf32>
    %87 = tpu.matmul %84, %86, %cst_65 {dimension_numbers = #tpu.dot_dimension_numbers<[1], [0], [0], [1], [0, 0, 1, 1], [], []>} : vector<128x128xbf16>, vector<128x128xbf16>, vector<128x128xf32> -> vector<128x128xf32>
    %88 = arith.addf %82, %87 : vector<128x128xf32>
    %89 = vector.extract_strided_slice %74 {offsets = [0, 0, 2, 0], sizes = [2, 8, 8, 128], strides = [1, 1, 1, 1]} : vector<2x10x10x128xbf16> to vector<2x8x8x128xbf16>
    %90 = vector.shape_cast %89 : vector<2x8x8x128xbf16> to vector<128x128xbf16>
    %c2_66 = arith.constant 2 : index
    %c0_67 = arith.constant 0 : index
    %c0_68 = arith.constant 0 : index
    %91 = vector.load %arg6[%c2_66, %c0_67, %c0_68] : memref<9x128x128xbf16, #tpu.memory_space<vmem>>, vector<1x128x128xbf16>
    %92 = vector.shape_cast %91 : vector<1x128x128xbf16> to vector<128x128xbf16>
    %cst_69 = arith.constant dense<0.000000e+00> : vector<128x128xf32>
    %93 = tpu.matmul %90, %92, %cst_69 {dimension_numbers = #tpu.dot_dimension_numbers<[1], [0], [0], [1], [0, 0, 1, 1], [], []>} : vector<128x128xbf16>, vector<128x128xbf16>, vector<128x128xf32> -> vector<128x128xf32>
    %94 = arith.addf %88, %93 : vector<128x128xf32>
    %95 = vector.extract_strided_slice %74 {offsets = [0, 1, 0, 0], sizes = [2, 8, 8, 128], strides = [1, 1, 1, 1]} : vector<2x10x10x128xbf16> to vector<2x8x8x128xbf16>
    %96 = vector.shape_cast %95 : vector<2x8x8x128xbf16> to vector<128x128xbf16>
    %c3_70 = arith.constant 3 : index
    %c0_71 = arith.constant 0 : index
    %c0_72 = arith.constant 0 : index
    %97 = vector.load %arg6[%c3_70, %c0_71, %c0_72] : memref<9x128x128xbf16, #tpu.memory_space<vmem>>, vector<1x128x128xbf16>
    %98 = vector.shape_cast %97 : vector<1x128x128xbf16> to vector<128x128xbf16>
    %cst_73 = arith.constant dense<0.000000e+00> : vector<128x128xf32>
    %99 = tpu.matmul %96, %98, %cst_73 {dimension_numbers = #tpu.dot_dimension_numbers<[1], [0], [0], [1], [0, 0, 1, 1], [], []>} : vector<128x128xbf16>, vector<128x128xbf16>, vector<128x128xf32> -> vector<128x128xf32>
    %100 = arith.addf %94, %99 : vector<128x128xf32>
    %101 = vector.extract_strided_slice %74 {offsets = [0, 1, 1, 0], sizes = [2, 8, 8, 128], strides = [1, 1, 1, 1]} : vector<2x10x10x128xbf16> to vector<2x8x8x128xbf16>
    %102 = vector.shape_cast %101 : vector<2x8x8x128xbf16> to vector<128x128xbf16>
    %c4_74 = arith.constant 4 : index
    %c0_75 = arith.constant 0 : index
    %c0_76 = arith.constant 0 : index
    %103 = vector.load %arg6[%c4_74, %c0_75, %c0_76] : memref<9x128x128xbf16, #tpu.memory_space<vmem>>, vector<1x128x128xbf16>
    %104 = vector.shape_cast %103 : vector<1x128x128xbf16> to vector<128x128xbf16>
    %cst_77 = arith.constant dense<0.000000e+00> : vector<128x128xf32>
    %105 = tpu.matmul %102, %104, %cst_77 {dimension_numbers = #tpu.dot_dimension_numbers<[1], [0], [0], [1], [0, 0, 1, 1], [], []>} : vector<128x128xbf16>, vector<128x128xbf16>, vector<128x128xf32> -> vector<128x128xf32>
    %106 = arith.addf %100, %105 : vector<128x128xf32>
    %107 = vector.extract_strided_slice %74 {offsets = [0, 1, 2, 0], sizes = [2, 8, 8, 128], strides = [1, 1, 1, 1]} : vector<2x10x10x128xbf16> to vector<2x8x8x128xbf16>
    %108 = vector.shape_cast %107 : vector<2x8x8x128xbf16> to vector<128x128xbf16>
    %c5_78 = arith.constant 5 : index
    %c0_79 = arith.constant 0 : index
    %c0_80 = arith.constant 0 : index
    %109 = vector.load %arg6[%c5_78, %c0_79, %c0_80] : memref<9x128x128xbf16, #tpu.memory_space<vmem>>, vector<1x128x128xbf16>
    %110 = vector.shape_cast %109 : vector<1x128x128xbf16> to vector<128x128xbf16>
    %cst_81 = arith.constant dense<0.000000e+00> : vector<128x128xf32>
    %111 = tpu.matmul %108, %110, %cst_81 {dimension_numbers = #tpu.dot_dimension_numbers<[1], [0], [0], [1], [0, 0, 1, 1], [], []>} : vector<128x128xbf16>, vector<128x128xbf16>, vector<128x128xf32> -> vector<128x128xf32>
    %112 = arith.addf %106, %111 : vector<128x128xf32>
    %113 = vector.extract_strided_slice %74 {offsets = [0, 2, 0, 0], sizes = [2, 8, 8, 128], strides = [1, 1, 1, 1]} : vector<2x10x10x128xbf16> to vector<2x8x8x128xbf16>
    %114 = vector.shape_cast %113 : vector<2x8x8x128xbf16> to vector<128x128xbf16>
    %c6_82 = arith.constant 6 : index
    %c0_83 = arith.constant 0 : index
    %c0_84 = arith.constant 0 : index
    %115 = vector.load %arg6[%c6_82, %c0_83, %c0_84] : memref<9x128x128xbf16, #tpu.memory_space<vmem>>, vector<1x128x128xbf16>
    %116 = vector.shape_cast %115 : vector<1x128x128xbf16> to vector<128x128xbf16>
    %cst_85 = arith.constant dense<0.000000e+00> : vector<128x128xf32>
    %117 = tpu.matmul %114, %116, %cst_85 {dimension_numbers = #tpu.dot_dimension_numbers<[1], [0], [0], [1], [0, 0, 1, 1], [], []>} : vector<128x128xbf16>, vector<128x128xbf16>, vector<128x128xf32> -> vector<128x128xf32>
    %118 = arith.addf %112, %117 : vector<128x128xf32>
    %119 = vector.extract_strided_slice %74 {offsets = [0, 2, 1, 0], sizes = [2, 8, 8, 128], strides = [1, 1, 1, 1]} : vector<2x10x10x128xbf16> to vector<2x8x8x128xbf16>
    %120 = vector.shape_cast %119 : vector<2x8x8x128xbf16> to vector<128x128xbf16>
    %c7_86 = arith.constant 7 : index
    %c0_87 = arith.constant 0 : index
    %c0_88 = arith.constant 0 : index
    %121 = vector.load %arg6[%c7_86, %c0_87, %c0_88] : memref<9x128x128xbf16, #tpu.memory_space<vmem>>, vector<1x128x128xbf16>
    %122 = vector.shape_cast %121 : vector<1x128x128xbf16> to vector<128x128xbf16>
    %cst_89 = arith.constant dense<0.000000e+00> : vector<128x128xf32>
    %123 = tpu.matmul %120, %122, %cst_89 {dimension_numbers = #tpu.dot_dimension_numbers<[1], [0], [0], [1], [0, 0, 1, 1], [], []>} : vector<128x128xbf16>, vector<128x128xbf16>, vector<128x128xf32> -> vector<128x128xf32>
    %124 = arith.addf %118, %123 : vector<128x128xf32>
    %125 = vector.extract_strided_slice %74 {offsets = [0, 2, 2, 0], sizes = [2, 8, 8, 128], strides = [1, 1, 1, 1]} : vector<2x10x10x128xbf16> to vector<2x8x8x128xbf16>
    %126 = vector.shape_cast %125 : vector<2x8x8x128xbf16> to vector<128x128xbf16>
    %c8_90 = arith.constant 8 : index
    %c0_91 = arith.constant 0 : index
    %c0_92 = arith.constant 0 : index
    %127 = vector.load %arg6[%c8_90, %c0_91, %c0_92] : memref<9x128x128xbf16, #tpu.memory_space<vmem>>, vector<1x128x128xbf16>
    %128 = vector.shape_cast %127 : vector<1x128x128xbf16> to vector<128x128xbf16>
    %cst_93 = arith.constant dense<0.000000e+00> : vector<128x128xf32>
    %129 = tpu.matmul %126, %128, %cst_93 {dimension_numbers = #tpu.dot_dimension_numbers<[1], [0], [0], [1], [0, 0, 1, 1], [], []>} : vector<128x128xbf16>, vector<128x128xbf16>, vector<128x128xf32> -> vector<128x128xf32>
    %130 = arith.addf %124, %129 : vector<128x128xf32>
    %c0_94 = arith.constant 0 : index
    %c0_95 = arith.constant 0 : index
    %131 = vector.load %arg2[%c0_94, %c0_95] : memref<128x128xf32, #tpu.memory_space<vmem>>, vector<128x128xf32>
    %132 = arith.addf %130, %131 : vector<128x128xf32>
    %cst_96 = arith.constant 0.000000e+00 : f32
    %133 = vector.broadcast %cst_96 : f32 to vector<128x128xf32>
    %134 = arith.cmpf ogt, %132, %133 : vector<128x128xf32>
    %135 = vector.broadcast %1 : f32 to vector<128x128xf32>
    %136 = arith.mulf %135, %132 : vector<128x128xf32>
    %137 = arith.select %134, %132, %136 : vector<128x128xi1>, vector<128x128xf32>
    %c0_97 = arith.constant 0 : index
    %c0_98 = arith.constant 0 : index
    %138 = vector.load %arg9[%c0_97, %c0_98] : memref<128x128xf32, #tpu.memory_space<vmem>>, vector<128x128xf32>
    tpu.vector_store %arg9[%c0_97, %c0_98], %137 {strides = array<i32>} : memref<128x128xf32, #tpu.memory_space<vmem>>, vector<128x128xf32>,
    return
  }
  func.func @transform_0(%arg0: i32) -> (i32, i32, i32, i32) {
    %c0_i32 = arith.constant 0 : i32
    %c0_i32_0 = arith.constant 0 : i32
    %c0_i32_1 = arith.constant 0 : i32
    %c0_i32_2 = arith.constant 0 : i32
    return %arg0, %c0_i32, %c0_i32_0, %c0_i32_1 : i32, i32, i32, i32
  }
  func.func @transform_1(%arg0: i32) -> (i32, i32) {
    %c0_i32 = arith.constant 0 : i32
    %c0_i32_0 = arith.constant 0 : i32
    return %arg0, %c0_i32 : i32, i32
  }
  func.func @transform_2(%arg0: i32) -> (i32, i32) {
    %c0_i32 = arith.constant 0 : i32
    %c0_i32_0 = arith.constant 0 : i32
    return %arg0, %c0_i32 : i32, i32
  }
  func.func @transform_3(%arg0: i32) -> (i32, i32, i32) {
    %c0_i32 = arith.constant 0 : i32
    %c0_i32_0 = arith.constant 0 : i32
    %c0_i32_1 = arith.constant 0 : i32
    %c0_i32_2 = arith.constant 0 : i32
    return %c0_i32, %c0_i32_0, %c0_i32_1 : i32, i32, i32
  }
  func.func @transform_4(%arg0: i32) -> (i32, i32) {
    %c0_i32 = arith.constant 0 : i32
    %c0_i32_0 = arith.constant 0 : i32
    %c0_i32_1 = arith.constant 0 : i32
    return %c0_i32, %c0_i32_0 : i32, i32
  }
  func.func @transform_5(%arg0: i32) -> (i32, i32, i32) {
    %c0_i32 = arith.constant 0 : i32
    %c0_i32_0 = arith.constant 0 : i32
    %c0_i32_1 = arith.constant 0 : i32
    %c0_i32_2 = arith.constant 0 : i32
    return %c0_i32, %c0_i32_0, %c0_i32_1 : i32, i32, i32
  }
  func.func @transform_6(%arg0: i32) -> (i32, i32) {
    %c0_i32 = arith.constant 0 : i32
    %c0_i32_0 = arith.constant 0 : i32
    %c0_i32_1 = arith.constant 0 : i32
    return %c0_i32, %c0_i32_0 : i32, i32
  }
  func.func @transform_7(%arg0: i32) -> (i32, i32) {
    %c0_i32 = arith.constant 0 : i32
    %c0_i32_0 = arith.constant 0 : i32
    %c0_i32_1 = arith.constant 0 : i32
    return %c0_i32, %c0_i32_0 : i32, i32
  }
  func.func @transform_8(%arg0: i32) -> (i32, i32) {
    %c0_i32 = arith.constant 0 : i32
    %c0_i32_0 = arith.constant 0 : i32
    return %arg0, %c0_i32 : i32, i32
  }
}

</mosaic_0001>

<bundles_post_ra>
// kernel: tpu_custom_call.1
= control target key start
LH: loop header
LB: loop body
LE: loop exit
PB: predicated region body
PF: predicated region fallthrough
CT: control target
= control target key end

     0   :  { %13 = vsyncpa [#allocation4], 0  ;;  %s8918_s0 = inlined_call_operand.hbm [shape: bf16[2,8,8,128], index: 0, kind: input, shape index: {}]   ;;  %s8919_s1 = inlined_call_operand.hbm [shape: f32[128,128], index: 1, kind: input, shape index: {}]   ;;  %s8920_s2 = inlined_call_operand.hbm [shape: f32[128,128], index: 2, kind: input, shape index: {}]   ;;  %s8921_s3 = inlined_call_operand.hbm [shape: bf16[9,128,128], index: 3, kind: input, shape index: {}]   ;;  %s8922_s4 = inlined_call_operand.vmem [shape: f32[1,128], index: 4, kind: input, shape index: {}]   ;;  %s8923_s5 = inlined_call_operand.hbm [shape: bf16[9,128,128], index: 5, kind: input, shape index: {}]   ;;  %s8924_s6 = inlined_call_operand.vmem [shape: f32[1,128], index: 6, kind: input, shape index: {}]   ;;  %s8925_s7 = inlined_call_operand.vmem [shape: f32[1,2], index: 7, kind: input, shape index: {}]   ;;  %s8926_s8 = inlined_call_operand.hbm [shape: f32[128,128], index: 8, kind: output, shape index: {}]  }
   0x1   :  { %14 = vsyncpa [#allocation8], 0 }
   0x2   :  { %15 = vsyncpa [#allocation11], 0 }
   0x3   :  { %16 = vsyncpa [#allocation6], 0 }
   0x4   :  { %17 = vsyncpa [#allocation5], 0  ;;  %s6910_s27 = smov [#allocation7]  }
   0x5   :  { %s35_s28 = sshll.u32 %s6910_s27, 4  ;;  %s36_s28 = int_to_ptr.vmem [resolvable:$true] %s35_s28 }
   0x6   :  { %s6776_s29 = scalar_lea.vmem %s36_s28, 2048  ;;  %p6781_p1 = scmp.lt.s32.totalorder %s36_s28, %s36_s28 }
   0x7   :  { %p6777_p0 = scmp.ne.s32.totalorder %s36_s28, %s6776_s29  ;;  %p6782_p2 = scmp.lt.s32.totalorder %s6776_s29, %s6776_s29 }
   0x9   :  { %p6783_p3 = por %p6782_p2, %p6781_p1 }
   0xb   :  { %p6784_p4 = pnand %p6783_p3, %p6777_p0 }
   0xd   :  { %6787 = shalt.err (!%p6784_p4)
}
   0xe   :  { %s6911_s30 = smov 128   ;;  %s6912_s9 = smov 8  }
   0xf   :  { %41 = dma.hbm_to_vmem [thread:$0]  %s8919_s1, 2048, %s36_s28, [#allocation8], %s6911_s30, %s6911_s30, %s6912_s9  }
  0x10   :  { %s6913_s12 = smov [#allocation10]   ;;  %s6914_s14 = smov [#allocation3]  }
  0x11   :  { %s59_s13 = sshll.u32 %s6913_s12, 4  ;;  %s23_s15 = sshll.u32 %s6914_s14, 4  ;;  %s60_s13 = int_to_ptr.vmem [resolvable:$true] %s59_s13  ;;  %s24_s15 = int_to_ptr.vmem [resolvable:$true] %s23_s15 }
  0x12   :  { %s6796_s16 = scalar_lea.vmem %s60_s13, 9216  ;;  %p6801_p6 = scmp.lt.s32.totalorder %s60_s13, %s60_s13 }
  0x13   :  { %p6797_p5 = scmp.ne.s32.totalorder %s60_s13, %s6796_s16  ;;  %p6802_p7 = scmp.lt.s32.totalorder %s6796_s16, %s6796_s16 }
  0x15   :  { %p6803_p8 = por %p6802_p7, %p6801_p6 }
  0x17   :  { %p6804_p9 = pnand %p6803_p8, %p6797_p5 }
  0x19   :  { %6807 = shalt.err (!%p6804_p9)
}
  0x1a   :  { %s6915_s17 = smov 64   ;;  %s6916_s18 = smov 4  }
  0x1b   :  { %65 = dma.hbm_to_vmem [thread:$0]  %s8921_s3, 9216, %s60_s13, [#allocation11], %s6915_s17, %s6915_s17, %s6916_s18  }
  0x1c   :  { %s6816_s1 = scalar_lea.vmem %s24_s15, 1024  ;;  %p6821_p11 = scmp.lt.s32.totalorder %s24_s15, %s24_s15 }
  0x1d   :  { %p6817_p10 = scmp.ne.s32.totalorder %s24_s15, %s6816_s1  ;;  %p6822_p12 = scmp.lt.s32.totalorder %s6816_s1, %s6816_s1 }
  0x1f   :  { %p6823_p13 = por %p6822_p12, %p6821_p11 }
  0x21   :  { %p6824_p0 = pnand %p6823_p13, %p6817_p10 }
  0x23   :  { %6827 = shalt.err (!%p6824_p0)
}
  0x24   :  { %29 = dma.hbm_to_vmem [thread:$0]  %s8918_s0, 1024, %s24_s15, [#allocation4], %s6915_s17, %s6915_s17, %s6916_s18  }
  0x25   :  { %s6917_s23 = smov [#allocation9]   ;;  %s6918_s25 = smov [#allocation12]  }
  0x26   :  { %s47_s24 = sshll.u32 %s6917_s23, 4  ;;  %s73_s3 = sshll.u32 %s6918_s25, 4  ;;  %s48_s24 = int_to_ptr.vmem [resolvable:$true] %s47_s24  ;;  %s74_s3 = int_to_ptr.vmem [resolvable:$true] %s73_s3 }
  0x27   :  { %s6836_s26 = scalar_lea.vmem %s48_s24, 2048  ;;  %p6841_p2 = scmp.lt.s32.totalorder %s48_s24, %s48_s24 }
  0x28   :  { %p6837_p1 = scmp.ne.s32.totalorder %s48_s24, %s6836_s26  ;;  %p6842_p3 = scmp.lt.s32.totalorder %s6836_s26, %s6836_s26 }
  0x2a   :  { %p6843_p4 = por %p6842_p3, %p6841_p2 }
  0x2c   :  { %p6844_p5 = pnand %p6843_p4, %p6837_p1 }
  0x2e   :  { %6847 = shalt.err (!%p6844_p5)
}
  0x2f   :  { %53 = dma.hbm_to_vmem [thread:$0]  %s8920_s2, 2048, %s48_s24, [#allocation8], %s6911_s30, %s6911_s30, %s6912_s9  }
  0x30   :  { %s88_s10 = sshll.u32 %s8925_s7, 4  ;;  %s6856_s11 = scalar_lea.vmem %s74_s3, 9216  ;;  %s89_s10 = int_to_ptr.vmem [resolvable:$true] %s88_s10 }
  0x31   :  { %p6857_p6 = scmp.ne.s32.totalorder %s74_s3, %s6856_s11  ;;  %p6861_p7 = scmp.lt.s32.totalorder %s74_s3, %s74_s3 }
  0x32   :  { %p6862_p8 = scmp.lt.s32.totalorder %s6856_s11, %s6856_s11 }
  0x34   :  { %p6863_p9 = por %p6862_p8, %p6861_p7 }
  0x36   :  { %p6864_p10 = pnand %p6863_p9, %p6857_p6 }
  0x38   :  { %6867 = shalt.err (!%p6864_p10)
}
  0x39   :  { %79 = dma.hbm_to_vmem [thread:$0]  %s8923_s5, 9216, %s74_s3, [#allocation11], %s6915_s17, %s6915_s17, %s6916_s18  }
  0x3a   :  { %s6868_s2 = scalar_lea.vmem %s89_s10, 16  ;;  %p6873_p12 = scmp.lt.s32.totalorder %s89_s10, %s89_s10 }
  0x3b   :  { %p6869_p11 = scmp.ne.s32.totalorder %s89_s10, %s6868_s2  ;;  %p6874_p13 = scmp.lt.s32.totalorder %s6868_s2, %s6868_s2 }
  0x3d   :  { %p6875_p0 = por %p6874_p13, %p6873_p12 }
  0x3f   :  { %p6876_p1 = pnand %p6875_p0, %p6869_p11 }
  0x41   :  { %6879 = shalt.err (!%p6876_p1)
}
  0x42   :  { %s6919_s7 = smov [#allocation13]  }
  0x43   :  { %91 = dma.vmem_to_smem %s89_s10, 16, %s6919_s7, [#allocation6]  }
  0x44   :  { %6900 = dma.done.wait [#allocation4], 1024  }
  0x45   :  { %6901 = vsyncadd [#allocation4], 4294966272 }
  0x46   :  { %6902 = dma.done.wait [#allocation8], 4096  }
  0x47   :  { %6903 = vsyncadd [#allocation8], 4294963200 }
  0x48   :  { %6904 = dma.done.wait [#allocation11], 18432  }
  0x49   :  { %6905 = vsyncadd [#allocation11], 4294948864 }
  0x4a   :  { %6906 = dma.done.wait [#allocation6], 16  }
  0x4b   :  { %6907 = vsyncadd [#allocation6], 4294967280 }
  0x4c   :  { %110 = sfence }
  0x4d   :  { %v6596_v0 = vld [vmem:[#allocation10 + $0x38] sm:$0xff]   ;;  %v6920_v2 = vmov 0   ;;  %v6598_v3 = vld [vmem:[#allocation10 + $0x30] sm:$0xff]   ;;  %v6600_v5 = vld [vmem:[#allocation10 + $0x28] sm:$0xff]   ;;  %vm335_vm0 = vcmask 1043456   ;;  %vm341_vm1 = vcmask 1040384  }
  0x4e   :  { %v6597_v1 = vld [vmem:[#allocation10 + $0x78] sm:$0xff]   ;;  %118 = vst [vmem:[#allocation2] sm:$0xf] %v6920_v2  ;;  %120 = vst [vmem:[#allocation2 + $0x8] sm:$0xf] %v6920_v2  ;;  %6008 = vmatprep.subr.bf16.mxu0 %v6596_v0  ;;  %v6599_v4 = vld [vmem:[#allocation10 + $0x70] sm:$0xff]  }
  0x4f   :  { %119 = vst [vmem:[#allocation2 + $0x4] sm:$0x1] %v6920_v2  ;;  %121 = vst [vmem:[#allocation2 + $0xc] sm:$0x1] %v6920_v2  ;;  %6009 = vmatpush3.bf16.msra.mxu0 %v6596_v0  ;;  %6040 = vmatprep.subr.bf16.mxu1 %v6597_v1  ;;  %v6601_v6 = vld [vmem:[#allocation10 + $0x68] sm:$0xff]   ;;  %v6602_v7 = vld [vmem:[#allocation10 + $0x20] sm:$0xff]  }
  0x50   :  { %122 = vst [vmem:[#allocation2 + $0x10] sm:$0xf] %v6920_v2  ;;  %123 = vst [vmem:[#allocation2 + $0x14] sm:$0x1] %v6920_v2  ;;  %6041 = vmatpush3.bf16.msra.mxu1 %v6597_v1  ;;  %6010 = vmatprep.subr.bf16.mxu0 %v6598_v3  ;;  %v6603_v8 = vld [vmem:[#allocation10 + $0x60] sm:$0xff]   ;;  %v6604_v9 = vld [vmem:[#allocation10 + $0x18] sm:$0xff]  }
  0x51   :  { %124 = vst [vmem:[#allocation2 + $0x18] sm:$0xf] %v6920_v2  ;;  %125 = vst [vmem:[#allocation2 + $0x1c] sm:$0x1] %v6920_v2  ;;  %6042 = vmatprep.subr.bf16.mxu1 %v6599_v4  ;;  %v6605_v10 = vld [vmem:[#allocation10 + $0x58] sm:$0xff]   ;;  %v6606_v11 = vld [vmem:[#allocation10 + $0x10] sm:$0xff]  }
  0x52   :  { %126 = vst [vmem:[#allocation2 + $0x20] sm:$0xf] %v6920_v2  ;;  %127 = vst [vmem:[#allocation2 + $0x24] sm:$0x1] %v6920_v2  ;;  %v6607_v12 = vld [vmem:[#allocation10 + $0x50] sm:$0xff]   ;;  %v6608_v18 = vld [vmem:[#allocation10 + $0x8] sm:$0xff]  }
  0x53   :  { %128 = vst [vmem:[#allocation2 + $0x28] sm:$0xf] %v6920_v2  ;;  %129 = vst [vmem:[#allocation2 + $0x2c] sm:$0x1] %v6920_v2  ;;  %6011 = vmatpush3.bf16.msra.mxu0 %v6598_v3  ;;  %v158_v13 = vld [vmem:[#allocation3] sm:$0xf] }
  0x54   :  { %130 = vst [vmem:[#allocation2 + $0x30] sm:$0xf] %v6920_v2  ;;  %131 = vst [vmem:[#allocation2 + $0x34] sm:$0x1] %v6920_v2  ;;  %6043 = vmatpush3.bf16.msra.mxu1 %v6599_v4  ;;  %6012 = vmatprep.subr.bf16.mxu0 %v6600_v5  ;;  %vm336_vm2 = vsmask.f32 7938 }
  0x55   :  { %132 = vst [vmem:[#allocation2 + $0x38] sm:$0xf] %v6920_v2  ;;  %133 = vst [vmem:[#allocation2 + $0x3c] sm:$0x1] %v6920_v2  ;;  %6044 = vmatprep.subr.bf16.mxu1 %v6601_v6  ;;  %v175_v14 = vshrl.u32 %v158_v13, 16  ;;  %v178_v15 = vshll.u32 %v158_v13, 16 }
  0x56   :  { %134 = vst [vmem:[#allocation2 + $0x40] sm:$0xf] %v6920_v2  ;;  %135 = vst [vmem:[#allocation2 + $0x44] sm:$0x1] %v6920_v2  ;;  %v7000_v16 = vld [vmem:[#allocation2] sm:$0xf] }
  0x57   :  { %136 = vst [vmem:[#allocation2 + $0x48] sm:$0xf] %v6920_v2  ;;  %137 = vst [vmem:[#allocation2 + $0x4c] sm:$0x1] %v6920_v2  ;;  %6013 = vmatpush3.bf16.msra.mxu0 %v6600_v5  ;;  %v159_v17 = vld [vmem:[#allocation3 + $0x4] sm:$0xf] }
  0x58   :  { %138 = vst [vmem:[#allocation2 + $0x50] sm:$0xf] %v6920_v2  ;;  %139 = vst [vmem:[#allocation2 + $0x54] sm:$0x1] %v6920_v2  ;;  %6045 = vmatpush3.bf16.msra.mxu1 %v6601_v6  ;;  %6014 = vmatprep.subr.bf16.mxu0 %v6602_v7  ;;  %v338_v19 = vld [vmem:[#allocation2 + $0x8] sm:$0xf] }
  0x59   :  { %140 = vst [vmem:[#allocation2 + $0x58] sm:$0xf] %v6920_v2  ;;  %141 = vst [vmem:[#allocation2 + $0x5c] sm:$0x1] %v6920_v2  ;;  %6046 = vmatprep.subr.bf16.mxu1 %v6603_v8  ;;  %v713_v20 = vshrl.u32 %v7000_v16, 16  ;;  %v183_v22 = vshrl.u32 %v159_v17, 16 }
  0x5a   :  { %142 = vst [vmem:[#allocation2 + $0x60] sm:$0xf] %v6920_v2  ;;  %143 = vst [vmem:[#allocation2 + $0x64] sm:$0x1] %v6920_v2  ;;  %v160_v21 = vld [vmem:[#allocation3 + $0x8] sm:$0xf] }
  0x5b   :  { %144 = vst [vmem:[#allocation2 + $0x68] sm:$0xf] %v6920_v2  ;;  %145 = vst [vmem:[#allocation2 + $0x6c] sm:$0x1] %v6920_v2  ;;  %6015 = vmatpush3.bf16.msra.mxu0 %v6602_v7  ;;  %v6609_v23 = vld [vmem:[#allocation10 + $0x48] sm:$0xff]   ;;  %v177_v24 = vrot.slane %v175_v14, 7 }
  0x5c   :  { %146 = vst [vmem:[#allocation2 + $0x70] sm:$0xf] %v6920_v2  ;;  %147 = vst [vmem:[#allocation2 + $0x74] sm:$0x1] %v6920_v2  ;;  %6047 = vmatpush3.bf16.msra.mxu1 %v6603_v8  ;;  %6016 = vmatprep.subr.bf16.mxu0 %v6604_v9  ;;  %v186_v25 = vshll.u32 %v159_v17, 16  ;;  %v191_v26 = vshrl.u32 %v160_v21, 16 }
  0x5d   :  { %148 = vst [vmem:[#allocation2 + $0x78] sm:$0xf] %v6920_v2  ;;  %149 = vst [vmem:[#allocation2 + $0x7c] sm:$0x1] %v6920_v2  ;;  %6048 = vmatprep.subr.bf16.mxu1 %v6605_v10  ;;  %v194_v27 = vshll.u32 %v160_v21, 16  ;;  %v8961_v29 = vmov 0  ;;  %v180_v33 = vor.u32 %v178_v15, %v177_v24 }
  0x5e   :  { %150 = vst [vmem:[#allocation2 + $0x80] sm:$0xf] %v6920_v2  ;;  %151 = vst [vmem:[#allocation2 + $0x84] sm:$0x1] %v6920_v2  ;;  %v347_v28 = vld [vmem:[#allocation2 + $0x10] sm:$0xf] }
  0x5f   :  { %152 = vst [vmem:[#allocation2 + $0x88] sm:$0xf] %v6920_v2  ;;  %153 = vst [vmem:[#allocation2 + $0x8c] sm:$0x1] %v6920_v2  ;;  %6017 = vmatpush3.bf16.msra.mxu0 %v6604_v9  ;;  %v716_v30 = vshll.u32 %v7000_v16, 16  ;;  %v185_v31 = vrot.slane %v183_v22, 7 }
  0x60   :  { %154 = vst [vmem:[#allocation2 + $0x90] sm:$0xf] %v6920_v2  ;;  %155 = vst [vmem:[#allocation2 + $0x94] sm:$0x1] %v6920_v2  ;;  %6049 = vmatpush3.bf16.msra.mxu1 %v6605_v10  ;;  %6018 = vmatprep.subr.bf16.mxu0 %v6606_v11  ;;  %v353_v32 = vld [vmem:[#allocation2 + $0x18] sm:$0xf] }
  0x61   :  { %156 = vst [vmem:[#allocation2 + $0x98] sm:$0xf] %v6920_v2  ;;  %157 = vst [vmem:[#allocation2 + $0x9c] sm:$0x1] %v6920_v2  ;;  %6050 = vmatprep.subr.bf16.mxu1 %v6607_v12  ;;  %v193_v34 = vrot.slane %v191_v26, 7  ;;  %v181_v35 = vrot.slane %v177_v24, 4  ;;  %v188_v36 = vor.u32 %v186_v25, %v185_v31 }
  0x62   :  { %vm7005_vm3 = vmand %vm335_vm0, %vm336_vm2  ;;  %vm342_vm4 = vsmask.f32 256  ;;  %v189_v37 = vrot.slane %v185_v31, 4  ;;  %v8964_v38 = vmov 0  ;;  %v344_v39 = vld [vmem:[#allocation2 + $0xc] sm:$0x1] }
  0x63   :  { %v8962_v29 = vsel %vm7005_vm3, 4294967295, %v8961_v29  ;;  %vm7011_vm5 = vmand %vm341_vm1, %vm342_vm4  ;;  %v350_v40 = vld [vmem:[#allocation2 + $0x14] sm:$0x1]  ;;  %v715_v41 = vrot.slane %v713_v20, 4  ;;  %6019 = vmatpush3.bf16.msra.mxu0 %v6606_v11  ;;  %v6610_v42 = vld [vmem:[#allocation10] sm:$0xff]   ;;  %v339_v43 = vsel %vm7005_vm3, %v180_v33, %v338_v19  ;;  %v196_v44 = vor.u32 %v194_v27, %v193_v34  ;;  %s6921_s17 = smov [#allocation14]  }
  0x64   :  { %8963 = vst [vmem:[#allocation20_spill] sm:$0xff] %v8962_v29  ;;  %v8965_v38 = vsel %vm7011_vm5, 4294967295, %v8964_v38  ;;  %v345_v45 = vsel %vm7011_vm5, %v181_v35, %v344_v39  ;;  %v7019_v46 = vld [vmem:[#allocation2 + $0x4] sm:$0x1]  ;;  %vm709_vm6 = vsmask.f32 3328  ;;  %6051 = vmatpush3.bf16.msra.mxu1 %v6607_v12  ;;  %6020 = vmatprep.subr.bf16.mxu0 %v6608_v18  ;;  %v348_v48 = vsel %vm7005_vm3, %v188_v36, %v347_v28 }
  0x65   :  { %8966 = vst [vmem:[#allocation21_spill] sm:$0xff] %v8965_v38  ;;  %v6611_v47 = vld [vmem:[#allocation10 + $0x40] sm:$0xff]   ;;  %340 = vst [vmem:[#allocation2 + $0x8] sm:$0xf] %v339_v43  ;;  %v351_v49 = vsel %vm7011_vm5, %v189_v37, %v350_v40  ;;  %v718_v50 = vrot.slane %v716_v30, 5  ;;  %6052 = vmatprep.subr.bf16.mxu1 %v6609_v23  ;;  %v354_v52 = vsel %vm7005_vm3, %v196_v44, %v353_v32  ;;  %v722_v53 = vshll.u32 %v7019_v46, 16 }
  0x66   :  { %346 = vst [vmem:[#allocation2 + $0xc] sm:$0x1] %v345_v45  ;;  %v356_v51 = vld [vmem:[#allocation2 + $0x1c] sm:$0x1]  ;;  %349 = vst [vmem:[#allocation2 + $0x10] sm:$0xf] %v348_v48 }
  0x67   :  { %352 = vst [vmem:[#allocation2 + $0x14] sm:$0x1] %v351_v49  ;;  %vm710_vm7 = vsmask.f32 7440  ;;  %v197_v54 = vrot.slane %v193_v34, 4  ;;  %v719_v55 = vor.u32 %v718_v50, %v715_v41  ;;  %6021 = vmatpush3.bf16.msra.mxu0 %v6608_v18  ;;  %v7028_v56 = vrot.slane %v722_v53, 5 }
  0x68   :  { %355 = vst [vmem:[#allocation2 + $0x18] sm:$0xf] %v354_v52  ;;  %v161_v58 = vld [vmem:[#allocation3 + $0xc] sm:$0xf]  ;;  %6053 = vmatpush3.bf16.msra.mxu1 %v6609_v23  ;;  %6022 = vmatprep.subr.bf16.mxu0 %v6610_v42  ;;  %v6614_v59 = vld [vmem:[#allocation10 + $0xb8] sm:$0xff]   ;;  %vm7033_vm8 = vmor %vm709_vm6, %vm710_vm7  ;;  %vm1162_vm9 = vcmask 1042432  }
  0x69   :  { %v357_v57 = vsel %vm7011_vm5, %v197_v54, %v356_v51  ;;  %v7037_v61 = vrot.slane %v719_v55, 4  ;;  %v162_v62 = vld [vmem:[#allocation3 + $0x10] sm:$0xf]  ;;  %v199_v63 = vshrl.u32 %v161_v58, 16  ;;  %v202_v0 = vshll.u32 %v161_v58, 16  ;;  %6054 = vmatprep.subr.bf16.mxu1 %v6611_v47  ;;  %v7039_v1 = vld [vmem:[#allocation10 + $0xf8] sm:$0xff]  }
  0x6a   :  { %358 = vst [vmem:[#allocation2 + $0x1c] sm:$0x1] %v357_v57  ;;  %v207_v2 = vshrl.u32 %v162_v62, 16  ;;  %v7045_v6 = vld [vmem:[#allocation3 + $0x14] sm:$0xf]  ;;  %v210_v11 = vshll.u32 %v162_v62, 16 }
  0x6b   :  { %v7043_v5 = vrot.slane %v199_v63, 7  ;;  %6023 = vmatpush3.bf16.msra.mxu0 %v6610_v42  ;;  %v725_v9 = vsel %vm7033_vm8, %v7037_v61, %v7028_v56  ;;  %v359_v19 = vld [vmem:[#allocation2 + $0x20] sm:$0xf]  ;;  %v6616_v28 = vld [vmem:[#allocation10 + $0xb0] sm:$0xff]   ;;  %v365_v30 = vld [vmem:[#allocation2 + $0x28] sm:$0xf] }
  0x6c   :  { %v7047_v7 = vld [vmem:[#allocation2 + $0x8] sm:$0xf]  ;;  %v7055_v10 = vrot.slane %v207_v2, 7  ;;  %6055 = vmatpush3.bf16.msra.mxu1 %v6611_v47  ;;  %6072 = vmatprep.subr.bf16.mxu0 %v6614_v59  ;;  %v215_v31 = vshrl.u32 %v7045_v6, 16  ;;  %v164_v42 = vld [vmem:[#allocation3 + $0x18] sm:$0xf] }
  0x6d   :  { %v7049_v8 = vld [vmem:[#allocation2 + $0xc] sm:$0x1]  ;;  %v5394_v12 = vcombine.low %v7000_v16, %v7047_v7  ;;  %v7059_v13 = vld [vmem:[#allocation2 + $0x10] sm:$0xf]  ;;  %v727_v15 = vshrl.u32 %v7047_v7, 16  ;;  %v730_v17 = vshll.u32 %v7047_v7, 16  ;;  %v204_v18 = vor.u32 %v202_v0, %v7043_v5  ;;  %6104 = vmatprep.subr.bf16.mxu1 %v7039_v1 }
  0x6e   :  { %v7061_v14 = vld [vmem:[#allocation2 + $0x14] sm:$0x1]  ;;  %v736_v21 = vshll.u32 %v7049_v8, 16  ;;  %v741_v22 = vshrl.u32 %v7059_v13, 16  ;;  %v744_v23 = vshll.u32 %v7059_v13, 16  ;;  %v212_v45 = vor.u32 %v210_v11, %v7055_v10  ;;  %v6620_v48 = vld [vmem:[#allocation10 + $0xa8] sm:$0xff]  }
  0x6f   :  { %v7066_v20 = vld [vmem:[#allocation2 + $0x18] sm:$0xf]  ;;  %v750_v24 = vshll.u32 %v7061_v14, 16  ;;  %6024 = vmatprep.mubr.bf16.mxu0 %v5394_v12  ;;  %v729_v26 = vrot.slane %v727_v15, 4  ;;  %v732_v27 = vrot.slane %v730_v17, 5  ;;  %v360_v47 = vsel %vm7005_vm3, %v204_v18, %v359_v19  ;;  %v6635_v3 = vld [vmem:[#allocation10 + $0xc0] sm:$0xff]  }
  0x70   :  { %v7075_v25 = vcombine.low %v7059_v13, %v7066_v20  ;;  %v738_v32 = vrot.slane %v736_v21, 5  ;;  %v743_v33 = vrot.slane %v741_v22, 4  ;;  %v746_v34 = vrot.slane %v744_v23, 5  ;;  %361 = vst [vmem:[#allocation2 + $0x20] sm:$0xf] %v360_v47  ;;  %s5378_s18 = sshll.u32 %s6921_s17, 4  ;;  %s5379_s18 = int_to_ptr.vmem [resolvable:$true] %s5378_s18 }
  0x71   :  { %v7079_v36 = vld [vmem:[#allocation2 + $0x1c] sm:$0x1]  ;;  %v733_v37 = vor.u32 %v732_v27, %v729_v26  ;;  %v755_v39 = vshrl.u32 %v7066_v20, 16  ;;  %v758_v40 = vshll.u32 %v7066_v20, 16  ;;  %v752_v44 = vrot.slane %v750_v24, 5  ;;  %v6622_v27 = vld [vmem:[#allocation10 + $0xa0] sm:$0xff]   ;;  %p6885_p3 = scmp.lt.s32.totalorder %s5379_s18, %s5379_s18 }
  0x72   :  { %8969 = vst [vmem:[#allocation22_spill] sm:$0xff] %v7075_v25  ;;  %6025 = vmatmul.mubr.bf16.vlgmr.msra.gmra.mxu0 %v7075_v25  ;;  %v764_v41 = vshll.u32 %v7079_v36, 16  ;;  %v747_v43 = vor.u32 %v746_v34, %v743_v33  ;;  %v371_v53 = vld [vmem:[#allocation2 + $0x30] sm:$0xf]  ;;  %v366_v55 = vsel %vm7005_vm3, %v212_v45, %v365_v30  ;;  %v217_v57 = vrot.slane %v215_v31, 7  ;;  %s6880_s19 = scalar_lea.vmem %s5379_s18, 2048 }
  0x73   :  { %6073 = vmatpush3.bf16.msra.mxu0 %v6614_v59  ;;  %v734_v49 = vrot.slane %v733_v37, 4  ;;  %v757_v50 = vrot.slane %v755_v39, 4  ;;  %v760_v51 = vrot.slane %v758_v40, 5  ;;  %v218_v58 = vshll.u32 %v7045_v6, 16  ;;  %v362_v59 = vld [vmem:[#allocation2 + $0x24] sm:$0x1]  ;;  %p6881_p2 = scmp.ne.s32.totalorder %s5379_s18, %s6880_s19  ;;  %p6886_p4 = scmp.lt.s32.totalorder %s6880_s19, %s6880_s19 }
  0x74   :  { %v766_v52 = vrot.slane %v764_v41, 5  ;;  %6074 = vmatprep.subr.bf16.mxu0 %v6616_v28  ;;  %v748_v54 = vrot.slane %v747_v43, 4  ;;  %367 = vst [vmem:[#allocation2 + $0x28] sm:$0xf] %v366_v55  ;;  %v223_v0 = vshrl.u32 %v164_v42, 16  ;;  %v226_v2 = vshll.u32 %v164_v42, 16 }
  0x75   :  { %v7093_v62 = vsel %vm7033_vm8, %v734_v49, %v738_v32  ;;  %v761_v63 = vor.u32 %v760_v51, %v757_v50  ;;  %v368_v11 = vld [vmem:[#allocation2 + $0x2c] sm:$0x1]  ;;  %v374_v12 = vld [vmem:[#allocation2 + $0x34] sm:$0x1]  ;;  %v220_v17 = vor.u32 %v218_v58, %v217_v57  ;;  %v377_v18 = vld [vmem:[#allocation2 + $0x38] sm:$0xf]  ;;  %p6887_p5 = por %p6886_p4, %p6885_p3 }
  0x76   :  { %v7097_v15 = vsel %vm7033_vm8, %v748_v54, %v752_v44  ;;  %v5411_v6 = vcombine.low %v725_v9, %v7093_v62  ;;  %v205_v19 = vrot.slane %v7043_v5, 4  ;;  %v380_v21 = vld [vmem:[#allocation2 + $0x3c] sm:$0x1]  ;;  %v225_v24 = vrot.slane %v223_v0, 7  ;;  %v166_v32 = vld [vmem:[#allocation3 + $0x20] sm:$0xf] }
  0x77   :  { %6075 = vmatpush3.bf16.msra.mxu0 %v6616_v28  ;;  %v762_v23 = vrot.slane %v761_v63, 4  ;;  %v213_v26 = vrot.slane %v7055_v10, 4  ;;  %v372_v56 = vsel %vm7005_vm3, %v220_v17, %v371_v53  ;;  %v221_v5 = vrot.slane %v217_v57, 4  ;;  %v6617_v34 = vld [vmem:[#allocation10 + $0xf0] sm:$0xff]   ;;  %v7124_v37 = vld [vmem:[#allocation2 + $0x20] sm:$0xf]  ;;  %p6888_p6 = pnand %p6887_p5, %p6881_p2 }
  0x78   :  { %6076 = vmatprep.subr.bf16.mxu0 %v6620_v48  ;;  %6056 = vmatprep.mubr.bf16.mxu1 %v5411_v6  ;;  %v363_v61 = vsel %vm7011_vm5, %v205_v19, %v362_v59  ;;  %v228_v28 = vor.u32 %v226_v2, %v225_v24  ;;  %373 = vst [vmem:[#allocation2 + $0x30] sm:$0xf] %v372_v56  ;;  %v229_v31 = vrot.slane %v225_v24, 4  ;;  %v239_v40 = vshrl.u32 %v166_v32, 16  ;;  %v6626_v42 = vld [vmem:[#allocation10 + $0x98] sm:$0xff]   ;;  %v6628_v24 = vld [vmem:[#allocation10 + $0x90] sm:$0xff]  }
  0x79   :  { %v7116_v9 = vsel %vm7033_vm8, %v762_v23, %v766_v52  ;;  %364 = vst [vmem:[#allocation2 + $0x24] sm:$0x1] %v363_v61  ;;  %v369_v10 = vsel %vm7011_vm5, %v213_v26, %v368_v11  ;;  %v375_v39 = vsel %vm7011_vm5, %v221_v5, %v374_v12  ;;  %v242_v41 = vshll.u32 %v166_v32, 16  ;;  %v389_v49 = vld [vmem:[#allocation2 + $0x58] sm:$0xf]  ;;  %v6621_v11 = vld [vmem:[#allocation10 + $0xe8] sm:$0xff]  }
  0x7a   :  { %v7122_v33 = vcombine.low %v7097_v15, %v7116_v9  ;;  %370 = vst [vmem:[#allocation2 + $0x2c] sm:$0x1] %v369_v10  ;;  %v378_v43 = vsel %vm7005_vm3, %v228_v28, %v377_v18  ;;  %v769_v44 = vshrl.u32 %v7124_v37, 16  ;;  %v772_v45 = vshll.u32 %v7124_v37, 16  ;;  %376 = vst [vmem:[#allocation2 + $0x34] sm:$0x1] %v375_v39 }
  0x7b   :  { %6077 = vmatpush3.bf16.msra.mxu0 %v6620_v48  ;;  %v381_v47 = vsel %vm7011_vm5, %v229_v31, %v380_v21  ;;  %v7134_v48 = vld [vmem:[#allocation2 + $0x50] sm:$0xf]  ;;  %v167_v50 = vld [vmem:[#allocation3 + $0x24] sm:$0xf]  ;;  %v7137_v51 = vld [vmem:[#allocation2 + $0x28] sm:$0xf] }
  0x7c   :  { %8970 = vst [vmem:[#allocation23_spill] sm:$0xff] %v7122_v33  ;;  %6078 = vmatprep.subr.bf16.mxu0 %v6622_v27  ;;  %6057 = vmatmul.mubr.bf16.vlgmr.msra.gmra.mxu1 %v7122_v33  ;;  %379 = vst [vmem:[#allocation2 + $0x38] sm:$0xf] %v378_v43  ;;  %v7139_v52 = vrot.slane %v239_v40, 7  ;;  %v825_v53 = vshrl.u32 %v7134_v48, 16  ;;  %v828_v54 = vshll.u32 %v7134_v48, 16  ;;  %v7146_v57 = vcombine.low %v7124_v37, %v7137_v51 }
  0x7d   :  { %382 = vst [vmem:[#allocation2 + $0x3c] sm:$0x1] %v381_v47  ;;  %v247_v55 = vshrl.u32 %v167_v50, 16  ;;  %6105 = vmatpush3.bf16.msra.mxu1 %v7039_v1  ;;  %v771_v58 = vrot.slane %v769_v44, 4  ;;  %v774_v59 = vrot.slane %v772_v45, 5  ;;  %v783_v63 = vshrl.u32 %v7137_v51, 16 }
  0x7e   :  { %8971 = vst [vmem:[#allocation24_spill] sm:$0xff] %v7146_v57  ;;  %v7149_v0 = vld [vmem:[#allocation3 + $0x28] sm:$0xf]  ;;  %6106 = vmatprep.subr.bf16.mxu1 %v6617_v34  ;;  %v786_v2 = vshll.u32 %v7137_v51, 16  ;;  %v244_v12 = vor.u32 %v242_v41, %v7139_v52  ;;  %v250_v1 = vshll.u32 %v167_v50, 16  ;;  %6028 = vmatprep.mubr.bf16.mxu0 %v7146_v57  ;;  %v6623_v61 = vld [vmem:[#allocation10 + $0xe0] sm:$0xff]  }
  0x7f   :  { %6079 = vmatpush3.bf16.msra.mxu0 %v6622_v27  ;;  %v7153_v6 = vrot.slane %v247_v55, 7  ;;  %v775_v17 = vor.u32 %v774_v59, %v771_v58  ;;  %v785_v18 = vrot.slane %v783_v63, 4  ;;  %v255_v19 = vshrl.u32 %v7149_v0, 16  ;;  %v395_v23 = vld [vmem:[#allocation2 + $0x60] sm:$0xf] }
  0x80   :  { %v258_v21 = vshll.u32 %v7149_v0, 16  ;;  %6080 = vmatprep.subr.bf16.mxu0 %v6626_v42  ;;  %v7158_v26 = vld [vmem:[#allocation2 + $0x30] sm:$0xf]  ;;  %v7160_v56 = vld [vmem:[#allocation2 + $0x24] sm:$0x1]  ;;  %v788_v27 = vrot.slane %v786_v2, 5  ;;  %v390_v5 = vsel %vm7005_vm3, %v244_v12, %v389_v49 }
  0x81   :  { %v252_v28 = vor.u32 %v250_v1, %v7153_v6  ;;  %v245_v10 = vrot.slane %v7139_v52, 4  ;;  %6107 = vmatpush3.bf16.msra.mxu1 %v6617_v34  ;;  %v7166_v31 = vld [vmem:[#allocation2 + $0x2c] sm:$0x1]  ;;  %v776_v32 = vrot.slane %v775_v17, 4  ;;  %v778_v39 = vshll.u32 %v7160_v56, 16 }
  0x82   :  { %v797_v40 = vshrl.u32 %v7158_v26, 16  ;;  %v800_v41 = vshll.u32 %v7158_v26, 16  ;;  %391 = vst [vmem:[#allocation2 + $0x58] sm:$0xf] %v390_v5  ;;  %v789_v43 = vor.u32 %v788_v27, %v785_v18  ;;  %v792_v44 = vshll.u32 %v7166_v31, 16  ;;  %6108 = vmatprep.subr.bf16.mxu1 %v6621_v11  ;;  %v6632_v2 = vld [vmem:[#allocation10 + $0x88] sm:$0xff]  }
  0x83   :  { %v7172_v45 = vld [vmem:[#allocation2 + $0x34] sm:$0x1]  ;;  %v7174_v47 = vrot.slane %v255_v19, 7  ;;  %v396_v34 = vsel %vm7005_vm3, %v252_v28, %v395_v23  ;;  %6081 = vmatpush3.bf16.msra.mxu0 %v6626_v42  ;;  %v7178_v49 = vld [vmem:[#allocation2 + $0x38] sm:$0xf]  ;;  %v780_v50 = vrot.slane %v778_v39, 5 }
  0x84   :  { %v7180_v52 = vld [vmem:[#allocation2 + $0x3c] sm:$0x1]  ;;  %v799_v55 = vrot.slane %v797_v40, 4  ;;  %397 = vst [vmem:[#allocation2 + $0x60] sm:$0xf] %v396_v34  ;;  %6082 = vmatprep.subr.bf16.mxu0 %v6628_v24  ;;  %v7184_v58 = vcombine.low %v7158_v26, %v7178_v49  ;;  %v790_v59 = vrot.slane %v789_v43, 4 }
  0x85   :  { %v794_v63 = vrot.slane %v792_v44, 5  ;;  %v802_v0 = vrot.slane %v800_v41, 5  ;;  %v7188_v12 = vsel %vm7033_vm8, %v776_v32, %v780_v50  ;;  %v806_v42 = vshll.u32 %v7172_v45, 16  ;;  %6109 = vmatpush3.bf16.msra.mxu1 %v6621_v11  ;;  %v392_v18 = vld [vmem:[#allocation2 + $0x5c] sm:$0x1]  ;;  %v6634_v44 = vld [vmem:[#allocation10 + $0x80] sm:$0xff]  }
  0x86   :  { %8972 = vst [vmem:[#allocation25_spill] sm:$0xff] %v7184_v58  ;;  %8973 = vst [vmem:[#allocation26_spill] sm:$0xff] %v7188_v12  ;;  %v811_v1 = vshrl.u32 %v7178_v49, 16  ;;  %v814_v17 = vshll.u32 %v7178_v49, 16  ;;  %6029 = vmatmul.mubr.bf16.gmra.mxu0 %v7184_v58  ;;  %v820_v5 = vshll.u32 %v7180_v52, 16  ;;  %6110 = vmatprep.subr.bf16.mxu1 %v6623_v61  ;;  %v6627_v32 = vld [vmem:[#allocation10 + $0xd8] sm:$0xff]  }
  0x87   :  { %v7196_v19 = vsel %vm7033_vm8, %v790_v59, %v794_v63  ;;  %v803_v27 = vor.u32 %v802_v0, %v799_v55  ;;  %v401_v28 = vld [vmem:[#allocation2 + $0x68] sm:$0xf]  ;;  %v808_v11 = vrot.slane %v806_v42, 5  ;;  %v7205_v43 = vld [vmem:[#allocation2 + $0x54] sm:$0x1]  ;;  %6083 = vmatpush3.bf16.msra.mxu0 %v6628_v24  ;;  %v260_v55 = vor.u32 %v258_v21, %v7174_v47 }
  0x88   :  { %v7203_v39 = vcombine.low %v7188_v12, %v7196_v19  ;;  %v813_v40 = vrot.slane %v811_v1, 4  ;;  %v816_v41 = vrot.slane %v814_v17, 5  ;;  %v822_v50 = vrot.slane %v820_v5, 5  ;;  %v398_v0 = vld [vmem:[#allocation2 + $0x64] sm:$0x1]  ;;  %v7212_v23 = vld [vmem:[#allocation10 + $0xd0] sm:$0xff]   ;;  %6084 = vmatprep.subr.bf16.mxu0 %v6632_v2 }
  0x89   :  { %v804_v34 = vrot.slane %v803_v27, 4  ;;  %v7207_v59 = vld [vmem:[#allocation2 + $0x58] sm:$0xf]  ;;  %v393_v63 = vsel %vm7011_vm5, %v245_v10, %v392_v18  ;;  %6111 = vmatpush3.bf16.msra.mxu1 %v6623_v61  ;;  %v827_v1 = vrot.slane %v825_v53, 4  ;;  %v830_v21 = vrot.slane %v828_v54, 5 }
  0x8a   :  { %8974 = vst [vmem:[#allocation27_spill] sm:$0xff] %v7203_v39  ;;  %6060 = vmatprep.mubr.bf16.mxu1 %v7203_v39  ;;  %v817_v42 = vor.u32 %v816_v41, %v813_v40  ;;  %v5398_v24 = vcombine.low %v7134_v48, %v7207_v59  ;;  %394 = vst [vmem:[#allocation2 + $0x5c] sm:$0x1] %v393_v63  ;;  %v404_v17 = vld [vmem:[#allocation2 + $0x6c] sm:$0x1]  ;;  %v402_v18 = vsel %vm7005_vm3, %v260_v55, %v401_v28  ;;  %vm1163_vm10 = vcmask 1046532  }
  0x8b   :  { %v7223_v10 = vsel %vm7033_vm8, %v804_v34, %v808_v11  ;;  %v7227_v27 = vld [vmem:[#allocation2 + $0x60] sm:$0xf]  ;;  %v834_v5 = vshll.u32 %v7205_v43, 16  ;;  %v839_v61 = vshrl.u32 %v7207_v59, 16  ;;  %6112 = vmatprep.subr.bf16.mxu1 %v6627_v32  ;;  %403 = vst [vmem:[#allocation2 + $0x68] sm:$0xf] %v402_v18  ;;  %v831_v53 = vor.u32 %v830_v21, %v827_v1  ;;  %6085 = vmatpush3.bf16.msra.mxu0 %v6632_v2  ;;  %vm7315_vm11 = vmor %vm1162_vm9, %vm1163_vm10 }
  0x8c   :  { %v818_v40 = vrot.slane %v817_v42, 4  ;;  %6032 = vmatprep.mubr.bf16.mxu0 %v5398_v24  ;;  %v842_v54 = vshll.u32 %v7207_v59, 16  ;;  %v253_v41 = vrot.slane %v7153_v6, 4  ;;  %v7233_v11 = vld [vmem:[#allocation10 + $0x138] sm:$0xff]   ;;  %v261_v55 = vrot.slane %v7174_v47, 4  ;;  %6086 = vmatprep.subr.bf16.mxu0 %v6634_v44 }
  0x8d   :  { %v7235_v34 = vrot.slane %v834_v5, 5  ;;  %v841_v28 = vrot.slane %v839_v61, 4  ;;  %v853_v63 = vshrl.u32 %v7227_v27, 16  ;;  %v832_v24 = vrot.slane %v831_v53, 4  ;;  %6113 = vmatpush3.bf16.msra.mxu1 %v6627_v32  ;;  %v169_v2 = vld [vmem:[#allocation3 + $0x2c] sm:$0xf] }
  0x8e   :  { %v7241_v42 = vsel %vm7033_vm8, %v818_v40, %v822_v50  ;;  %v844_v1 = vrot.slane %v842_v54, 5  ;;  %v399_v6 = vsel %vm7011_vm5, %v253_v41, %v398_v0  ;;  %v170_v21 = vld [vmem:[#allocation3 + $0x30] sm:$0xf]  ;;  %v405_v47 = vsel %vm7011_vm5, %v261_v55, %v404_v17  ;;  %6114 = vmatprep.subr.bf16.mxu1 %v7212_v23  ;;  %v6633_v61 = vld [vmem:[#allocation10 + $0xc8] sm:$0xff]   ;;  %v171_v54 = vld [vmem:[#allocation3 + $0x34] sm:$0xf] }
  0x8f   :  { %8975 = vst [vmem:[#allocation28_spill] sm:$0xff] %v7241_v42  ;;  %v7247_v18 = vcombine.low %v7223_v10, %v7241_v42  ;;  %400 = vst [vmem:[#allocation2 + $0x64] sm:$0x1] %v399_v6  ;;  %v855_v5 = vrot.slane %v853_v63, 4  ;;  %v856_v50 = vshll.u32 %v7227_v27, 16  ;;  %v837_v32 = vsel %vm7033_vm8, %v832_v24, %v7235_v34  ;;  %6087 = vmatpush3.bf16.msra.mxu0 %v6634_v44 }
  0x90   :  { %v845_v0 = vor.u32 %v844_v1, %v841_v28  ;;  %406 = vst [vmem:[#allocation2 + $0x6c] sm:$0x1] %v405_v47  ;;  %v263_v40 = vshrl.u32 %v169_v2, 16  ;;  %v266_v53 = vshll.u32 %v169_v2, 16  ;;  %v7256_v41 = vld [vmem:[#allocation3 + $0x38] sm:$0xf]  ;;  %6136 = vmatprep.subr.bf16.mxu0 %v7233_v11 }
  0x91   :  { %8976 = vst [vmem:[#allocation29_spill] sm:$0xff] %v7247_v18  ;;  %6061 = vmatmul.mubr.bf16.gmra.mxu1 %v7247_v18  ;;  %v7259_v17 = vld [vmem:[#allocation2 + $0x5c] sm:$0x1]  ;;  %v858_v55 = vrot.slane %v856_v50, 5  ;;  %v271_v63 = vshrl.u32 %v170_v21, 16  ;;  %v274_v6 = vshll.u32 %v170_v21, 16 }
  0x92   :  { %v279_v22 = vshrl.u32 %v171_v54, 16  ;;  %v846_v34 = vrot.slane %v845_v0, 4  ;;  %v848_v28 = vshll.u32 %v7259_v17, 16  ;;  %v265_v24 = vrot.slane %v263_v40, 7  ;;  %v407_v1 = vld [vmem:[#allocation2 + $0x70] sm:$0xf]  ;;  %6115 = vmatpush3.bf16.msra.mxu1 %v7212_v23 }
  0x93   :  { %v413_v2 = vld [vmem:[#allocation2 + $0x78] sm:$0xf]  ;;  %v282_v44 = vshll.u32 %v171_v54, 16  ;;  %v7264_v47 = vld [vmem:[#allocation2 + $0x68] sm:$0xf]  ;;  %v859_v30 = vor.u32 %v858_v55, %v855_v5  ;;  %v273_v50 = vrot.slane %v271_v63, 7  ;;  %6116 = vmatprep.subr.bf16.mxu1 %v6633_v61 }
  0x94   :  { %v281_v35 = vrot.slane %v279_v22, 7  ;;  %v287_v21 = vshrl.u32 %v7256_v41, 16  ;;  %v7269_v0 = vcombine.low %v7227_v27, %v7264_v47  ;;  %v850_v4 = vrot.slane %v848_v28, 5  ;;  %v419_v23 = vld [vmem:[#allocation2 + $0x80] sm:$0xf] }
  0x95   :  { %v867_v40 = vshrl.u32 %v7264_v47, 16  ;;  %v870_v18 = vshll.u32 %v7264_v47, 16  ;;  %v860_v54 = vrot.slane %v859_v30, 4  ;;  %v268_v39 = vor.u32 %v266_v53, %v265_v24 }
  0x96   :  { %8977 = vst [vmem:[#allocation30_spill] sm:$0xff] %v7269_v0  ;;  %v276_v33 = vor.u32 %v274_v6, %v273_v50  ;;  %v284_v5 = vor.u32 %v282_v44, %v281_v35  ;;  %6033 = vmatmul.mubr.bf16.gmra.mxu0 %v7269_v0  ;;  %v7276_v22 = vsel %vm7033_vm8, %v846_v34, %v850_v4  ;;  %v7278_v55 = vld [vmem:[#allocation2 + $0x64] sm:$0x1]  ;;  %v289_v28 = vrot.slane %v287_v21, 7  ;;  %v425_v4 = vld [vmem:[#allocation2 + $0x88] sm:$0xf] }
  0x97   :  { %8978 = vst [vmem:[#allocation31_spill] sm:$0xff] %v7276_v22  ;;  %v869_v63 = vrot.slane %v867_v40, 4  ;;  %v872_v58 = vrot.slane %v870_v18, 5  ;;  %6117 = vmatpush3.bf16.msra.mxu1 %v6633_v61  ;;  %v5415_v57 = vcombine.low %v837_v32, %v7276_v22  ;;  %v7281_v25 = vld [vmem:[#allocation2 + $0x6c] sm:$0x1]  ;;  %v862_v30 = vshll.u32 %v7278_v55, 16 }
  0x98   :  { %v408_v53 = vsel %vm7005_vm3, %v268_v39, %v407_v1  ;;  %v414_v6 = vsel %vm7005_vm3, %v276_v33, %v413_v2  ;;  %v410_v34 = vld [vmem:[#allocation2 + $0x74] sm:$0x1]  ;;  %6118 = vmatprep.subr.bf16.mxu1 %v6635_v3  ;;  %v7288_v44 = vld [vmem:[#allocation10 + $0x178] sm:$0xff]   ;;  %v876_v61 = vshll.u32 %v7281_v25, 16  ;;  %v290_v32 = vshll.u32 %v7256_v41, 16 }
  0x99   :  { %v873_v18 = vor.u32 %v872_v58, %v869_v63  ;;  %409 = vst [vmem:[#allocation2 + $0x70] sm:$0xf] %v408_v53  ;;  %415 = vst [vmem:[#allocation2 + $0x78] sm:$0xf] %v414_v6  ;;  %v420_v21 = vsel %vm7005_vm3, %v284_v5, %v419_v23  ;;  %v416_v40 = vld [vmem:[#allocation2 + $0x7c] sm:$0x1]  ;;  %6064 = vmatprep.mubr.bf16.mxu1 %v5415_v57 }
  0x9a   :  { %v422_v39 = vld [vmem:[#allocation2 + $0x84] sm:$0x1]  ;;  %v864_v1 = vrot.slane %v862_v30, 5  ;;  %421 = vst [vmem:[#allocation2 + $0x80] sm:$0xf] %v420_v21  ;;  %v269_v33 = vrot.slane %v265_v24, 4  ;;  %v292_v63 = vor.u32 %v290_v32, %v289_v28 }
  0x9b   :  { %v277_v2 = vrot.slane %v273_v50, 4  ;;  %v285_v0 = vrot.slane %v281_v35, 4  ;;  %v428_v22 = vld [vmem:[#allocation2 + $0x8c] sm:$0x1]  ;;  %v874_v42 = vrot.slane %v873_v18, 4  ;;  %v878_v58 = vrot.slane %v876_v61, 5  ;;  %6119 = vmatpush3.bf16.msra.mxu1 %v6635_v3 }
  0x9c   :  { %v293_v12 = vrot.slane %v289_v28, 4  ;;  %v7296_v41 = vsel %vm7033_vm8, %v860_v54, %v864_v1  ;;  %v411_v23 = vsel %vm7011_vm5, %v269_v33, %v410_v34  ;;  %6168 = vmatprep.subr.bf16.mxu1 %v7288_v44  ;;  %v426_v3 = vsel %vm7005_vm3, %v292_v63, %v425_v4 }
  0x9d   :  { %v417_v57 = vsel %vm7011_vm5, %v277_v2, %v416_v40  ;;  %v423_v24 = vsel %vm7011_vm5, %v285_v0, %v422_v39  ;;  %v7307_v35 = vsel %vm7033_vm8, %v874_v42, %v878_v58  ;;  %412 = vst [vmem:[#allocation2 + $0x74] sm:$0x1] %v411_v23  ;;  %v5428_v0 = vrot.slane %v7047_v7, 9  ;;  %427 = vst [vmem:[#allocation2 + $0x88] sm:$0xf] %v426_v3 }
  0x9e   :  { %418 = vst [vmem:[#allocation2 + $0x7c] sm:$0x1] %v417_v57  ;;  %424 = vst [vmem:[#allocation2 + $0x84] sm:$0x1] %v423_v24  ;;  %v429_v50 = vsel %vm7011_vm5, %v293_v12, %v428_v22  ;;  %v7322_v42 = vcombine.low %v7296_v41, %v7307_v35  ;;  %v1171_v5 = vrot.slane %v7049_v8, 5  ;;  %v5429_v28 = vrot.slane %v7059_v13, 9 }
  0x9f   :  { %430 = vst [vmem:[#allocation2 + $0x8c] sm:$0x1] %v429_v50  ;;  %v5430_v12 = vrot.slane %v7066_v20, 9  ;;  %v8982_v6 = vrot.slane %v7019_v46, 5  ;;  %v8983_v4 = vrot.slane %v7000_v16, 9  ;;  %v8984_v24 = vrot.slane %v7061_v14, 5 }
  0xa0   :  { %8981 = vst [vmem:[#allocation32_spill] sm:$0xff] %v7322_v42  ;;  %6065 = vmatmul.mubr.bf16.gmra.mxu1 %v7322_v42  ;;  %v7330_v30 = vld [vmem:[#allocation2 + $0x70] sm:$0xf]  ;;  %v7332_v53 = vld [vmem:[#allocation2 + $0x78] sm:$0xf]  ;;  %v7354_v39 = vsel %vm7315_vm11, %v5428_v0, %v1171_v5  ;;  %v8985_v50 = vrot.slane %v7079_v36, 5 }
  0xa1   :  { %v1168_v8 = vsel %vm7315_vm11, %v8983_v4, %v8982_v6  ;;  %v7342_v34 = vcombine.low %v7330_v30, %v7332_v53  ;;  %v7344_v18 = vld [vmem:[#allocation2 + $0x80] sm:$0xf]  ;;  %v881_v61 = vshrl.u32 %v7330_v30, 16  ;;  %v884_v32 = vshll.u32 %v7330_v30, 16 }
  0xa2   :  { %v895_v21 = vshrl.u32 %v7332_v53, 16  ;;  %v898_v40 = vshll.u32 %v7332_v53, 16  ;;  %v909_v46 = vshrl.u32 %v7344_v18, 16  ;;  %v912_v16 = vshll.u32 %v7344_v18, 16 }
  0xa3   :  { %6036 = vmatprep.mubr.bf16.mxu0 %v7342_v34  ;;  %v883_v1 = vrot.slane %v881_v61, 4  ;;  %v886_v33 = vrot.slane %v884_v32, 5  ;;  %v7365_v3 = vsel %vm7315_vm11, %v5429_v28, %v8984_v24  ;;  %v7371_v0 = vsel %vm7315_vm11, %v5430_v12, %v8985_v50 }
  0xa4   :  { %v897_v2 = vrot.slane %v895_v21, 4  ;;  %v7357_v58 = vld [vmem:[#allocation2 + $0x74] sm:$0x1]  ;;  %v900_v23 = vrot.slane %v898_v40, 5  ;;  %v911_v57 = vrot.slane %v909_v46, 4  ;;  %v5443_v14 = vcombine.low %v1168_v8, %v7354_v39 }
  0xa5   :  { %v7359_v63 = vld [vmem:[#allocation2 + $0x7c] sm:$0x1]  ;;  %v7373_v5 = vld [vmem:[#allocation2 + $0x88] sm:$0xf]  ;;  %v887_v6 = vor.u32 %v886_v33, %v883_v1  ;;  %v890_v4 = vshll.u32 %v7357_v58, 16  ;;  %v914_v12 = vrot.slane %v912_v16, 5 }
  0xa6   :  { %v904_v61 = vshll.u32 %v7359_v63, 16  ;;  %v7377_v32 = vld [vmem:[#allocation2 + $0x84] sm:$0x1]  ;;  %v7382_v28 = vcombine.low %v7344_v18, %v7373_v5  ;;  %v901_v36 = vor.u32 %v900_v23, %v897_v2  ;;  %v7384_v21 = vld [vmem:[#allocation2 + $0x8c] sm:$0x1]  ;;  %v923_v24 = vshrl.u32 %v7373_v5, 16 }
  0xa7   :  { %v918_v40 = vshll.u32 %v7377_v32, 16  ;;  %v888_v46 = vrot.slane %v887_v6, 4  ;;  %v892_v1 = vrot.slane %v890_v4, 5  ;;  %v915_v22 = vor.u32 %v914_v12, %v911_v57 }
  0xa8   :  { %8986 = vst [vmem:[#allocation33_spill] sm:$0xff] %v7382_v28  ;;  %v906_v33 = vrot.slane %v904_v61, 5  ;;  %6037 = vmatmul.mubr.bf16.gmra.mxu0 %v7382_v28  ;;  %v902_v50 = vrot.slane %v901_v36, 4  ;;  %v926_v42 = vshll.u32 %v7373_v5, 16  ;;  %v925_v23 = vrot.slane %v923_v24, 4 }
  0xa9   :  { %v920_v8 = vrot.slane %v918_v40, 5  ;;  %v7392_v2 = vsel %vm7033_vm8, %v888_v46, %v892_v1  ;;  %v932_v16 = vshll.u32 %v7384_v21, 16  ;;  %6088 = vmatprep.mubr.bf16.mxu0 %v5443_v14  ;;  %v5431_v6 = vrot.slane %v7124_v37, 9  ;;  %v165_v1 = vld [vmem:[#allocation3 + $0x1c] sm:$0xf] }
  0xaa   :  { %v7398_v4 = vsel %vm7033_vm8, %v902_v50, %v906_v33  ;;  %v916_v61 = vrot.slane %v915_v22, 4  ;;  %v928_v36 = vrot.slane %v926_v42, 5  ;;  %v1183_v57 = vrot.slane %v7160_v56, 5 }
  0xab   :  { %v7403_v12 = vcombine.low %v7392_v2, %v7398_v4  ;;  %v7407_v40 = vcombine.low %v7365_v3, %v7371_v0  ;;  %v5432_v14 = vrot.slane %v7137_v51, 9  ;;  %v1187_v46 = vrot.slane %v7166_v31, 5 }
  0xac   :  { %v929_v24 = vor.u32 %v928_v36, %v925_v23  ;;  %v934_v33 = vrot.slane %v932_v16, 5  ;;  %v7413_v42 = vsel %vm7315_vm11, %v5431_v6, %v1183_v57  ;;  %v5433_v56 = vrot.slane %v7158_v26, 9  ;;  %v6638_v36 = vld [vmem:[#allocation10 + $0x130] sm:$0xff]  }
  0xad   :  { %8987 = vst [vmem:[#allocation34_spill] sm:$0xff] %v7403_v12  ;;  %6068 = vmatprep.mubr.bf16.mxu1 %v7403_v12  ;;  %v7419_v22 = vsel %vm7033_vm8, %v916_v61, %v920_v8  ;;  %v7423_v50 = vsel %vm7315_vm11, %v5432_v14, %v1187_v46  ;;  %v1191_v31 = vrot.slane %v7172_v45, 5  ;;  %v5434_v23 = vrot.slane %v7178_v49, 9  ;;  %v383_v8 = vld [vmem:[#allocation2 + $0x40] sm:$0xf] }
  0xae   :  { %v930_v16 = vrot.slane %v929_v24, 4  ;;  %v7429_v6 = vcombine.low %v7413_v42, %v7423_v50  ;;  %v1195_v57 = vrot.slane %v7180_v52, 5  ;;  %v231_v12 = vshrl.u32 %v165_v1, 16 }
  0xaf   :  { %v234_v28 = vshll.u32 %v165_v1, 16  ;;  %v5435_v61 = vrot.slane %v7134_v48, 9  ;;  %v1199_v14 = vrot.slane %v7205_v43, 5  ;;  %v5459_v46 = vcombine.low %v7047_v7, %v7059_v13  ;;  %v6640_v13 = vld [vmem:[#allocation10 + $0x128] sm:$0xff]  }
  0xb0   :  { %8988 = vst [vmem:[#allocation35_spill] sm:$0xff] %v7429_v6  ;;  %v7436_v45 = vsel %vm7033_vm8, %v930_v16, %v934_v33  ;;  %6089 = vmatmul.mubr.bf16.vlgmr.msra.gmra.mxu0 %v7407_v40  ;;  %v7441_v24 = vrot.slane %v231_v12, 7  ;;  %v5436_v52 = vrot.slane %v7207_v59, 9  ;;  %v7452_v48 = vsel %vm7315_vm11, %v5433_v56, %v1191_v31  ;;  %v6642_v16 = vld [vmem:[#allocation10 + $0x120] sm:$0xff]  }
  0xb1   :  { %v7446_v1 = vcombine.low %v7419_v22, %v7436_v45  ;;  %6137 = vmatpush3.bf16.msra.mxu0 %v7233_v11  ;;  %6092 = vmatprep.mubr.bf16.mxu0 %v7429_v6  ;;  %v7456_v43 = vsel %vm7315_vm11, %v5434_v23, %v1195_v57  ;;  %v1203_v7 = vrot.slane %v7259_v17, 5  ;;  %v1200_v33 = vsel %vm7315_vm11, %v5435_v61, %v1199_v14  ;;  %v173_v14 = vld [vmem:[#allocation3 + $0x3c] sm:$0xf] }
  0xb2   :  { %6138 = vmatprep.subr.bf16.mxu0 %v6638_v36  ;;  %v236_v12 = vor.u32 %v234_v28, %v7441_v24  ;;  %v5460_v11 = vcombine.low %v7066_v20, %v7124_v37  ;;  %v7471_v17 = vcombine.low %v7452_v48, %v7456_v43  ;;  %v5437_v31 = vrot.slane %v7227_v27, 9  ;;  %v6644_v6 = vld [vmem:[#allocation10 + $0x118] sm:$0xff]  }
  0xb3   :  { %8989 = vst [vmem:[#allocation36_spill] sm:$0xff] %v7446_v1  ;;  %6069 = vmatmul.mubr.bf16.gmra.mxu1 %v7446_v1  ;;  %v7467_v56 = vsel %vm7315_vm11, %v5436_v52, %v1203_v7  ;;  %v1207_v23 = vrot.slane %v7278_v55, 5  ;;  %v5438_v37 = vrot.slane %v7264_v47, 9  ;;  %v1211_v57 = vrot.slane %v7281_v25, 5 }
  0xb4   :  { %6120 = vmatprep.mubr.bf16.mxu1 %v5459_v46  ;;  %8990 = vst [vmem:[#allocation37_spill] sm:$0xff] %v7471_v17  ;;  %v384_v28 = vsel %vm7005_vm3, %v236_v12, %v383_v8  ;;  %v5447_v20 = vcombine.low %v1200_v33, %v7467_v56  ;;  %v5439_v61 = vrot.slane %v7330_v30, 9  ;;  %v1215_v46 = vrot.slane %v7357_v58, 5  ;;  %v431_v58 = vld [vmem:[#allocation2 + $0x90] sm:$0xf] }
  0xb5   :  { %6139 = vmatpush3.bf16.msra.mxu0 %v6638_v36  ;;  %385 = vst [vmem:[#allocation2 + $0x40] sm:$0xf] %v384_v28  ;;  %v5440_v8 = vrot.slane %v7332_v53, 9  ;;  %v1219_v52 = vrot.slane %v7359_v63, 5  ;;  %v5441_v55 = vrot.slane %v7344_v18, 9  ;;  %v6639_v36 = vld [vmem:[#allocation10 + $0x170] sm:$0xff]   ;;  %v5461_v25 = vcombine.low %v7137_v51, %v7158_v26 }
  0xb6   :  { %6140 = vmatprep.subr.bf16.mxu0 %v6640_v13  ;;  %v1223_v7 = vrot.slane %v7377_v32, 5  ;;  %v5442_v12 = vrot.slane %v7373_v5, 9  ;;  %v295_v33 = vshrl.u32 %v173_v14, 16  ;;  %v298_v28 = vshll.u32 %v173_v14, 16 }
  0xb7   :  { %v7492_v63 = vsel %vm7315_vm11, %v5437_v31, %v1207_v23  ;;  %v7496_v32 = vsel %vm7315_vm11, %v5438_v37, %v1211_v57  ;;  %v237_v14 = vrot.slane %v7441_v24, 4  ;;  %v7501_v51 = vsel %vm7315_vm11, %v5439_v61, %v1215_v46  ;;  %v6646_v57 = vld [vmem:[#allocation10 + $0x110] sm:$0xff]   ;;  %v6643_v46 = vld [vmem:[#allocation10 + $0x160] sm:$0xff]  }
  0xb8   :  { %6093 = vmatmul.mubr.bf16.gmra.mxu0 %v7471_v17  ;;  %v297_v1 = vrot.slane %v295_v33, 7  ;;  %v6641_v17 = vld [vmem:[#allocation10 + $0x168] sm:$0xff]   ;;  %v7505_v26 = vsel %vm7315_vm11, %v5440_v8, %v1219_v52  ;;  %v7512_v24 = vcombine.low %v7492_v63, %v7496_v32  ;;  %v1227_v23 = vrot.slane %v7384_v21, 5 }
  0xb9   :  { %6141 = vmatpush3.bf16.msra.mxu0 %v6640_v13  ;;  %6096 = vmatprep.mubr.bf16.mxu0 %v5447_v20  ;;  %v7522_v61 = vcombine.low %v7501_v51, %v7505_v26  ;;  %v5463_v52 = vcombine.low %v7207_v59, %v7227_v27  ;;  %v6648_v33 = vld [vmem:[#allocation10 + $0x108] sm:$0xff]  }
  0xba   :  { %6142 = vmatprep.subr.bf16.mxu0 %v6642_v16  ;;  %v300_v13 = vor.u32 %v298_v28, %v297_v1 }
  0xbb   :  { %6121 = vmatmul.mubr.bf16.vlgmr.msra.gmra.mxu1 %v5460_v11  ;;  %v386_v11 = vld [vmem:[#allocation2 + $0x44] sm:$0x1] }
  0xbc   :  { %6169 = vmatpush3.bf16.msra.mxu1 %v7288_v44  ;;  %6124 = vmatprep.mubr.bf16.mxu1 %v5461_v25  ;;  %v7508_v31 = vld [vmem:[#allocation2 + $0x40] sm:$0xf]  ;;  %v432_v20 = vsel %vm7005_vm3, %v300_v13, %v431_v58  ;;  %v387_v37 = vsel %vm7011_vm5, %v237_v14, %v386_v11  ;;  %v301_v25 = vrot.slane %v297_v1, 4  ;;  %v7532_v58 = vsel %vm7315_vm11, %v5441_v55, %v1223_v7 }
  0xbd   :  { %6170 = vmatprep.subr.bf16.mxu1 %v6639_v36  ;;  %6143 = vmatpush3.bf16.msra.mxu0 %v6642_v16  ;;  %v1638_v44 = vshrl.u32 %v7508_v31, 16  ;;  %433 = vst [vmem:[#allocation2 + $0x90] sm:$0xf] %v432_v20  ;;  %388 = vst [vmem:[#allocation2 + $0x44] sm:$0x1] %v387_v37  ;;  %v1641_v16 = vshll.u32 %v7508_v31, 16  ;;  %v5462_v21 = vcombine.low %v7178_v49, %v7508_v31 }
  0xbe   :  { %6144 = vmatprep.subr.bf16.mxu0 %v6644_v6  ;;  %v7536_v49 = vsel %vm7315_vm11, %v5442_v12, %v1227_v23  ;;  %v6650_v7 = vld [vmem:[#allocation10 + $0x100] sm:$0xff]   ;;  %v6647_v12 = vld [vmem:[#allocation10 + $0x150] sm:$0xff]   ;;  %v5465_v11 = vcombine.low %v7332_v53, %v7344_v18  ;;  %v6652_v37 = vld [vmem:[#allocation10 + $0x1b8] sm:$0xff]  }
  0xbf   :  { %v1640_v8 = vrot.slane %v1638_v44, 4  ;;  %v1643_v28 = vrot.slane %v1641_v16, 5  ;;  %v7541_v59 = vcombine.low %v7532_v58, %v7536_v49 }
  0xc0   :  { %6171 = vmatpush3.bf16.msra.mxu1 %v6639_v36  ;;  %6097 = vmatmul.mubr.bf16.gmra.mxu0 %v7512_v24  ;;  %v434_v36 = vld [vmem:[#allocation2 + $0x94] sm:$0x1] }
  0xc1   :  { %6172 = vmatprep.subr.bf16.mxu1 %v6641_v17  ;;  %6145 = vmatpush3.bf16.msra.mxu0 %v6644_v6  ;;  %v435_v27 = vsel %vm7011_vm5, %v301_v25, %v434_v36  ;;  %v6645_v6 = vld [vmem:[#allocation10 + $0x158] sm:$0xff]   ;;  %v1644_v14 = vor.u32 %v1643_v28, %v1640_v8  ;;  %v6649_v8 = vld [vmem:[#allocation10 + $0x148] sm:$0xff]   ;;  %v5493_v25 = vcombine.low %v7354_v39, %v7365_v3  ;;  %v8992_v36 = vld [vmem:[#allocation26_spill] sm:$0xff] }
  0xc2   :  { %6146 = vmatprep.subr.bf16.mxu0 %v6646_v57  ;;  %6100 = vmatprep.mubr.bf16.mxu0 %v7522_v61  ;;  %436 = vst [vmem:[#allocation2 + $0x94] sm:$0x1] %v435_v27  ;;  %v8993_v27 = vcombine.low %v7116_v9, %v8992_v36  ;;  %v8994_v9 = vcombine.low %v7196_v19, %v7223_v10 }
  0xc3   :  { %6125 = vmatmul.mubr.bf16.gmra.mxu1 %v5462_v21  ;;  %v1645_v44 = vrot.slane %v1644_v14, 4 }
  0xc4   :  { %6173 = vmatpush3.bf16.msra.mxu1 %v6641_v17  ;;  %6128 = vmatprep.mubr.bf16.mxu1 %v5463_v52  ;;  %v7545_v1 = vld [vmem:[#allocation2 + $0x44] sm:$0x1]  ;;  %v7547_v55 = vld [vmem:[#allocation2 + $0x90] sm:$0xf]  ;;  %v5464_v17 = vcombine.low %v7264_v47, %v7330_v30  ;;  %v8991_v47 = vcombine.low %v7093_v62, %v7097_v15  ;;  %v7560_v30 = vld [vmem:[#allocation2 + $0x48] sm:$0xf] }
  0xc5   :  { %6174 = vmatprep.subr.bf16.mxu1 %v6643_v46  ;;  %6147 = vmatpush3.bf16.msra.mxu0 %v6646_v57  ;;  %v1647_v13 = vshll.u32 %v7545_v1, 16  ;;  %v1652_v23 = vshrl.u32 %v7547_v55, 16  ;;  %v1655_v20 = vshll.u32 %v7547_v55, 16  ;;  %v2254_v57 = vshrl.u32 %v7560_v30, 16  ;;  %v7566_v62 = vld [vmem:[#allocation2 + $0x4c] sm:$0x1] }
  0xc6   :  { %6148 = vmatprep.subr.bf16.mxu0 %v6648_v33  ;;  %v6654_v52 = vld [vmem:[#allocation10 + $0x1b0] sm:$0xff]   ;;  %v5466_v28 = vcombine.low %v7373_v5, %v7547_v55  ;;  %v2263_v14 = vshll.u32 %v7566_v62, 16  ;;  %v6651_v5 = vld [vmem:[#allocation10 + $0x140] sm:$0xff]  }
  0xc7   :  { %v1649_v53 = vrot.slane %v1647_v13, 5  ;;  %v1654_v16 = vrot.slane %v1652_v23, 4  ;;  %v1657_v21 = vrot.slane %v1655_v20, 5  ;;  %v2256_v15 = vrot.slane %v2254_v57, 4  ;;  %v7581_v13 = vld [vmem:[#allocation2 + $0x98] sm:$0xf] }
  0xc8   :  { %6175 = vmatpush3.bf16.msra.mxu1 %v6643_v46  ;;  %6101 = vmatmul.mubr.bf16.gmra.mxu0 %v7541_v59  ;;  %v2257_v46 = vshll.u32 %v7560_v30, 16  ;;  %v2268_v3 = vshrl.u32 %v7581_v13, 16  ;;  %v6653_v23 = vld [vmem:[#allocation10 + $0x1f8] sm:$0xff]   ;;  %v8995_v20 = vld [vmem:[#allocation28_spill] sm:$0xff]  ;;  %v2271_v57 = vshll.u32 %v7581_v13, 16 }
  0xc9   :  { %6176 = vmatprep.subr.bf16.mxu1 %v6645_v6  ;;  %6149 = vmatpush3.bf16.msra.mxu0 %v6648_v33  ;;  %v7563_v18 = vld [vmem:[#allocation2 + $0x94] sm:$0x1] }
  0xca   :  { %6150 = vmatprep.subr.bf16.mxu0 %v6650_v7  ;;  %6152 = vmatprep.mubr.bf16.mxu0 %v8991_v47  ;;  %v2259_v33 = vrot.slane %v2257_v46, 5  ;;  %v1869_v10 = vrot.slane %v7563_v18, 5  ;;  %v7596_v46 = vld [vmem:[#allocation2 + $0x9c] sm:$0x1]  ;;  %v7606_v36 = vrot.slane %v2271_v57, 5  ;;  %v9003_v57 = vld [vmem:[#allocation29_spill] sm:$0xff] }
  0xcb   :  { %6129 = vmatmul.mubr.bf16.gmra.mxu1 %v5464_v17  ;;  %v1661_v17 = vshll.u32 %v7563_v18, 16  ;;  %v8999_v18 = vld [vmem:[#allocation25_spill] sm:$0xff] }
  0xcc   :  { %6177 = vmatpush3.bf16.msra.mxu1 %v6645_v6  ;;  %6132 = vmatprep.mubr.bf16.mxu1 %v5465_v11  ;;  %v7577_v6 = vsel %vm7033_vm8, %v1645_v44, %v1649_v53  ;;  %v2260_v39 = vor.u32 %v2259_v33, %v2256_v15  ;;  %v5491_v11 = vrot.slane %v7508_v31, 9  ;;  %v1865_v44 = vrot.slane %v7545_v1, 5  ;;  %v6658_v53 = vld [vmem:[#allocation10 + $0x1a0] sm:$0xff]   ;;  %v8996_v33 = vld [vmem:[#allocation31_spill] sm:$0xff] }
  0xcd   :  { %6178 = vmatprep.subr.bf16.mxu1 %v6647_v12  ;;  %6151 = vmatpush3.bf16.msra.mxu0 %v6650_v7  ;;  %v1658_v7 = vor.u32 %v1657_v21, %v1654_v16  ;;  %v5478_v47 = vcombine.low %v8995_v20, %v7577_v6  ;;  %v1663_v19 = vrot.slane %v1661_v17, 5  ;;  %v7594_v21 = vrot.slane %v2263_v14, 5  ;;  %v6662_v17 = vld [vmem:[#allocation10 + $0x190] sm:$0xff]   ;;  %v6659_v14 = vld [vmem:[#allocation10 + $0x1e0] sm:$0xff]  }
  0xce   :  { %6200 = vmatprep.subr.bf16.mxu0 %v6652_v37  ;;  %v7598_v15 = vrot.slane %v2260_v39, 4  ;;  %v7600_v1 = vrot.slane %v2268_v3, 4  ;;  %v6664_v39 = vld [vmem:[#allocation10 + $0x188] sm:$0xff]   ;;  %v6668_v3 = vld [vmem:[#allocation10 + $0x238] sm:$0xff]   ;;  %v5509_v20 = vcombine.low %v7508_v31, %v7560_v30 }
  0xcf   :  { %v1659_v16 = vrot.slane %v1658_v7, 4  ;;  %v6660_v7 = vld [vmem:[#allocation10 + $0x198] sm:$0xff]  }
  0xd0   :  { %6179 = vmatpush3.bf16.msra.mxu1 %v6647_v12  ;;  %6153 = vmatmul.mubr.bf16.vlgmr.msra.gmra.mxu0 %v8993_v27  ;;  %v6656_v12 = vld [vmem:[#allocation10 + $0x1a8] sm:$0xff]   ;;  %v2277_v27 = vshll.u32 %v7596_v46, 16  ;;  %v2266_v31 = vsel %vm7033_vm8, %v7598_v15, %v7594_v21  ;;  %v2274_v21 = vor.u32 %v7606_v36, %v7600_v1  ;;  %v6675_v15 = vld [vmem:[#allocation10 + $0x200] sm:$0xff]   ;;  %v5529_v1 = vrot.slane %v7560_v30, 9 }
  0xd1   :  { %6180 = vmatprep.subr.bf16.mxu1 %v6649_v8  ;;  %6201 = vmatpush3.bf16.msra.mxu0 %v6652_v37  ;;  %v5492_v37 = vrot.slane %v7547_v55, 9  ;;  %v2469_v36 = vrot.slane %v7566_v62, 5  ;;  %v2473_v30 = vrot.slane %v7596_v46, 5 }
  0xd2   :  { %6202 = vmatprep.subr.bf16.mxu0 %v6654_v52  ;;  %6156 = vmatprep.mubr.bf16.mxu0 %v8994_v9  ;;  %v8997_v9 = vld [vmem:[#allocation22_spill] sm:$0xff] }
  0xd3   :  { %6133 = vmatmul.mubr.bf16.gmra.mxu1 %v5466_v28  ;;  %v5494_v28 = vcombine.low %v7371_v0, %v7413_v42  ;;  %v7613_v0 = vsel %vm7315_vm11, %v5491_v11, %v1865_v44  ;;  %v5480_v42 = vcombine.low %v7307_v35, %v7392_v2  ;;  %v7625_v35 = vsel %vm7033_vm8, %v1659_v16, %v1663_v19  ;;  %v6661_v2 = vld [vmem:[#allocation10 + $0x1d8] sm:$0xff]   ;;  %v6670_v11 = vld [vmem:[#allocation10 + $0x228] sm:$0xff]   ;;  %v9001_v44 = vld [vmem:[#allocation30_spill] sm:$0xff] }
  0xd4   :  { %6181 = vmatpush3.bf16.msra.mxu1 %v6649_v8  ;;  %6184 = vmatprep.mubr.bf16.mxu1 %v5493_v25  ;;  %v5479_v8 = vcombine.low %v8996_v33, %v7296_v41  ;;  %v6655_v25 = vld [vmem:[#allocation10 + $0x1f0] sm:$0xff]   ;;  %v6657_v41 = vld [vmem:[#allocation10 + $0x1e8] sm:$0xff]   ;;  %v5519_v16 = vcombine.low %v7577_v6, %v2266_v31  ;;  %v9005_v33 = vld [vmem:[#allocation32_spill] sm:$0xff]  ;;  %v2275_v6 = vrot.slane %v2274_v21, 4 }
  0xd5   :  { %6182 = vmatprep.subr.bf16.mxu1 %v6651_v5  ;;  %6203 = vmatpush3.bf16.msra.mxu0 %v6654_v52  ;;  %v5495_v52 = vcombine.low %v7423_v50, %v7452_v48  ;;  %v5481_v50 = vcombine.low %v7398_v4, %v7419_v22  ;;  %v5496_v48 = vcombine.low %v7456_v43, %v7613_v0  ;;  %v6666_v22 = vld [vmem:[#allocation10 + $0x180] sm:$0xff]   ;;  %v6674_v19 = vld [vmem:[#allocation10 + $0x208] sm:$0xff]  }
  0xd6   :  { %6204 = vmatprep.subr.bf16.mxu0 %v6656_v12  ;;  %v5482_v4 = vcombine.low %v7436_v45, %v7625_v35  ;;  %v5498_v43 = vcombine.low %v7496_v32, %v7501_v51  ;;  %v6665_v45 = vld [vmem:[#allocation10 + $0x1c8] sm:$0xff]   ;;  %v7640_v32 = vsel %vm7315_vm11, %v5492_v37, %v1869_v10  ;;  %v6669_v51 = vld [vmem:[#allocation10 + $0x230] sm:$0xff]   ;;  %v9002_v37 = vld [vmem:[#allocation27_spill] sm:$0xff] }
  0xd7   :  { %v9004_v10 = vld [vmem:[#allocation33_spill] sm:$0xff] }
  0xd8   :  { %6183 = vmatpush3.bf16.msra.mxu1 %v6651_v5  ;;  %6157 = vmatmul.mubr.bf16.gmra.mxu0 %v5478_v47  ;;  %v5497_v5 = vcombine.low %v7467_v56, %v7492_v63  ;;  %v6663_v56 = vld [vmem:[#allocation10 + $0x1d0] sm:$0xff]   ;;  %v5499_v63 = vcombine.low %v7505_v26, %v7532_v58  ;;  %v5500_v26 = vcombine.low %v7536_v49, %v7640_v32  ;;  %v6667_v58 = vld [vmem:[#allocation10 + $0x1c0] sm:$0xff]   ;;  %v6672_v49 = vld [vmem:[#allocation10 + $0x218] sm:$0xff]  }
  0xd9   :  { %6232 = vmatprep.subr.bf16.mxu1 %v6653_v23  ;;  %6205 = vmatpush3.bf16.msra.mxu0 %v6656_v12  ;;  %v8998_v12 = vld [vmem:[#allocation24_spill] sm:$0xff] }
  0xda   :  { %6206 = vmatprep.subr.bf16.mxu0 %v6658_v53  ;;  %6160 = vmatprep.mubr.bf16.mxu0 %v5479_v8  ;;  %v6671_v47 = vld [vmem:[#allocation10 + $0x220] sm:$0xff]   ;;  %v5510_v8 = vcombine.low %v7547_v55, %v7581_v13 }
  0xdb   :  { %6185 = vmatmul.mubr.bf16.vlgmr.msra.gmra.mxu1 %v5494_v28  ;;  %v9006_v28 = vld [vmem:[#allocation34_spill] sm:$0xff] }
  0xdc   :  { %6233 = vmatpush3.bf16.msra.mxu1 %v6653_v23  ;;  %6188 = vmatprep.mubr.bf16.mxu1 %v5495_v52  ;;  %v9000_v23 = vld [vmem:[#allocation23_spill] sm:$0xff] }
  0xdd   :  { %6234 = vmatprep.subr.bf16.mxu1 %v6655_v25  ;;  %6207 = vmatpush3.bf16.msra.mxu0 %v6658_v53  ;;  %v6673_v53 = vld [vmem:[#allocation10 + $0x210] sm:$0xff]  }
  0xde   :  { %6208 = vmatprep.subr.bf16.mxu0 %v6660_v7 }
  0xe0   :  { %6235 = vmatpush3.bf16.msra.mxu1 %v6655_v25  ;;  %6161 = vmatmul.mubr.bf16.gmra.mxu0 %v5480_v42  ;;  %v9007_v25 = vld [vmem:[#allocation36_spill] sm:$0xff]  ;;  %v5530_v42 = vrot.slane %v7581_v13, 9 }
  0xe1   :  { %6236 = vmatprep.subr.bf16.mxu1 %v6657_v41  ;;  %6209 = vmatpush3.bf16.msra.mxu0 %v6660_v7  ;;  %v9008_v7 = vld [vmem:[#allocation35_spill] sm:$0xff] }
  0xe2   :  { %6210 = vmatprep.subr.bf16.mxu0 %v6662_v17  ;;  %6164 = vmatprep.mubr.bf16.mxu0 %v5481_v50  ;;  %v2474_v62 = vsel %vm7315_vm11, %v5530_v42, %v2473_v30 }
  0xe3   :  { %6189 = vmatmul.mubr.bf16.gmra.mxu1 %v5496_v48 }
  0xe4   :  { %6237 = vmatpush3.bf16.msra.mxu1 %v6657_v41  ;;  %6192 = vmatprep.mubr.bf16.mxu1 %v5497_v5 }
  0xe5   :  { %6238 = vmatprep.subr.bf16.mxu1 %v6659_v14  ;;  %6211 = vmatpush3.bf16.msra.mxu0 %v6662_v17  ;;  %v5532_v17 = vcombine.low %v7640_v32, %v2474_v62 }
  0xe6   :  { %6212 = vmatprep.subr.bf16.mxu0 %v6664_v39 }
  0xe8   :  { %6239 = vmatpush3.bf16.msra.mxu1 %v6659_v14  ;;  %6165 = vmatmul.mubr.bf16.gmra.mxu0 %v5482_v4 }
  0xe9   :  { %6240 = vmatprep.subr.bf16.mxu1 %v6661_v2  ;;  %6213 = vmatpush3.bf16.msra.mxu0 %v6664_v39 }
  0xea   :  { %6214 = vmatprep.subr.bf16.mxu0 %v6666_v22  ;;  %6216 = vmatprep.mubr.bf16.mxu0 %v8997_v9 }
  0xeb   :  { %6193 = vmatmul.mubr.bf16.gmra.mxu1 %v5498_v43 }
  0xec   :  { %6241 = vmatpush3.bf16.msra.mxu1 %v6661_v2  ;;  %6196 = vmatprep.mubr.bf16.mxu1 %v5499_v63 }
  0xed   :  { %6242 = vmatprep.subr.bf16.mxu1 %v6663_v56  ;;  %6215 = vmatpush3.bf16.msra.mxu0 %v6666_v22 }
  0xee   :  { %6264 = vmatprep.subr.bf16.mxu0 %v6668_v3 }
  0xf0   :  { %6243 = vmatpush3.bf16.msra.mxu1 %v6663_v56  ;;  %6217 = vmatmul.mubr.bf16.vlgmr.msra.gmra.mxu0 %v8998_v12 }
  0xf1   :  { %6244 = vmatprep.subr.bf16.mxu1 %v6665_v45  ;;  %6265 = vmatpush3.bf16.msra.mxu0 %v6668_v3 }
  0xf2   :  { %6266 = vmatprep.subr.bf16.mxu0 %v6669_v51  ;;  %6220 = vmatprep.mubr.bf16.mxu0 %v8999_v18 }
  0xf3   :  { %6197 = vmatmul.mubr.bf16.gmra.mxu1 %v5500_v26 }
  0xf4   :  { %6245 = vmatpush3.bf16.msra.mxu1 %v6665_v45  ;;  %6248 = vmatprep.mubr.bf16.mxu1 %v9000_v23 }
  0xf5   :  { %6246 = vmatprep.subr.bf16.mxu1 %v6667_v58  ;;  %6267 = vmatpush3.bf16.msra.mxu0 %v6669_v51 }
  0xf6   :  { %6268 = vmatprep.subr.bf16.mxu0 %v6670_v11 }
  0xf8   :  { %6247 = vmatpush3.bf16.msra.mxu1 %v6667_v58  ;;  %6221 = vmatmul.mubr.bf16.gmra.mxu0 %v5509_v20  ;;  %v6676_v20 = vld [vmem:[#allocation12 + $0x38] sm:$0xff]  }
  0xf9   :  { %6269 = vmatpush3.bf16.msra.mxu0 %v6670_v11  ;;  %6224 = vmatprep.mubr.bf16.mxu0 %v9001_v44  ;;  %v6677_v44 = vld [vmem:[#allocation12 + $0x30] sm:$0xff]  }
  0xfa   :  { %6270 = vmatprep.subr.bf16.mxu0 %v6671_v47  ;;  %6296 = vmatprep.subr.bf16.mxu1 %v6676_v20 }
  0xfb   :  { %6249 = vmatmul.mubr.bf16.vlgmr.msra.gmra.mxu1 %v9002_v37 }
  0xfc   :  { %6252 = vmatprep.mubr.bf16.mxu1 %v9003_v57  ;;  %6297 = vmatpush3.bf16.msra.mxu1 %v6676_v20  ;;  %v6688_v20 = vld [vmem:[#allocation12] sm:$0xff]  }
  0xfd   :  { %6271 = vmatpush3.bf16.msra.mxu0 %v6671_v47  ;;  %6298 = vmatprep.subr.bf16.mxu1 %v6677_v44 }
  0xfe   :  { %6272 = vmatprep.subr.bf16.mxu0 %v6672_v49 }
 0x100   :  { %6225 = vmatmul.mubr.bf16.gmra.mxu0 %v7342_v34  ;;  %v2279_v34 = vrot.slane %v2277_v27, 5  ;;  %v9009_v27 = vld [vmem:[#allocation37_spill] sm:$0xff]  ;;  %6299 = vmatpush3.bf16.msra.mxu1 %v6677_v44 }
 0x101   :  { %6273 = vmatpush3.bf16.msra.mxu0 %v6672_v49  ;;  %6228 = vmatprep.mubr.bf16.mxu0 %v9004_v10 }
 0x102   :  { %6274 = vmatprep.subr.bf16.mxu0 %v6673_v53  ;;  %v2280_v55 = vsel %vm7033_vm8, %v2275_v6, %v2279_v34  ;;  %v6680_v34 = vld [vmem:[#allocation12 + $0x20] sm:$0xff]  }
 0x103   :  { %6253 = vmatmul.mubr.bf16.gmra.mxu1 %v5519_v16  ;;  %v5520_v52 = vcombine.low %v7625_v35, %v2280_v55  ;;  %v6678_v16 = vld [vmem:[#allocation12 + $0x28] sm:$0xff]  }
 0x104   :  { %6256 = vmatprep.mubr.bf16.mxu1 %v9005_v33  ;;  %v6679_v33 = vld [vmem:[#allocation12 + $0x78] sm:$0xff]   ;;  %6300 = vmatprep.subr.bf16.mxu1 %v6678_v16 }
 0x105   :  { %6275 = vmatpush3.bf16.msra.mxu0 %v6673_v53  ;;  %6301 = vmatpush3.bf16.msra.mxu1 %v6678_v16 }
 0x106   :  { %6276 = vmatprep.subr.bf16.mxu0 %v6674_v19  ;;  %6302 = vmatprep.subr.bf16.mxu1 %v6680_v34 }
 0x108   :  { %6229 = vmatmul.mubr.bf16.gmra.mxu0 %v5510_v8 }
 0x109   :  { %6277 = vmatpush3.bf16.msra.mxu0 %v6674_v19  ;;  %6280 = vmatprep.mubr.bf16.mxu0 %v7407_v40  ;;  %v2470_v40 = vsel %vm7315_vm11, %v5529_v1, %v2469_v36  ;;  %v6682_v1 = vld [vmem:[#allocation12 + $0x18] sm:$0xff]  }
 0x10a   :  { %6278 = vmatprep.subr.bf16.mxu0 %v6675_v15  ;;  %v5531_v41 = vcombine.low %v7613_v0, %v2470_v40  ;;  %v7690_v0 = vld [vmem:[%s8922_s4] ss:$0 sm:$0xff]  ;;  %6303 = vmatpush3.bf16.msra.mxu1 %v6680_v34  ;;  %s7896_s4 = sld [smem:[#allocation13]] }
 0x10b   :  { %6257 = vmatmul.mubr.bf16.gmra.mxu1 %v9006_v28  ;;  %6304 = vmatprep.subr.bf16.mxu1 %v6682_v1 }
 0x10c   :  { %6260 = vmatprep.mubr.bf16.mxu1 %v9007_v25  ;;  %v6681_v25 = vld [vmem:[#allocation12 + $0x70] sm:$0xff]  }
 0x10d   :  { %6279 = vmatpush3.bf16.msra.mxu0 %v6675_v15 }
 0x10e   :  { %6328 = vmatprep.subr.bf16.mxu0 %v6679_v33  ;;  %6305 = vmatpush3.bf16.msra.mxu1 %v6682_v1 }
 0x110   :  { %6281 = vmatmul.mubr.bf16.vlgmr.msra.gmra.mxu0 %v9008_v7 }
 0x111   :  { %6284 = vmatprep.mubr.bf16.mxu0 %v9009_v27  ;;  %6329 = vmatpush3.bf16.msra.mxu0 %v6679_v33  ;;  %v6684_v27 = vld [vmem:[#allocation12 + $0x10] sm:$0xff]  }
 0x112   :  { %6330 = vmatprep.subr.bf16.mxu0 %v6681_v25  ;;  %6306 = vmatprep.subr.bf16.mxu1 %v6684_v27 }
 0x113   :  { %6261 = vmatmul.mubr.bf16.gmra.mxu1 %v5520_v52  ;;  %v6683_v52 = vld [vmem:[#allocation12 + $0x68] sm:$0xff]  }
 0x114   :  { %6307 = vmatpush3.bf16.msra.mxu1 %v6684_v27 }
 0x115   :  { %6331 = vmatpush3.bf16.msra.mxu0 %v6681_v25 }
 0x116   :  { %6332 = vmatprep.subr.bf16.mxu0 %v6683_v52 }
 0x118   :  { %6285 = vmatmul.mubr.bf16.gmra.mxu0 %v5531_v41 }
 0x119   :  { %6288 = vmatprep.mubr.bf16.mxu0 %v7512_v24  ;;  %6333 = vmatpush3.bf16.msra.mxu0 %v6683_v52 }
 0x120   :  { %6289 = vmatmul.mubr.bf16.gmra.mxu0 %v7522_v61 }
 0x121   :  { %6292 = vmatprep.mubr.bf16.mxu0 %v7541_v59 }
 0x128   :  { %6293 = vmatmul.mubr.bf16.gmra.mxu0 %v5532_v17 }
 0x132   :  { %v6026_v50 = vpop.f32.mrf.mxu0 }
 0x133   :  { %v695_v13 = vadd.f32 %v6026_v50, %v7690_v0 }
 0x134   :  { %v624_v24 = vpop.f32.mrf.mxu0 }
 0x135   :  { %v693_v61 = vadd.f32 %v7690_v0, %v624_v24 }
 0x136   :  { %v6027_v46 = vpop.f32.mrf.mxu0 }
 0x137   :  { %v696_v14 = vadd.f32 %v6027_v46, %v7690_v0  ;;  %v6685_v46 = vld [vmem:[#allocation12 + $0x60] sm:$0xff]  }
 0x138   :  { %v7701_v4 = vpop.f32.mrf.mxu0  ;;  %6334 = vmatprep.subr.bf16.mxu0 %v6685_v46 }
 0x139   :  { %6335 = vmatpush3.bf16.msra.mxu0 %v6685_v46 }
 0x13c   :  { %v6058_v48 = vpop.f32.mrf.mxu1 }
 0x13d   :  { %v7694_v59 = vadd.f32 %v6058_v48, %v695_v13 }
 0x13e   :  { %v1067_v5 = vpop.f32.mrf.mxu1 }
 0x13f   :  { %v7697_v39 = vadd.f32 %v1067_v5, %v693_v61 }
 0x140   :  { %v6059_v35 = vpop.f32.mrf.mxu1 }
 0x141   :  { %v7699_v2 = vadd.f32 %v6059_v35, %v696_v14 }
 0x142   :  { %v7703_v56 = vpop.f32.mrf.mxu1 }
 0x146   :  { %v6030_v22 = vpop.f32.mrf.mxu0 }
 0x147   :  { %v699_v63 = vadd.f32 %v6030_v22, %v7690_v0 }
 0x148   :  { %v640_v43 = vpop.f32.mrf.mxu0 }
 0x149   :  { %v697_v9 = vadd.f32 %v7690_v0, %v640_v43  ;;  %v6686_v43 = vld [vmem:[#allocation12 + $0x8] sm:$0xff]  }
 0x14a   :  { %v6031_v3 = vpop.f32.mrf.mxu0  ;;  %6308 = vmatprep.subr.bf16.mxu1 %v6686_v43 }
 0x14b   :  { %v700_v51 = vadd.f32 %v6031_v3, %v7690_v0  ;;  %v6687_v3 = vld [vmem:[#allocation12 + $0x58] sm:$0xff]   ;;  %6309 = vmatpush3.bf16.msra.mxu1 %v6686_v43 }
 0x14c   :  { %v7710_v26 = vpop.f32.mrf.mxu0  ;;  %6336 = vmatprep.subr.bf16.mxu0 %v6687_v3  ;;  %6310 = vmatprep.subr.bf16.mxu1 %v6688_v20 }
 0x14d   :  { %6337 = vmatpush3.bf16.msra.mxu0 %v6687_v3 }
 0x14f   :  { %6311 = vmatpush3.bf16.msra.mxu1 %v6688_v20  ;;  %v6699_v20 = vld [vmem:[#allocation12 + $0xf8] sm:$0xff]  }
 0x151   :  { %v6062_v45 = vpop.f32.mrf.mxu1 }
 0x152   :  { %v7707_v32 = vadd.f32 %v6062_v45, %v699_v63 }
 0x153   :  { %v1083_v58 = vpop.f32.mrf.mxu1 }
 0x154   :  { %v7712_v12 = vadd.f32 %v1083_v58, %v697_v9 }
 0x155   :  { %v6063_v11 = vpop.f32.mrf.mxu1 }
 0x156   :  { %v7714_v18 = vadd.f32 %v6063_v11, %v700_v51  ;;  %v6034_v23 = vpop.f32.mrf.mxu0 }
 0x157   :  { %v7716_v49 = vpop.f32.mrf.mxu1  ;;  %v703_v37 = vadd.f32 %v6034_v23, %v7690_v0 }
 0x158   :  { %v656_v47 = vpop.f32.mrf.mxu0 }
 0x159   :  { %v701_v31 = vadd.f32 %v7690_v0, %v656_v47 }
 0x15a   :  { %v6035_v57 = vpop.f32.mrf.mxu0 }
 0x15b   :  { %v704_v10 = vadd.f32 %v6035_v57, %v7690_v0 }
 0x15c   :  { %v7725_v15 = vpop.f32.mrf.mxu0 }
 0x160   :  { %v6066_v53 = vpop.f32.mrf.mxu1 }
 0x161   :  { %v7720_v19 = vadd.f32 %v6066_v53, %v703_v37  ;;  %v6690_v37 = vld [vmem:[#allocation12 + $0x50] sm:$0xff]   ;;  %v7766_v53 = vld [vmem:[#allocation12 + $0xb8] sm:$0xff]  }
 0x162   :  { %v1099_v8 = vpop.f32.mrf.mxu1  ;;  %6338 = vmatprep.subr.bf16.mxu0 %v6690_v37  ;;  %9010 = vst [vmem:[#allocation26_spill] sm:$0xff] %v7766_v53  ;;  %6360 = vmatprep.subr.bf16.mxu1 %v7766_v53 }
 0x163   :  { %v7723_v21 = vadd.f32 %v1099_v8, %v701_v31  ;;  %6339 = vmatpush3.bf16.msra.mxu0 %v6690_v37 }
 0x164   :  { %v6067_v6 = vpop.f32.mrf.mxu1 }
 0x165   :  { %v7727_v28 = vadd.f32 %v6067_v6, %v704_v10  ;;  %v6693_v10 = vld [vmem:[#allocation12 + $0x48] sm:$0xff]  }
 0x166   :  { %v7731_v41 = vpop.f32.mrf.mxu1  ;;  %6340 = vmatprep.subr.bf16.mxu0 %v6693_v10 }
 0x167   :  { %6341 = vmatpush3.bf16.msra.mxu0 %v6693_v10 }
 0x168   :  { %v6038_v55 = vpop.f32.mrf.mxu0 }
 0x169   :  { %v707_v42 = vadd.f32 %v6038_v55, %v7690_v0  ;;  %v6696_v55 = vld [vmem:[#allocation12 + $0x40] sm:$0xff]  }
 0x16a   :  { %v672_v36 = vpop.f32.mrf.mxu0  ;;  %6342 = vmatprep.subr.bf16.mxu0 %v6696_v55 }
 0x16b   :  { %v705_v17 = vadd.f32 %v7690_v0, %v672_v36  ;;  %6343 = vmatpush3.bf16.msra.mxu0 %v6696_v55 }
 0x16c   :  { %v6039_v7 = vpop.f32.mrf.mxu0  ;;  %6392 = vmatprep.subr.bf16.mxu0 %v6699_v20 }
 0x16d   :  { %v708_v48 = vadd.f32 %v6039_v7, %v7690_v0 }
 0x16e   :  { %v7729_v40 = vpop.f32.mrf.mxu0 }
 0x170   :  { %v6090_v30 = vpop.f32.mrf.mxu0 }
 0x171   :  { %v7735_v62 = vadd.f32 %v6090_v30, %v7694_v59 }
 0x172   :  { %v1360_v50 = vpop.f32.mrf.mxu0 }
 0x173   :  { %v6070_v24 = vpop.f32.mrf.mxu1  ;;  %v7739_v13 = vadd.f32 %v1360_v50, %v7697_v39 }
 0x174   :  { %v1144_v61 = vadd.f32 %v6070_v24, %v707_v42  ;;  %v6091_v14 = vpop.f32.mrf.mxu0 }
 0x175   :  { %v1115_v5 = vpop.f32.mrf.mxu1  ;;  %v7743_v35 = vadd.f32 %v6091_v14, %v7699_v2 }
 0x176   :  { %v1142_v22 = vadd.f32 %v1115_v5, %v705_v17  ;;  %v7745_v59 = vpop.f32.mrf.mxu0 }
 0x177   :  { %v6071_v63 = vpop.f32.mrf.mxu1 }
 0x178   :  { %v1145_v9 = vadd.f32 %v6071_v63, %v708_v48  ;;  %v6094_v39 = vpop.f32.mrf.mxu0 }
 0x179   :  { %v7747_v45 = vpop.f32.mrf.mxu1  ;;  %v7750_v51 = vadd.f32 %v6094_v39, %v7707_v32 }
 0x17a   :  { %v1376_v2 = vpop.f32.mrf.mxu0 }
 0x17b   :  { %v7752_v58 = vpop.f32.mrf.mxu1  ;;  %v7755_v11 = vadd.f32 %v1376_v2, %v7712_v12 }
 0x17c   :  { %v6095_v23 = vpop.f32.mrf.mxu0 }
 0x17d   :  { %v7757_v47 = vpop.f32.mrf.mxu1  ;;  %v7760_v44 = vadd.f32 %v6095_v23, %v7714_v18 }
 0x17e   :  { %v7762_v57 = vpop.f32.mrf.mxu0 }
 0x17f   :  { %v7764_v32 = vpop.f32.mrf.mxu1 }
 0x180   :  { %v6098_v31 = vpop.f32.mrf.mxu0 }
 0x181   :  { %v7768_v12 = vpop.f32.mrf.mxu1  ;;  %v1433_v16 = vadd.f32 %v6098_v31, %v7720_v19 }
 0x182   :  { %v1392_v33 = vpop.f32.mrf.mxu0 }
 0x183   :  { %v7772_v18 = vpop.f32.mrf.mxu1  ;;  %v1431_v8 = vadd.f32 %v1392_v33, %v7723_v21 }
 0x184   :  { %v6099_v6 = vpop.f32.mrf.mxu0 }
 0x185   :  { %v7775_v34 = vpop.f32.mrf.mxu1  ;;  %v1434_v25 = vadd.f32 %v6099_v6, %v7727_v28 }
 0x186   :  { %v7778_v1 = vpop.f32.mrf.mxu0 }
 0x187   :  { %v7780_v36 = vpop.f32.mrf.mxu1 }
 0x188   :  { %v6102_v19 = vpop.f32.mrf.mxu0 }
 0x189   :  { %v7782_v52 = vpop.f32.mrf.mxu1  ;;  %v1437_v7 = vadd.f32 %v6102_v19, %v1144_v61 }
 0x18a   :  { %v1408_v27 = vpop.f32.mrf.mxu0 }
 0x18b   :  { %v6130_v21 = vpop.f32.mrf.mxu1  ;;  %v1435_v42 = vadd.f32 %v1408_v27, %v1142_v22 }
 0x18c   :  { %v1631_v30 = vadd.f32 %v6130_v21, %v1433_v16  ;;  %v6103_v17 = vpop.f32.mrf.mxu0 }
 0x18d   :  { %v1590_v50 = vpop.f32.mrf.mxu1  ;;  %v1438_v24 = vadd.f32 %v6103_v17, %v1145_v9 }
 0x18e   :  { %v1629_v46 = vadd.f32 %v1590_v50, %v1431_v8  ;;  %v7784_v28 = vpop.f32.mrf.mxu0 }
 0x18f   :  { %v6131_v48 = vpop.f32.mrf.mxu1 }
 0x190   :  { %v1632_v14 = vadd.f32 %v6131_v48, %v1434_v25  ;;  %v7786_v5 = vpop.f32.mrf.mxu0 }
 0x191   :  { %v7788_v43 = vpop.f32.mrf.mxu1 }
 0x192   :  { %v7790_v63 = vpop.f32.mrf.mxu0 }
 0x193   :  { %v6134_v3 = vpop.f32.mrf.mxu1 }
 0x194   :  { %v1635_v61 = vadd.f32 %v6134_v3, %v1437_v7  ;;  %v7792_v39 = vpop.f32.mrf.mxu0 }
 0x195   :  { %v1606_v22 = vpop.f32.mrf.mxu1 }
 0x196   :  { %v1633_v2 = vadd.f32 %v1606_v22, %v1435_v42  ;;  %v7794_v23 = vpop.f32.mrf.mxu0 }
 0x197   :  { %v6135_v9 = vpop.f32.mrf.mxu1 }
 0x198   :  { %v1636_v37 = vadd.f32 %v6135_v9, %v1438_v24  ;;  %v7796_v31 = vpop.f32.mrf.mxu0 }
 0x199   :  { %v7798_v16 = vpop.f32.mrf.mxu1 }
 0x19a   :  { %v7800_v10 = vpop.f32.mrf.mxu0 }
 0x19b   :  { %v7802_v33 = vpop.f32.mrf.mxu1 }
 0x19c   :  { %v7804_v8 = vpop.f32.mrf.mxu0 }
 0x19d   :  { %v7806_v6 = vpop.f32.mrf.mxu1 }
 0x19e   :  { %v7808_v25 = vpop.f32.mrf.mxu0 }
 0x19f   :  { %v7810_v55 = vpop.f32.mrf.mxu1 }
 0x1a0   :  { %v6162_v19 = vpop.f32.mrf.mxu0 }
 0x1a1   :  { %v7812_v7 = vpop.f32.mrf.mxu1  ;;  %v7814_v27 = vadd.f32 %v6162_v19, %v1631_v30 }
 0x1a2   :  { %v1814_v21 = vpop.f32.mrf.mxu0 }
 0x1a3   :  { %9011 = vst [vmem:[#allocation28_spill] sm:$0xff] %v7814_v27  ;;  %v7816_v42 = vpop.f32.mrf.mxu1  ;;  %v7818_v17 = vadd.f32 %v1814_v21, %v1629_v46 }
 0x1a4   :  { %v6163_v50 = vpop.f32.mrf.mxu0 }
 0x1a5   :  { %9012 = vst [vmem:[#allocation31_spill] sm:$0xff] %v7818_v17  ;;  %v7820_v24 = vpop.f32.mrf.mxu1  ;;  %v7822_v48 = vadd.f32 %v6163_v50, %v1632_v14 }
 0x1a6   :  { %v7824_v3 = vpop.f32.mrf.mxu0 }
 0x1a7   :  { %9013 = vst [vmem:[#allocation22_spill] sm:$0xff] %v7822_v48  ;;  %v7826_v22 = vpop.f32.mrf.mxu1 }
 0x1a8   :  { %v6166_v9 = vpop.f32.mrf.mxu0 }
 0x1a9   :  { %v7828_v20 = vpop.f32.mrf.mxu1  ;;  %v7830_v53 = vadd.f32 %v6166_v9, %v1635_v61  ;;  %v7850_v9 = vld [vmem:[#allocation2] sm:$0xf] }
 0x1aa   :  { %9014 = vst [vmem:[#allocation24_spill] sm:$0xff] %v7828_v20  ;;  %v1830_v30 = vpop.f32.mrf.mxu0 }
 0x1ab   :  { %9015 = vst [vmem:[#allocation25_spill] sm:$0xff] %v7830_v53  ;;  %v7832_v19 = vpop.f32.mrf.mxu1  ;;  %v7834_v38 = vadd.f32 %v1830_v30, %v1633_v2 }
 0x1ac   :  { %9016 = vst [vmem:[#allocation23_spill] sm:$0xff] %v7832_v19  ;;  %v6167_v46 = vpop.f32.mrf.mxu0 }
 0x1ad   :  { %9017 = vst [vmem:[#allocation30_spill] sm:$0xff] %v7834_v38  ;;  %v7836_v21 = vpop.f32.mrf.mxu1  ;;  %v7838_v29 = vadd.f32 %v6167_v46, %v1636_v37  ;;  %v3333_v37 = vshrl.u32 %v7850_v9, 16  ;;  %v3336_v46 = vshll.u32 %v7850_v9, 16  ;;  %v694_v38 = vadd.f32 %v7690_v0, %v7701_v4 }
 0x1ae   :  { %9018 = vst [vmem:[#allocation27_spill] sm:$0xff] %v7836_v21  ;;  %v7840_v14 = vpop.f32.mrf.mxu0 }
 0x1af   :  { %9019 = vst [vmem:[#allocation29_spill] sm:$0xff] %v7838_v29  ;;  %9020 = vst [vmem:[#allocation33_spill] sm:$0xff] %v7840_v14  ;;  %v7842_v50 = vpop.f32.mrf.mxu1  ;;  %v3338_v19 = vrot.slane %v3336_v46, 5  ;;  %v1131_v4 = vadd.f32 %v7703_v56, %v694_v38 }
 0x1b0   :  { %9021 = vst [vmem:[#allocation32_spill] sm:$0xff] %v7842_v50  ;;  %v7844_v48 = vpop.f32.mrf.mxu0  ;;  %v7866_v50 = vld [vmem:[#allocation2 + $0x50] sm:$0xf] }
 0x1b1   :  { %9022 = vst [vmem:[#allocation34_spill] sm:$0xff] %v7844_v48  ;;  %v7846_v17 = vpop.f32.mrf.mxu1  ;;  %9030 = vst [vmem:[#allocation42_spill] sm:$0xff] %v7866_v50  ;;  %v1424_v46 = vadd.f32 %v7745_v59, %v1131_v4 }
 0x1b2   :  { %9023 = vst [vmem:[#allocation36_spill] sm:$0xff] %v7846_v17  ;;  %v7848_v61 = vpop.f32.mrf.mxu0 }
 0x1b3   :  { %9024 = vst [vmem:[#allocation35_spill] sm:$0xff] %v7848_v61  ;;  %v7852_v53 = vpop.f32.mrf.mxu1  ;;  %v3448_v61 = vshll.u32 %v7866_v50, 16 }
 0x1b4   :  { %9025 = vst [vmem:[#allocation37_spill] sm:$0xff] %v7852_v53  ;;  %v7854_v2 = vpop.f32.mrf.mxu0  ;;  %v698_v53 = vadd.f32 %v7690_v0, %v7710_v26  ;;  %v706_v26 = vadd.f32 %v7690_v0, %v7729_v40  ;;  %v1623_v40 = vadd.f32 %v7752_v58, %v7735_v62 }
 0x1b5   :  { %9026 = vst [vmem:[#allocation38_spill] sm:$0xff] %v7854_v2  ;;  %v7856_v30 = vpop.f32.mrf.mxu1 }
 0x1b6   :  { %9027 = vst [vmem:[#allocation39_spill] sm:$0xff] %v7856_v30  ;;  %v7860_v29 = vpop.f32.mrf.mxu0  ;;  %v3335_v30 = vrot.slane %v3333_v37, 4  ;;  %v1135_v37 = vadd.f32 %v7716_v49, %v698_v53  ;;  %v1143_v49 = vadd.f32 %v7747_v45, %v706_v26  ;;  %v1621_v53 = vadd.f32 %v7757_v47, %v7739_v13 }
 0x1b7   :  { %9028 = vst [vmem:[#allocation40_spill] sm:$0xff] %v7860_v29  ;;  %v7864_v17 = vpop.f32.mrf.mxu1  ;;  %v3445_v29 = vshrl.u32 %v7866_v50, 16  ;;  %v1627_v45 = vadd.f32 %v7772_v18, %v7750_v51  ;;  %v1625_v13 = vadd.f32 %v7775_v34, %v7755_v11  ;;  %v1847_v18 = vadd.f32 %v7786_v5, %v1623_v40 }
 0x1b8   :  { %9029 = vst [vmem:[#allocation41_spill] sm:$0xff] %v7864_v17  ;;  %v7868_v21 = vpop.f32.mrf.mxu0  ;;  %v3339_v50 = vor.u32 %v3338_v19, %v3335_v30  ;;  %v1436_v51 = vadd.f32 %v7784_v28, %v1143_v49  ;;  %v1845_v11 = vadd.f32 %v7790_v63, %v1621_v53 }
 0x1b9   :  { %9031 = vst [vmem:[#allocation43_spill] sm:$0xff] %v7868_v21  ;;  %v7872_v2 = vpop.f32.mrf.mxu1  ;;  %v702_v21 = vadd.f32 %v7690_v0, %v7725_v15  ;;  %v3447_v56 = vrot.slane %v3445_v29, 4  ;;  %v1428_v15 = vadd.f32 %v7762_v57, %v1135_v37  ;;  %v1624_v29 = vadd.f32 %v7764_v32, %v7743_v35 }
 0x1ba   :  { %9032 = vst [vmem:[#allocation44_spill] sm:$0xff] %v7872_v2  ;;  %v7874_v27 = vpop.f32.mrf.mxu0  ;;  %v1622_v57 = vadd.f32 %v7768_v12, %v1424_v46  ;;  %v1628_v35 = vadd.f32 %v7780_v36, %v7760_v44 }
 0x1bb   :  { %9033 = vst [vmem:[#allocation45_spill] sm:$0xff] %v7874_v27  ;;  %v7879_v17 = vpop.f32.mrf.mxu1  ;;  %v3061_v27 = vld [vmem:[#allocation2 + $0x4] sm:$0x1]  ;;  %v1139_v0 = vadd.f32 %v7731_v41, %v702_v21  ;;  %v3081_v41 = vld [vmem:[#allocation2 + $0x54] sm:$0x1]  ;;  %v1626_v47 = vadd.f32 %v7782_v52, %v1428_v15  ;;  %v1848_v44 = vadd.f32 %v7792_v39, %v1624_v29  ;;  %v1849_v52 = vadd.f32 %v7800_v10, %v1625_v13  ;;  %v9041_v13 = vld [vmem:[#allocation31_spill] sm:$0xff] }
 0x1bc   :  { %9034 = vst [vmem:[#allocation46_spill] sm:$0xff] %v7879_v17  ;;  %v7885_v48 = vpop.f32.mrf.mxu0  ;;  %v3342_v38 = vshll.u32 %v3061_v27, 16  ;;  %v3450_v17 = vrot.slane %v3448_v61, 5  ;;  %v7911_v61 = vrot.slane %v3339_v50, 4  ;;  %v3454_v30 = vshll.u32 %v3081_v41, 16 }
 0x1bd   :  { %v7889_v2 = vpop.f32.mrf.mxu1  ;;  %v1432_v32 = vadd.f32 %v7778_v1, %v1139_v0  ;;  %v3784_v4 = vrot.slane %v3061_v27, 5  ;;  %v1846_v34 = vadd.f32 %v7794_v23, %v1622_v57  ;;  %v1851_v1 = vadd.f32 %v7796_v31, %v1627_v45 }
 0x1be   :  { %v7891_v14 = vpop.f32.mrf.mxu0  ;;  %v7917_v62 = vrot.slane %v3342_v38, 5  ;;  %v3451_v58 = vor.u32 %v3450_v17, %v3447_v56  ;;  %v5590_v17 = vrot.slane %v7850_v9, 9  ;;  %v1852_v28 = vadd.f32 %v7804_v8, %v1628_v35 }
 0x1bf   :  { %v7894_v20 = vpop.f32.mrf.mxu1  ;;  %v7940_v37 = vrot.slane %v3454_v30, 5  ;;  %v1630_v27 = vadd.f32 %v7788_v43, %v1432_v32  ;;  %v1850_v63 = vadd.f32 %v7808_v25, %v1626_v47  ;;  %v7945_v39 = vstv %s7896_s4  ;;  %v9040_v30 = vld [vmem:[#allocation23_spill] sm:$0xff]  ;;  %v9043_v47 = vld [vmem:[#allocation38_spill] sm:$0xff] }
 0x1c0   :  { %v7902_v59 = vpop.f32.mrf.mxu0  ;;  %v7938_v26 = vrot.slane %v3451_v58, 4  ;;  %v1634_v23 = vadd.f32 %v7798_v16, %v1436_v51  ;;  %v2053_v31 = vadd.f32 %v7802_v33, %v1847_v18  ;;  %v3345_v10 = vsel %vm7033_vm8, %v7911_v61, %v7917_v62  ;;  %v9044_v51 = vld [vmem:[#allocation40_spill] sm:$0xff] }
 0x1c1   :  { %v7909_v19 = vpop.f32.mrf.mxu1  ;;  %v7955_v8 = vsel %vm7315_vm11, %v5590_v17, %v3784_v4  ;;  %v2051_v43 = vadd.f32 %v7806_v6, %v1845_v11  ;;  %v2054_v25 = vadd.f32 %v7810_v55, %v1848_v44  ;;  %v2052_v56 = vadd.f32 %v7812_v7, %v1846_v34  ;;  %v9035_v6 = vld [vmem:[#allocation24_spill] sm:$0xff]  ;;  %v9036_v55 = vld [vmem:[#allocation33_spill] sm:$0xff]  ;;  %v9037_v7 = vld [vmem:[#allocation34_spill] sm:$0xff] }
 0x1c2   :  { %v7915_v21 = vpop.f32.mrf.mxu0  ;;  %v1854_v16 = vadd.f32 %v7824_v3, %v1630_v27  ;;  %v2057_v33 = vadd.f32 %v7816_v42, %v1851_v1  ;;  %v2055_v0 = vadd.f32 %v7820_v24, %v1849_v52  ;;  %v2058_v49 = vadd.f32 %v7826_v22, %v1852_v28  ;;  %v9038_v3 = vld [vmem:[#allocation35_spill] sm:$0xff]  ;;  %v9039_v42 = vld [vmem:[#allocation28_spill] sm:$0xff]  ;;  %v9045_v4 = vld [vmem:[#allocation22_spill] sm:$0xff] }
 0x1c3   :  { %v7925_v12 = vpop.f32.mrf.mxu1  ;;  %v2056_v29 = vadd.f32 %v9035_v6, %v1850_v63  ;;  %v1858_v57 = vadd.f32 %v9036_v55, %v1634_v23  ;;  %v2239_v41 = vadd.f32 %v9037_v7, %v2053_v31  ;;  %v2237_v45 = vadd.f32 %v9038_v3, %v2051_v43  ;;  %v9042_v22 = vld [vmem:[#allocation27_spill] sm:$0xff]  ;;  %v9046_v11 = vld [vmem:[#allocation32_spill] sm:$0xff]  ;;  %v9049_v27 = vld [vmem:[#allocation45_spill] sm:$0xff] }
 0x1c4   :  { %v7929_v50 = vpop.f32.mrf.mxu0  ;;  %v2061_v24 = vadd.f32 %v9040_v30, %v9039_v42  ;;  %v2059_v35 = vadd.f32 %v9042_v22, %v9041_v13  ;;  %v2240_v32 = vadd.f32 %v9043_v47, %v2054_v25  ;;  %v2238_v18 = vadd.f32 %v9044_v51, %v2052_v56  ;;  %v9047_v34 = vld [vmem:[#allocation36_spill] sm:$0xff]  ;;  %v9048_v52 = vld [vmem:[#allocation43_spill] sm:$0xff]  ;;  %v9050_v31 = vld [vmem:[#allocation25_spill] sm:$0xff] }
 0x1c5   :  { %v2402_v36 = vpop.f32.mrf.mxu1  ;;  %v2062_v44 = vadd.f32 %v9046_v11, %v9045_v4  ;;  %v2060_v1 = vadd.f32 %v9047_v34, %v1854_v16  ;;  %v2243_v28 = vadd.f32 %v9048_v52, %v2057_v33  ;;  %v2241_v63 = vadd.f32 %v9049_v27, %v2055_v0  ;;  %v9051_v43 = vld [vmem:[#allocation37_spill] sm:$0xff]  ;;  %v9052_v55 = vld [vmem:[#allocation30_spill] sm:$0xff]  ;;  %v9053_v7 = vld [vmem:[#allocation39_spill] sm:$0xff] }
 0x1c6   :  { %v2209_v5 = vpop.f32.mrf.mxu0  ;;  %v2065_v6 = vadd.f32 %v9051_v43, %v9050_v31  ;;  %v2063_v3 = vadd.f32 %v9053_v7, %v9052_v55  ;;  %v2244_v25 = vadd.f32 %v7885_v48, %v2058_v49  ;;  %v2242_v56 = vadd.f32 %v7891_v14, %v2056_v29  ;;  %v9054_v30 = vld [vmem:[#allocation29_spill] sm:$0xff]  ;;  %v9056_v16 = vld [vmem:[#allocation44_spill] sm:$0xff]  ;;  %v9057_v33 = vld [vmem:[#allocation46_spill] sm:$0xff] }
 0x1c7   :  { %v6255_v46 = vpop.f32.mrf.mxu1  ;;  %v9055_v13 = vld [vmem:[#allocation41_spill] sm:$0xff]  ;;  %v2064_v47 = vadd.f32 %v9056_v16, %v1858_v57  ;;  %v2451_v51 = vadd.f32 %v9057_v33, %v2239_v41  ;;  %v2449_v0 = vadd.f32 %v7889_v2, %v2237_v45  ;;  %v2452_v11 = vadd.f32 %v7894_v20, %v2240_v32 }
 0x1c8   :  { %v6230_v38 = vpop.f32.mrf.mxu0  ;;  %v2066_v22 = vadd.f32 %v9055_v13, %v9054_v30  ;;  %v2450_v34 = vadd.f32 %v7909_v19, %v2238_v18  ;;  %v2247_v52 = vadd.f32 %v7902_v59, %v2061_v24  ;;  %v2245_v48 = vadd.f32 %v7915_v21, %v2059_v35  ;;  %v2710_v24 = vld [vmem:[#allocation9 + $0x10] sm:$0xff] }
 0x1c9   :  { %v2405_v15 = vpop.f32.mrf.mxu1  ;;  %v2455_v49 = vadd.f32 %v7925_v12, %v2243_v28  ;;  %v7999_v29 = vadd.f32 %v2402_v36, %v2241_v63  ;;  %v2248_v57 = vadd.f32 %v7929_v50, %v2062_v44  ;;  %v8002_v31 = vadd.f32 %v6255_v46, %v2244_v25 }
 0x1ca   :  { %v2222_v40 = vpop.f32.mrf.mxu0  ;;  %v8004_v2 = vadd.f32 %v2405_v15, %v2242_v56  ;;  %v2246_v20 = vadd.f32 %v2209_v5, %v2060_v1  ;;  %v2251_v45 = vadd.f32 %v6230_v38, %v2065_v6  ;;  %v2708_v38 = vld [vmem:[#allocation9] sm:$0xff] }
 0x1cb   :  { %v6258_v58 = vpop.f32.mrf.mxu1  ;;  %v2249_v32 = vadd.f32 %v2222_v40, %v2063_v3 }
 0x1cc   :  { %v6231_v17 = vpop.f32.mrf.mxu0  ;;  %v8007_v36 = vadd.f32 %v6258_v58, %v2247_v52 }
 0x1cd   :  { %v2418_v23 = vpop.f32.mrf.mxu1  ;;  %v2252_v50 = vadd.f32 %v6231_v17, %v2066_v22 }
 0x1ce   :  { %v2225_v42 = vpop.f32.mrf.mxu0  ;;  %v8009_v35 = vadd.f32 %v2418_v23, %v2245_v48 }
 0x1cf   :  { %v6259_v4 = vpop.f32.mrf.mxu1  ;;  %v2250_v18 = vadd.f32 %v2225_v42, %v2064_v47  ;;  %v2711_v42 = vld [vmem:[#allocation9 + $0x18] sm:$0xff]  ;;  %v2709_v47 = vld [vmem:[#allocation9 + $0x8] sm:$0xff] }
 0x1d0   :  { %v6282_v14 = vpop.f32.mrf.mxu0  ;;  %v8012_v1 = vadd.f32 %v6259_v4, %v2248_v57 }
 0x1d1   :  { %v2421_v27 = vpop.f32.mrf.mxu1  ;;  %v2645_v41 = vadd.f32 %v6282_v14, %v2451_v51 }
 0x1d2   :  { %v2580_v19 = vpop.f32.mrf.mxu0  ;;  %v8014_v28 = vadd.f32 %v2421_v27, %v2246_v20 }
 0x1d3   :  { %v6262_v59 = vpop.f32.mrf.mxu1  ;;  %vm2661_vm12 = vcmp.gt.f32.partialorder %v2645_v41, 0.0  ;;  %v2678_v21 = vmul.f32 %v7945_v39, %v2645_v41  ;;  %v2643_v12 = vadd.f32 %v2580_v19, %v2449_v0 }
 0x1d4   :  { %v6283_v46 = vpop.f32.mrf.mxu0  ;;  %v8016_v63 = vadd.f32 %v6262_v59, %v2251_v45  ;;  %v2714_v45 = vld [vmem:[#allocation9 + $0x30] sm:$0xff]  ;;  %v2979_v59 = vld [vmem:[#allocation2 + $0x1c] sm:$0x1] }
 0x1d5   :  { %v2434_v44 = vpop.f32.mrf.mxu1  ;;  %v2694_v15 = vsel %vm2661_vm12, %v2645_v41, %v2678_v21  ;;  %vm2659_vm13 = vcmp.gt.f32.partialorder %v2643_v12, 0.0  ;;  %v2676_v5 = vmul.f32 %v7945_v39, %v2643_v12  ;;  %v2646_v40 = vadd.f32 %v6283_v46, %v2452_v11 }
 0x1d6   :  { %v2726_v58 = vmul.f32 %v2710_v24, %v2694_v15  ;;  %v2583_v43 = vpop.f32.mrf.mxu0  ;;  %v8019_v7 = vadd.f32 %v2434_v44, %v2249_v32  ;;  %v2976_v32 = vld [vmem:[#allocation2 + $0x18] sm:$0xf]  ;;  %v2964_v44 = vld [vmem:[#allocation2 + $0x8] sm:$0xf] }
 0x1d7   :  { %v6263_v23 = vpop.f32.mrf.mxu1  ;;  %v2692_v6 = vsel %vm2659_vm13, %v2643_v12, %v2676_v5  ;;  %vm2662_vm14 = vcmp.gt.f32.partialorder %v2646_v40, 0.0  ;;  %v2679_v17 = vmul.f32 %v7945_v39, %v2646_v40  ;;  %v2644_v55 = vadd.f32 %v2583_v43, %v2450_v34 }
 0x1d8   :  { %v8021_v3 = vadd.f32 %v6263_v23, %v2252_v50  ;;  %v5706_v25 = vpack.c.bf16 %v2726_v58, %v2726_v58  ;;  %v2724_v56 = vmul.f32 %v2708_v38, %v2692_v6  ;;  %v6286_v30 = vpop.f32.mrf.mxu0  ;;  %v2967_v38 = vld [vmem:[#allocation2 + $0xc] sm:$0x1] }
 0x1d9   :  { %v2437_v13 = vpop.f32.mrf.mxu1  ;;  %v2695_v22 = vsel %vm2662_vm14, %v2646_v40, %v2679_v17  ;;  %vm2660_vm15 = vcmp.gt.f32.partialorder %v2644_v55, 0.0  ;;  %v2677_v16 = vmul.f32 %v7945_v39, %v2644_v55  ;;  %v2649_v33 = vadd.f32 %v6286_v30, %v2455_v49 }
 0x1da   :  { %v8024_v51 = vadd.f32 %v2437_v13, %v2250_v18  ;;  %v2821_v0 = vshrl.u32 %v5706_v25, 16  ;;  %v2824_v4 = vshll.u32 %v5706_v25, 16  ;;  %v5704_v11 = vpack.c.bf16 %v2724_v56, %v2724_v56  ;;  %v2596_v34 = vpop.f32.mrf.mxu0 }
 0x1db   :  { %v2727_v52 = vmul.f32 %v2711_v42, %v2695_v22  ;;  %v2693_v48 = vsel %vm2660_vm15, %v2644_v55, %v2677_v16  ;;  %vm2665_vm0 = vcmp.gt.f32.partialorder %v2649_v33, 0.0  ;;  %v2682_v14 = vmul.f32 %v7945_v39, %v2649_v33 }
 0x1dc   :  { %v2823_v57 = vrot.slane %v2821_v0, 7  ;;  %v2805_v27 = vshrl.u32 %v5704_v11, 16  ;;  %v2808_v41 = vshll.u32 %v5704_v11, 16  ;;  %v2725_v20 = vmul.f32 %v2709_v47, %v2693_v48  ;;  %v6287_v19 = vpop.f32.mrf.mxu0  ;;  %v2982_v47 = vld [vmem:[#allocation2 + $0x20] sm:$0xf] }
 0x1dd   :  { %v5707_v49 = vpack.c.bf16 %v2727_v52, %v2727_v52  ;;  %v2698_v21 = vsel %vm2665_vm0, %v2649_v33, %v2682_v14  ;;  %v2647_v24 = vadd.f32 %v2596_v34, %v7999_v29  ;;  %v2650_v12 = vadd.f32 %v6287_v19, %v8002_v31  ;;  %v2985_v33 = vld [vmem:[#allocation2 + $0x24] sm:$0x1]  ;;  %v2715_v19 = vld [vmem:[#allocation9 + $0x38] sm:$0xff] }
 0x1de   :  { %v2826_v50 = vor.u32 %v2824_v4, %v2823_v57  ;;  %v2827_v18 = vrot.slane %v2823_v57, 4  ;;  %v2807_v46 = vrot.slane %v2805_v27, 7  ;;  %v5705_v15 = vpack.c.bf16 %v2725_v20, %v2725_v20  ;;  %v2599_v5 = vpop.f32.mrf.mxu0  ;;  %v2712_v14 = vld [vmem:[#allocation9 + $0x20] sm:$0xff]  ;;  %v2970_v57 = vld [vmem:[#allocation2 + $0x10] sm:$0xf] }
 0x1df   :  { %v2829_v40 = vshrl.u32 %v5707_v49, 16  ;;  %v2832_v58 = vshll.u32 %v5707_v49, 16  ;;  %v2730_v43 = vmul.f32 %v2714_v45, %v2698_v21  ;;  %vm2663_vm1 = vcmp.gt.f32.partialorder %v2647_v24, 0.0  ;;  %v2973_v27 = vld [vmem:[#allocation2 + $0x14] sm:$0x1] }
 0x1e0   :  { %v2977_v6 = vsel %vm7005_vm3, %v2826_v50, %v2976_v32  ;;  %v2980_v55 = vsel %vm7011_vm5, %v2827_v18, %v2979_v59  ;;  %v2810_v29 = vor.u32 %v2808_v41, %v2807_v46  ;;  %v2811_v25 = vrot.slane %v2807_v46, 4  ;;  %v6290_v31 = vpop.f32.mrf.mxu0 }
 0x1e1   :  { %2978 = vst [vmem:[#allocation2 + $0x18] sm:$0xf] %v2977_v6  ;;  %2981 = vst [vmem:[#allocation2 + $0x1c] sm:$0x1] %v2980_v55  ;;  %v2831_v56 = vrot.slane %v2829_v40, 7  ;;  %v2813_v42 = vshrl.u32 %v5705_v15, 16  ;;  %v5710_v13 = vpack.c.bf16 %v2730_v43, %v2730_v43  ;;  %v2680_v0 = vmul.f32 %v7945_v39, %v2647_v24 }
 0x1e2   :  { %v2816_v30 = vshll.u32 %v5705_v15, 16  ;;  %v2965_v22 = vsel %vm7005_vm3, %v2810_v29, %v2964_v44  ;;  %v2968_v16 = vsel %vm7011_vm5, %v2811_v25, %v2967_v38  ;;  %vm2666_vm2 = vcmp.gt.f32.partialorder %v2650_v12, 0.0  ;;  %v2612_v4 = vpop.f32.mrf.mxu0  ;;  %v3003_v38 = vld [vmem:[#allocation2 + $0x3c] sm:$0x1]  ;;  %v2713_v29 = vld [vmem:[#allocation9 + $0x28] sm:$0xff] }
 0x1e3   :  { %2966 = vst [vmem:[#allocation2 + $0x8] sm:$0xf] %v2965_v22  ;;  %2969 = vst [vmem:[#allocation2 + $0xc] sm:$0x1] %v2968_v16  ;;  %v2834_v11 = vor.u32 %v2832_v58, %v2831_v56  ;;  %v2835_v34 = vrot.slane %v2831_v56, 4  ;;  %v2815_v52 = vrot.slane %v2813_v42, 7  ;;  %v2696_v20 = vsel %vm2663_vm1, %v2647_v24, %v2680_v0 }
 0x1e4   :  { %v2853_v48 = vshrl.u32 %v5710_v13, 16  ;;  %v2856_v41 = vshll.u32 %v5710_v13, 16  ;;  %v2683_v45 = vmul.f32 %v7945_v39, %v2650_v12  ;;  %v2648_v32 = vadd.f32 %v2599_v5, %v8004_v2  ;;  %v6291_v59 = vpop.f32.mrf.mxu0  ;;  %v3000_v5 = vld [vmem:[#allocation2 + $0x38] sm:$0xf] }
 0x1e5   :  { %v2983_v49 = vsel %vm7005_vm3, %v2834_v11, %v2982_v47  ;;  %v2986_v21 = vsel %vm7011_vm5, %v2835_v34, %v2985_v33  ;;  %v2818_v50 = vor.u32 %v2816_v30, %v2815_v52  ;;  %v2819_v18 = vrot.slane %v2815_v52, 4  ;;  %v2988_v34 = vld [vmem:[#allocation2 + $0x28] sm:$0xf]  ;;  %v2991_v52 = vld [vmem:[#allocation2 + $0x2c] sm:$0x1] }
 0x1e6   :  { %2984 = vst [vmem:[#allocation2 + $0x20] sm:$0xf] %v2983_v49  ;;  %2987 = vst [vmem:[#allocation2 + $0x24] sm:$0x1] %v2986_v21  ;;  %v2855_v46 = vrot.slane %v2853_v48, 7  ;;  %v2728_v44 = vmul.f32 %v2712_v14, %v2696_v20  ;;  %v2699_v24 = vsel %vm2666_vm2, %v2650_v12, %v2683_v45  ;;  %vm2664_vm4 = vcmp.gt.f32.partialorder %v2648_v32, 0.0  ;;  %v2615_v25 = vpop.f32.mrf.mxu0 }
 0x1e7   :  { %v2971_v15 = vsel %vm7005_vm3, %v2818_v50, %v2970_v57  ;;  %v2974_v2 = vsel %vm7011_vm5, %v2819_v18, %v2973_v27  ;;  %v2731_v40 = vmul.f32 %v2715_v19, %v2699_v24  ;;  %v2681_v58 = vmul.f32 %v7945_v39, %v2648_v32  ;;  %v2718_v57 = vld [vmem:[#allocation9 + $0x50] sm:$0xff]  ;;  %v2716_v27 = vld [vmem:[#allocation9 + $0x40] sm:$0xff] }
 0x1e8   :  { %2972 = vst [vmem:[#allocation2 + $0x10] sm:$0xf] %v2971_v15  ;;  %2975 = vst [vmem:[#allocation2 + $0x14] sm:$0x1] %v2974_v2  ;;  %v2858_v43 = vor.u32 %v2856_v41, %v2855_v46  ;;  %v2859_v6 = vrot.slane %v2855_v46, 4  ;;  %v5708_v55 = vpack.c.bf16 %v2728_v44, %v2728_v44  ;;  %v2653_v12 = vadd.f32 %v6290_v31, %v8007_v36  ;;  %v2719_v44 = vld [vmem:[#allocation9 + $0x58] sm:$0xff] }
 0x1e9   :  { %v5711_v56 = vpack.c.bf16 %v2731_v40, %v2731_v40  ;;  %v2697_v42 = vsel %vm2664_vm4, %v2648_v32, %v2681_v58  ;;  %v2651_v30 = vadd.f32 %v2612_v4, %v8009_v35  ;;  %v2654_v13 = vadd.f32 %v6291_v59, %v8012_v1  ;;  %v6294_v4 = vpop.f32.mrf.mxu0  ;;  %v3006_v19 = vld [vmem:[#allocation2 + $0x40] sm:$0xf]  ;;  %v3009_v32 = vld [vmem:[#allocation2 + $0x44] sm:$0x1] }
 0x1ea   :  { %v3001_v22 = vsel %vm7005_vm3, %v2858_v43, %v3000_v5  ;;  %v3004_v16 = vsel %vm7011_vm5, %v2859_v6, %v3003_v38  ;;  %v2837_v47 = vshrl.u32 %v5708_v55, 16  ;;  %v2840_v33 = vshll.u32 %v5708_v55, 16  ;;  %v2994_v55 = vld [vmem:[#allocation2 + $0x30] sm:$0xf] }
 0x1eb   :  { %3002 = vst [vmem:[#allocation2 + $0x38] sm:$0xf] %v3001_v22  ;;  %3005 = vst [vmem:[#allocation2 + $0x3c] sm:$0x1] %v3004_v16  ;;  %v2861_v0 = vshrl.u32 %v5711_v56, 16  ;;  %v2864_v36 = vshll.u32 %v5711_v56, 16  ;;  %v2729_v31 = vmul.f32 %v2713_v29, %v2697_v42  ;;  %v2686_v35 = vmul.f32 %v7945_v39, %v2653_v12  ;;  %v2628_v38 = vpop.f32.mrf.mxu0 }
 0x1ec   :  { %vm2669_vm6 = vcmp.gt.f32.partialorder %v2653_v12, 0.0  ;;  %v2839_v11 = vrot.slane %v2837_v47, 7  ;;  %vm2667_vm7 = vcmp.gt.f32.partialorder %v2651_v30, 0.0  ;;  %v2684_v1 = vmul.f32 %v7945_v39, %v2651_v30  ;;  %v2997_v29 = vld [vmem:[#allocation2 + $0x34] sm:$0x1] }
 0x1ed   :  { %v2863_v48 = vrot.slane %v2861_v0, 7  ;;  %v5709_v14 = vpack.c.bf16 %v2729_v31, %v2729_v31  ;;  %vm2670_vm9 = vcmp.gt.f32.partialorder %v2654_v13, 0.0  ;;  %v2687_v41 = vmul.f32 %v7945_v39, %v2654_v13 }
 0x1ee   :  { %v2842_v20 = vor.u32 %v2840_v33, %v2839_v11  ;;  %v2843_v45 = vrot.slane %v2839_v11, 4  ;;  %v2702_v59 = vsel %vm2669_vm6, %v2653_v12, %v2686_v35  ;;  %v2700_v49 = vsel %vm2667_vm7, %v2651_v30, %v2684_v1  ;;  %v3024_v35 = vld [vmem:[#allocation2 + $0x68] sm:$0xf]  ;;  %v3027_v1 = vld [vmem:[#allocation2 + $0x6c] sm:$0x1] }
 0x1ef   :  { %v2866_v21 = vor.u32 %v2864_v36, %v2863_v48  ;;  %v2867_v50 = vrot.slane %v2863_v48, 4  ;;  %v2845_v18 = vshrl.u32 %v5709_v14, 16  ;;  %v2848_v46 = vshll.u32 %v5709_v14, 16  ;;  %v3015_v48 = vld [vmem:[#allocation2 + $0x5c] sm:$0x1] }
 0x1f0   :  { %v2989_v24 = vsel %vm7005_vm3, %v2842_v20, %v2988_v34  ;;  %v2992_v15 = vsel %vm7011_vm5, %v2843_v45, %v2991_v52  ;;  %v2734_v2 = vmul.f32 %v2718_v57, %v2702_v59  ;;  %v2732_v5 = vmul.f32 %v2716_v27, %v2700_v49  ;;  %v2722_v59 = vld [vmem:[#allocation9 + $0x70] sm:$0xff] }
 0x1f1   :  { %2990 = vst [vmem:[#allocation2 + $0x28] sm:$0xf] %v2989_v24  ;;  %2993 = vst [vmem:[#allocation2 + $0x2c] sm:$0x1] %v2992_v15  ;;  %v3007_v40 = vsel %vm7005_vm3, %v2866_v21, %v3006_v19  ;;  %v3010_v58 = vsel %vm7011_vm5, %v2867_v50, %v3009_v32  ;;  %v2847_v43 = vrot.slane %v2845_v18, 7  ;;  %v2703_v6 = vsel %vm2670_vm9, %v2654_v13, %v2687_v41  ;;  %v2717_v32 = vld [vmem:[#allocation9 + $0x48] sm:$0xff] }
 0x1f2   :  { %3008 = vst [vmem:[#allocation2 + $0x40] sm:$0xf] %v3007_v40  ;;  %3011 = vst [vmem:[#allocation2 + $0x44] sm:$0x1] %v3010_v58  ;;  %v5714_v12 = vpack.c.bf16 %v2734_v2, %v2734_v2  ;;  %v5712_v56 = vpack.c.bf16 %v2732_v5, %v2732_v5  ;;  %v2735_v42 = vmul.f32 %v2719_v44, %v2703_v6  ;;  %v3033_v40 = vld [vmem:[#allocation2 + $0x74] sm:$0x1] }
 0x1f3   :  { %v2652_v30 = vadd.f32 %v2615_v25, %v8014_v28  ;;  %v2850_v22 = vor.u32 %v2848_v46, %v2847_v43  ;;  %v2851_v16 = vrot.slane %v2847_v43, 4  ;;  %v2657_v47 = vadd.f32 %v6294_v4, %v8016_v63  ;;  %v6295_v28 = vpop.f32.mrf.mxu0  ;;  %v8083_v46 = vld [vmem:[#allocation2 + $0x8] sm:$0xf] }
 0x1f4   :  { %v2655_v33 = vadd.f32 %v2628_v38, %v8019_v7  ;;  %v2885_v0 = vshrl.u32 %v5714_v12, 16  ;;  %v2888_v36 = vshll.u32 %v5714_v12, 16  ;;  %v2869_v31 = vshrl.u32 %v5712_v56, 16  ;;  %v3012_v7 = vld [vmem:[#allocation2 + $0x58] sm:$0xf] }
 0x1f5   :  { %v2872_v11 = vshll.u32 %v5712_v56, 16  ;;  %v2995_v13 = vsel %vm7005_vm3, %v2850_v22, %v2994_v55  ;;  %v2998_v34 = vsel %vm7011_vm5, %v2851_v16, %v2997_v29  ;;  %v5715_v52 = vpack.c.bf16 %v2735_v42, %v2735_v42  ;;  %v2631_v44 = vpop.f32.mrf.mxu0  ;;  %v3030_v38 = vld [vmem:[#allocation2 + $0x70] sm:$0xf]  ;;  %v2720_v29 = vld [vmem:[#allocation9 + $0x60] sm:$0xff] }
 0x1f6   :  { %vm2668_vm10 = vcmp.gt.f32.partialorder %v2652_v30, 0.0  ;;  %2996 = vst [vmem:[#allocation2 + $0x30] sm:$0xf] %v2995_v13  ;;  %2999 = vst [vmem:[#allocation2 + $0x34] sm:$0x1] %v2998_v34  ;;  %v2887_v63 = vrot.slane %v2885_v0, 7  ;;  %v2685_v4 = vmul.f32 %v7945_v39, %v2652_v30  ;;  %v2690_v27 = vmul.f32 %v7945_v39, %v2657_v47 }
 0x1f7   :  { %v2871_v25 = vrot.slane %v2869_v31, 7  ;;  %vm2673_vm12 = vcmp.gt.f32.partialorder %v2657_v47, 0.0  ;;  %v2893_v14 = vshrl.u32 %v5715_v52, 16  ;;  %v2896_v57 = vshll.u32 %v5715_v52, 16  ;;  %v2723_v31 = vld [vmem:[#allocation9 + $0x78] sm:$0xff] }
 0x1f8   :  { %vm2671_vm13 = vcmp.gt.f32.partialorder %v2655_v33, 0.0  ;;  %v2890_v41 = vor.u32 %v2888_v36, %v2887_v63  ;;  %v2891_v20 = vrot.slane %v2887_v63, 4  ;;  %v2701_v21 = vsel %vm2668_vm10, %v2652_v30, %v2685_v4  ;;  %v8102_v36 = vld [vmem:[#allocation2 + $0x10] sm:$0xf]  ;;  %v3021_v52 = vld [vmem:[#allocation2 + $0x64] sm:$0x1] }
 0x1f9   :  { %v2874_v45 = vor.u32 %v2872_v11, %v2871_v25  ;;  %v2875_v19 = vrot.slane %v2871_v25, 4  ;;  %v2895_v49 = vrot.slane %v2893_v14, 7  ;;  %v2706_v50 = vsel %vm2673_vm12, %v2657_v47, %v2690_v27  ;;  %v8114_v4 = vld [vmem:[#allocation2 + $0x20] sm:$0xf]  ;;  %v3048_v27 = vld [vmem:[#allocation2 + $0x88] sm:$0xf] }
 0x1fa   :  { %v2688_v18 = vmul.f32 %v7945_v39, %v2655_v33  ;;  %v3025_v24 = vsel %vm7005_vm3, %v2890_v41, %v3024_v35  ;;  %v3028_v15 = vsel %vm7011_vm5, %v2891_v20, %v3027_v1  ;;  %v2733_v6 = vmul.f32 %v2717_v32, %v2701_v21  ;;  %v8107_v35 = vld [vmem:[#allocation2 + $0x18] sm:$0xf]  ;;  %v3018_v1 = vld [vmem:[#allocation2 + $0x60] sm:$0xf]  ;;  %v2721_v20 = vld [vmem:[#allocation9 + $0x68] sm:$0xff] }
 0x1fb   :  { %v3013_v2 = vsel %vm7005_vm3, %v2874_v45, %v3012_v7  ;;  %v3016_v5 = vsel %vm7011_vm5, %v2875_v19, %v3015_v48  ;;  %3026 = vst [vmem:[#allocation2 + $0x68] sm:$0xf] %v3025_v24  ;;  %3029 = vst [vmem:[#allocation2 + $0x6c] sm:$0x1] %v3028_v15  ;;  %v2898_v58 = vor.u32 %v2896_v57, %v2895_v49  ;;  %v2899_v43 = vrot.slane %v2895_v49, 4  ;;  %v6695_v48 = vld [vmem:[#allocation12 + $0xb0] sm:$0xff]  }
 0x1fc   :  { %3014 = vst [vmem:[#allocation2 + $0x58] sm:$0xf] %v3013_v2  ;;  %3017 = vst [vmem:[#allocation2 + $0x5c] sm:$0x1] %v3016_v5  ;;  %v2738_v55 = vmul.f32 %v2722_v59, %v2706_v50  ;;  %v2704_v12 = vsel %vm2671_vm13, %v2655_v33, %v2688_v18  ;;  %v2658_v56 = vadd.f32 %v6295_v28, %v8021_v3  ;;  %v3051_v19 = vld [vmem:[#allocation2 + $0x8c] sm:$0x1] }
 0x1fd   :  { %v5557_v42 = vcombine.low %v7850_v9, %v8083_v46  ;;  %v2656_v30 = vadd.f32 %v2631_v44, %v8024_v51  ;;  %v3031_v22 = vsel %vm7005_vm3, %v2898_v58, %v3030_v38  ;;  %v3034_v16 = vsel %vm7011_vm5, %v2899_v43, %v3033_v40  ;;  %v8105_v9 = vld [vmem:[#allocation2 + $0x28] sm:$0xf]  ;;  %v9062_v49 = vld [vmem:[#allocation42_spill] sm:$0xff] }
 0x1fe   :  { %v5713_v47 = vpack.c.bf16 %v2733_v6, %v2733_v6  ;;  %v5718_v0 = vpack.c.bf16 %v2738_v55, %v2738_v55  ;;  %3032 = vst [vmem:[#allocation2 + $0x70] sm:$0xf] %v3031_v22  ;;  %3035 = vst [vmem:[#allocation2 + $0x74] sm:$0x1] %v3034_v16  ;;  %v2736_v33 = vmul.f32 %v2720_v29, %v2704_v12  ;;  %vm2674_vm14 = vcmp.gt.f32.partialorder %v2658_v56, 0.0  ;;  %v9063_v15 = vld [vmem:[#allocation26_spill] sm:$0xff] }
 0x1ff   :  { %v2691_v3 = vmul.f32 %v7945_v39, %v2658_v56  ;;  %6312 = vmatprep.mubr.bf16.mxu1 %v5557_v42  ;;  %vm2672_vm15 = vcmp.gt.f32.partialorder %v2656_v30, 0.0  ;;  %v2689_v25 = vmul.f32 %v7945_v39, %v2656_v30  ;;  %v8112_v7 = vcombine.low %v8102_v36, %v8107_v35  ;;  %v8126_v58 = vld [vmem:[#allocation2 + $0x30] sm:$0xf]  ;;  %v6698_v43 = vld [vmem:[#allocation12 + $0xa8] sm:$0xff]   ;;  %v3039_v42 = vld [vmem:[#allocation2 + $0x7c] sm:$0x1] }
 0x200   :  { %v2877_v51 = vshrl.u32 %v5713_v47, 16  ;;  %v2880_v11 = vshll.u32 %v5713_v47, 16  ;;  %v2917_v13 = vshrl.u32 %v5718_v0, 16  ;;  %v2920_v34 = vshll.u32 %v5718_v0, 16 }
 0x201   :  { %v5716_v28 = vpack.c.bf16 %v2736_v33, %v2736_v33  ;;  %v2707_v63 = vsel %vm2674_vm14, %v2658_v56, %v2691_v3  ;;  %9060 = vst [vmem:[#allocation24_spill] sm:$0xff] %v8112_v7  ;;  %v8118_v45 = vcombine.low %v8114_v4, %v8105_v9  ;;  %v2705_v39 = vsel %vm2672_vm15, %v2656_v30, %v2689_v25  ;;  %v3036_v56 = vld [vmem:[#allocation2 + $0x78] sm:$0xf]  ;;  %v8136_v30 = vld [vmem:[#allocation2 + $0xc] sm:$0x1]  ;;  %v6701_v25 = vld [vmem:[#allocation12 + $0xa0] sm:$0xff]  }
 0x202   :  { %v2879_v14 = vrot.slane %v2877_v51, 7  ;;  %v2919_v57 = vrot.slane %v2917_v13, 7  ;;  %v2739_v41 = vmul.f32 %v2723_v31, %v2707_v63  ;;  %6313 = vmatmul.mubr.bf16.vlgmr.msra.gmra.mxu1 %v8112_v7  ;;  %v3347_v59 = vshrl.u32 %v8083_v46, 16  ;;  %v8138_v33 = vld [vmem:[#allocation2 + $0x38] sm:$0xf] }
 0x203   :  { %9061 = vst [vmem:[#allocation33_spill] sm:$0xff] %v8118_v45  ;;  %v2901_v32 = vshrl.u32 %v5716_v28, 16  ;;  %6361 = vmatpush3.bf16.msra.mxu1 %v9063_v15  ;;  %6316 = vmatprep.mubr.bf16.mxu1 %v8118_v45  ;;  %v2904_v5 = vshll.u32 %v5716_v28, 16  ;;  %v2737_v40 = vmul.f32 %v2721_v20, %v2705_v39  ;;  %v3054_v31 = vld [vmem:[#allocation2 + $0x90] sm:$0xf]  ;;  %v8143_v13 = vcombine.low %v8126_v58, %v8138_v33 }
 0x204   :  { %v2882_v50 = vor.u32 %v2880_v11, %v2879_v14  ;;  %v2883_v18 = vrot.slane %v2879_v14, 4  ;;  %v2922_v44 = vor.u32 %v2920_v34, %v2919_v57  ;;  %v2923_v24 = vrot.slane %v2919_v57, 4  ;;  %6362 = vmatprep.subr.bf16.mxu1 %v6695_v48  ;;  %v8149_v28 = vld [vmem:[#allocation2 + $0x14] sm:$0x1]  ;;  %v3045_v39 = vld [vmem:[#allocation2 + $0x84] sm:$0x1] }
 0x205   :  { %v2903_v2 = vrot.slane %v2901_v32, 7  ;;  %v5719_v38 = vpack.c.bf16 %v2739_v41, %v2739_v41  ;;  %v3349_v0 = vrot.slane %v3347_v59, 4  ;;  %v5717_v51 = vpack.c.bf16 %v2737_v40, %v2737_v40  ;;  %9064 = vst [vmem:[#allocation34_spill] sm:$0xff] %v8143_v13  ;;  %v3042_v32 = vld [vmem:[#allocation2 + $0x80] sm:$0xf] }
 0x206   :  { %v3019_v6 = vsel %vm7005_vm3, %v2882_v50, %v3018_v1  ;;  %v3022_v55 = vsel %vm7011_vm5, %v2883_v18, %v3021_v52  ;;  %v3049_v29 = vsel %vm7005_vm3, %v2922_v44, %v3048_v27  ;;  %v3052_v12 = vsel %vm7011_vm5, %v2923_v24, %v3051_v19  ;;  %v8155_v24 = vld [vmem:[#allocation2 + $0x1c] sm:$0x1] }
 0x207   :  { %3020 = vst [vmem:[#allocation2 + $0x60] sm:$0xf] %v3019_v6  ;;  %3023 = vst [vmem:[#allocation2 + $0x64] sm:$0x1] %v3022_v55  ;;  %v2906_v22 = vor.u32 %v2904_v5, %v2903_v2  ;;  %v2907_v16 = vrot.slane %v2903_v2, 4  ;;  %v2925_v47 = vshrl.u32 %v5719_v38, 16  ;;  %6363 = vmatpush3.bf16.msra.mxu1 %v6695_v48 }
 0x208   :  { %3050 = vst [vmem:[#allocation2 + $0x88] sm:$0xf] %v3049_v29  ;;  %3053 = vst [vmem:[#allocation2 + $0x8c] sm:$0x1] %v3052_v12  ;;  %v2928_v3 = vshll.u32 %v5719_v38, 16  ;;  %v3350_v11 = vshll.u32 %v8083_v46, 16  ;;  %6364 = vmatprep.subr.bf16.mxu1 %v6698_v43 }
 0x209   :  { %v3037_v34 = vsel %vm7005_vm3, %v2906_v22, %v3036_v56  ;;  %v3040_v1 = vsel %vm7011_vm5, %v2907_v16, %v3039_v42  ;;  %v2927_v52 = vrot.slane %v2925_v47, 7  ;;  %v3361_v63 = vshrl.u32 %v8102_v36, 16  ;;  %v3057_v48 = vld [vmem:[#allocation2 + $0x94] sm:$0x1]  ;;  %v8164_v55 = vld [vmem:[#allocation2 + $0x58] sm:$0xf] }
 0x20a   :  { %3038 = vst [vmem:[#allocation2 + $0x78] sm:$0xf] %v3037_v34  ;;  %3041 = vst [vmem:[#allocation2 + $0x7c] sm:$0x1] %v3040_v1  ;;  %v2909_v14 = vshrl.u32 %v5717_v51, 16  ;;  %v2912_v57 = vshll.u32 %v5717_v51, 16  ;;  %6317 = vmatmul.mubr.bf16.gmra.mxu1 %v8143_v13  ;;  %v5561_v34 = vcombine.low %v9062_v49, %v8164_v55 }
 0x20b   :  { %v3352_v27 = vrot.slane %v3350_v11, 5  ;;  %v3356_v41 = vshll.u32 %v8136_v30, 16  ;;  %v2930_v20 = vor.u32 %v2928_v3, %v2927_v52  ;;  %v2931_v19 = vrot.slane %v2927_v52, 4  ;;  %6365 = vmatpush3.bf16.msra.mxu1 %v6698_v43  ;;  %v6704_v29 = vld [vmem:[#allocation12 + $0x98] sm:$0xff]   ;;  %v8167_v3 = vld [vmem:[#allocation2 + $0x24] sm:$0x1] }
 0x20c   :  { %v3363_v59 = vrot.slane %v3361_v63, 4  ;;  %v3364_v50 = vshll.u32 %v8102_v36, 16  ;;  %v2911_v18 = vrot.slane %v2909_v14, 7  ;;  %v3370_v15 = vshll.u32 %v8149_v28, 16  ;;  %6366 = vmatprep.subr.bf16.mxu1 %v6701_v25  ;;  %v8185_v63 = vld [vmem:[#allocation2 + $0x2c] sm:$0x1]  ;;  %6320 = vmatprep.mubr.bf16.mxu1 %v5561_v34 }
 0x20d   :  { %v3353_v44 = vor.u32 %v3352_v27, %v3349_v0  ;;  %v3375_v2 = vshrl.u32 %v8107_v35, 16  ;;  %v3055_v5 = vsel %vm7005_vm3, %v2930_v20, %v3054_v31  ;;  %v3058_v38 = vsel %vm7011_vm5, %v2931_v19, %v3057_v48  ;;  %v6707_v48 = vld [vmem:[#allocation12 + $0x90] sm:$0xff]  }
 0x20e   :  { %v3366_v40 = vrot.slane %v3364_v50, 5  ;;  %v3378_v6 = vshll.u32 %v8107_v35, 16  ;;  %3056 = vst [vmem:[#allocation2 + $0x90] sm:$0xf] %v3055_v5  ;;  %3059 = vst [vmem:[#allocation2 + $0x94] sm:$0x1] %v3058_v38  ;;  %v2914_v12 = vor.u32 %v2912_v57, %v2911_v18 }
 0x20f   :  { %v2915_v56 = vrot.slane %v2911_v18, 4  ;;  %v3354_v42 = vrot.slane %v3353_v44, 4  ;;  %v3358_v22 = vrot.slane %v3356_v41, 5  ;;  %v3377_v16 = vrot.slane %v3375_v2, 4  ;;  %6367 = vmatpush3.bf16.msra.mxu1 %v6701_v25  ;;  %v8191_v41 = vld [vmem:[#allocation2 + $0x60] sm:$0xf] }
 0x210   :  { %v3367_v43 = vor.u32 %v3366_v40, %v3363_v59  ;;  %v3380_v47 = vrot.slane %v3378_v6, 5  ;;  %v3384_v0 = vshll.u32 %v8155_v24, 16  ;;  %v3043_v31 = vsel %vm7005_vm3, %v2914_v12, %v3042_v32  ;;  %6368 = vmatprep.subr.bf16.mxu1 %v6704_v29  ;;  %v8198_v19 = vld [vmem:[#allocation2 + $0x34] sm:$0x1]  ;;  %v8201_v18 = vld [vmem:[#allocation2 + $0x68] sm:$0xf] }
 0x211   :  { %v3046_v51 = vsel %vm7011_vm5, %v2915_v56, %v3045_v39  ;;  %v8175_v11 = vsel %vm7033_vm8, %v3354_v42, %v3358_v22  ;;  %3044 = vst [vmem:[#allocation2 + $0x80] sm:$0xf] %v3043_v31  ;;  %v3372_v17 = vrot.slane %v3370_v15, 5  ;;  %v3389_v14 = vshrl.u32 %v8114_v4, 16  ;;  %v8211_v38 = vld [vmem:[#allocation2 + $0x3c] sm:$0x1] }
 0x212   :  { %3047 = vst [vmem:[#allocation2 + $0x84] sm:$0x1] %v3046_v51  ;;  %v5574_v23 = vcombine.low %v3345_v10, %v8175_v11  ;;  %v3368_v1 = vrot.slane %v3367_v43, 4  ;;  %v3381_v52 = vor.u32 %v3380_v47, %v3377_v16  ;;  %v3392_v25 = vshll.u32 %v8114_v4, 16  ;;  %v6710_v40 = vld [vmem:[#allocation12 + $0x88] sm:$0xff]   ;;  %v6712_v31 = vld [vmem:[#allocation12 + $0x80] sm:$0xff]  }
 0x213   :  { %v3398_v57 = vshll.u32 %v8167_v3, 16  ;;  %v3403_v27 = vshrl.u32 %v8105_v9, 16  ;;  %v3386_v10 = vrot.slane %v3384_v0, 5  ;;  %v3406_v20 = vshll.u32 %v8105_v9, 16  ;;  %6369 = vmatpush3.bf16.msra.mxu1 %v6704_v29  ;;  %v6702_v29 = vld [vmem:[#allocation12 + $0xf0] sm:$0xff]  }
 0x214   :  { %6344 = vmatprep.mubr.bf16.mxu0 %v5574_v23  ;;  %v8195_v61 = vsel %vm7033_vm8, %v3368_v1, %v3372_v17  ;;  %v3382_v62 = vrot.slane %v3381_v52, 4  ;;  %v3391_v32 = vrot.slane %v3389_v14, 4  ;;  %v3394_v39 = vrot.slane %v3392_v25, 5  ;;  %6370 = vmatprep.subr.bf16.mxu1 %v6707_v48  ;;  %v8223_v0 = vld [vmem:[#allocation2 + $0x78] sm:$0xf] }
 0x215   :  { %v3405_v59 = vrot.slane %v3403_v27, 4  ;;  %v3412_v50 = vshll.u32 %v8185_v63, 16  ;;  %v3400_v15 = vrot.slane %v3398_v57, 5  ;;  %v3408_v2 = vrot.slane %v3406_v20, 5  ;;  %v8227_v17 = vld [vmem:[#allocation2 + $0x5c] sm:$0x1] }
 0x216   :  { %v8205_v44 = vsel %vm7033_vm8, %v3382_v62, %v3386_v10  ;;  %v8209_v5 = vcombine.low %v8191_v41, %v8201_v18  ;;  %v3395_v12 = vor.u32 %v3394_v39, %v3391_v32  ;;  %v3417_v56 = vshrl.u32 %v8126_v58, 16  ;;  %v6766_v52 = vld [vmem:[#allocation12 + $0xf8] sm:$0xff]   ;;  %v8229_v62 = vld [vmem:[#allocation2 + $0x70] sm:$0xf]  ;;  %v6705_v39 = vld [vmem:[#allocation12 + $0xe8] sm:$0xff]  }
 0x217   :  { %v8215_v6 = vcombine.low %v8195_v61, %v8205_v44  ;;  %v3420_v42 = vshll.u32 %v8126_v58, 16  ;;  %v3409_v22 = vor.u32 %v3408_v2, %v3405_v59  ;;  %v3426_v43 = vshll.u32 %v8198_v19, 16  ;;  %6371 = vmatpush3.bf16.msra.mxu1 %v6707_v48 }
 0x218   :  { %9065 = vst [vmem:[#allocation35_spill] sm:$0xff] %v8209_v5  ;;  %6321 = vmatmul.mubr.bf16.gmra.mxu1 %v8209_v5  ;;  %v3431_v16 = vshrl.u32 %v8138_v33, 16  ;;  %v3434_v47 = vshll.u32 %v8138_v33, 16  ;;  %v3396_v51 = vrot.slane %v3395_v12, 4  ;;  %v3419_v34 = vrot.slane %v3417_v56, 4  ;;  %6372 = vmatprep.subr.bf16.mxu1 %v6710_v40  ;;  %v6711_v5 = vld [vmem:[#allocation12 + $0xd8] sm:$0xff]  }
 0x219   :  { %9066 = vst [vmem:[#allocation28_spill] sm:$0xff] %v8215_v6  ;;  %6345 = vmatmul.mubr.bf16.vlgmr.msra.gmra.mxu0 %v8215_v6  ;;  %v3422_v23 = vrot.slane %v3420_v42, 5  ;;  %v3440_v1 = vshll.u32 %v8211_v38, 16  ;;  %v3410_v14 = vrot.slane %v3409_v22, 4  ;;  %v3414_v25 = vrot.slane %v3412_v50, 5 }
 0x21a   :  { %6393 = vmatpush3.bf16.msra.mxu0 %v6766_v52  ;;  %v3433_v57 = vrot.slane %v3431_v16, 4  ;;  %v3436_v27 = vrot.slane %v3434_v47, 5  ;;  %v8233_v10 = vsel %vm7033_vm8, %v3396_v51, %v3400_v15  ;;  %v3428_v32 = vrot.slane %v3426_v43, 5  ;;  %v8239_v59 = vld [vmem:[#allocation2 + $0x80] sm:$0xf]  ;;  %v8262_v52 = vld [vmem:[#allocation12 + $0x138] sm:$0xff]  }
 0x21b   :  { %6394 = vmatprep.subr.bf16.mxu0 %v6702_v29  ;;  %v3423_v20 = vor.u32 %v3422_v23, %v3419_v34  ;;  %v8237_v48 = vcombine.low %v8229_v62, %v8223_v0  ;;  %v8243_v50 = vsel %vm7033_vm8, %v3410_v14, %v3414_v25  ;;  %v3442_v12 = vrot.slane %v3440_v1, 5  ;;  %v8246_v15 = vld [vmem:[#allocation2 + $0x88] sm:$0xf]  ;;  %v8255_v47 = vld [vmem:[#allocation2 + $0x64] sm:$0x1]  ;;  %6373 = vmatpush3.bf16.msra.mxu1 %v6710_v40 }
 0x21c   :  { %v3437_v2 = vor.u32 %v3436_v27, %v3433_v57  ;;  %v3459_v56 = vshrl.u32 %v8164_v55, 16  ;;  %v8250_v42 = vcombine.low %v8233_v10, %v8243_v50  ;;  %v3462_v43 = vshll.u32 %v8164_v55, 16  ;;  %6374 = vmatprep.subr.bf16.mxu1 %v6712_v31  ;;  %v8269_v25 = vld [vmem:[#allocation2 + $0x6c] sm:$0x1]  ;;  %v8272_v27 = vld [vmem:[#allocation2 + $0x54] sm:$0x1] }
 0x21d   :  { %9067 = vst [vmem:[#allocation23_spill] sm:$0xff] %v8237_v48  ;;  %v3424_v22 = vrot.slane %v3423_v20, 4  ;;  %6324 = vmatprep.mubr.bf16.mxu1 %v8237_v48  ;;  %v3468_v16 = vshll.u32 %v8227_v17, 16  ;;  %v8259_v23 = vcombine.low %v8239_v59, %v8246_v15  ;;  %v3473_v1 = vshrl.u32 %v8191_v41, 16  ;;  %v8287_v20 = vld [vmem:[#allocation2 + $0x74] sm:$0x1] }
 0x21e   :  { %9068 = vst [vmem:[#allocation31_spill] sm:$0xff] %v8250_v42  ;;  %6395 = vmatpush3.bf16.msra.mxu0 %v6702_v29  ;;  %v3438_v51 = vrot.slane %v3437_v2, 4  ;;  %v3461_v34 = vrot.slane %v3459_v56, 4  ;;  %6348 = vmatprep.mubr.bf16.mxu0 %v8250_v42  ;;  %v3464_v40 = vrot.slane %v3462_v43, 5  ;;  %v6708_v29 = vld [vmem:[#allocation12 + $0xe0] sm:$0xff]   ;;  %v3476_v57 = vshll.u32 %v8191_v41, 16 }
 0x21f   :  { %9069 = vst [vmem:[#allocation27_spill] sm:$0xff] %v8259_v23  ;;  %v8267_v14 = vsel %vm7033_vm8, %v3424_v22, %v3428_v32  ;;  %6396 = vmatprep.subr.bf16.mxu0 %v6705_v39  ;;  %v3475_v56 = vrot.slane %v3473_v1, 4  ;;  %v3482_v32 = vshll.u32 %v8255_v47, 16  ;;  %v3487_v22 = vshrl.u32 %v8201_v18, 16  ;;  %6375 = vmatpush3.bf16.msra.mxu1 %v6712_v31 }
 0x220   :  { %v8277_v2 = vsel %vm7033_vm8, %v3438_v51, %v3442_v12  ;;  %6325 = vmatmul.mubr.bf16.gmra.mxu1 %v8259_v23  ;;  %v3465_v21 = vor.u32 %v3464_v40, %v3461_v34  ;;  %v3478_v53 = vrot.slane %v3476_v57, 5  ;;  %v3490_v48 = vshll.u32 %v8201_v18, 16  ;;  %6424 = vmatprep.subr.bf16.mxu1 %v8262_v52 }
 0x221   :  { %v8284_v43 = vcombine.low %v8267_v14, %v8277_v2  ;;  %v3470_v12 = vrot.slane %v3468_v16, 5  ;;  %v3489_v51 = vrot.slane %v3487_v22, 4  ;;  %v3496_v1 = vshll.u32 %v8269_v25, 16 }
 0x222   :  { %6397 = vmatpush3.bf16.msra.mxu0 %v6705_v39  ;;  %v5591_v23 = vrot.slane %v8083_v46, 9  ;;  %v3466_v42 = vrot.slane %v3465_v21, 4  ;;  %v3479_v34 = vor.u32 %v3478_v53, %v3475_v56  ;;  %v3492_v40 = vrot.slane %v3490_v48, 5  ;;  %v8305_v21 = vld [vmem:[#allocation2 + $0x7c] sm:$0x1] }
 0x223   :  { %9070 = vst [vmem:[#allocation38_spill] sm:$0xff] %v8284_v43  ;;  %6349 = vmatmul.mubr.bf16.gmra.mxu0 %v8284_v43  ;;  %6398 = vmatprep.subr.bf16.mxu0 %v6708_v29  ;;  %v3788_v57 = vrot.slane %v8136_v30, 5  ;;  %v3484_v6 = vrot.slane %v3482_v32, 5  ;;  %v3501_v31 = vshrl.u32 %v8229_v62, 16  ;;  %v3504_v39 = vshll.u32 %v8229_v62, 16 }
 0x224   :  { %v3510_v16 = vshll.u32 %v8287_v20, 16  ;;  %v8299_v22 = vsel %vm7033_vm8, %v3466_v42, %v3470_v12  ;;  %v3480_v13 = vrot.slane %v3479_v34, 4  ;;  %v3493_v43 = vor.u32 %v3492_v40, %v3489_v51  ;;  %v6713_v40 = vld [vmem:[#allocation12 + $0xd0] sm:$0xff]  }
 0x225   :  { %v8303_v53 = vsel %vm7315_vm11, %v5591_v23, %v3788_v57  ;;  %v9071_v30 = vsel %vm7033_vm8, %v7938_v26, %v7940_v37  ;;  %v3503_v56 = vrot.slane %v3501_v31, 4  ;;  %v3506_v32 = vrot.slane %v3504_v39, 5 }
 0x226   :  { %v5578_v48 = vcombine.low %v9071_v30, %v8299_v22  ;;  %6399 = vmatpush3.bf16.msra.mxu0 %v6708_v29  ;;  %v5606_v42 = vcombine.low %v7955_v8, %v8303_v53  ;;  %v8317_v12 = vsel %vm7033_vm8, %v3480_v13, %v3484_v6  ;;  %v3494_v23 = vrot.slane %v3493_v43, 4 }
 0x227   :  { %v3498_v51 = vrot.slane %v3496_v1, 5  ;;  %6400 = vmatprep.subr.bf16.mxu0 %v6711_v5  ;;  %v3515_v34 = vshrl.u32 %v8223_v0, 16  ;;  %v3507_v26 = vor.u32 %v3506_v32, %v3503_v56  ;;  %v3518_v37 = vshll.u32 %v8223_v0, 16  ;;  %v8329_v1 = vld [vmem:[#allocation2 + $0x84] sm:$0x1] }
 0x228   :  { %6352 = vmatprep.mubr.bf16.mxu0 %v5578_v48  ;;  %6376 = vmatprep.mubr.bf16.mxu1 %v5606_v42  ;;  %v3524_v29 = vshll.u32 %v8305_v21, 16  ;;  %v5592_v8 = vrot.slane %v8102_v36, 9  ;;  %v3792_v6 = vrot.slane %v8149_v28, 5  ;;  %v5593_v43 = vrot.slane %v8107_v35, 9 }
 0x229   :  { %v8325_v57 = vsel %vm7033_vm8, %v3494_v23, %v3498_v51  ;;  %v3517_v13 = vrot.slane %v3515_v34, 4  ;;  %v3508_v39 = vrot.slane %v3507_v26, 4  ;;  %v3512_v30 = vrot.slane %v3510_v16, 5  ;;  %v6715_v23 = vld [vmem:[#allocation12 + $0xc8] sm:$0xff]  }
 0x22a   :  { %9072 = vst [vmem:[#allocation40_spill] sm:$0xff] %v8325_v57  ;;  %v8333_v31 = vcombine.low %v8317_v12, %v8325_v57  ;;  %6401 = vmatpush3.bf16.msra.mxu0 %v6711_v5  ;;  %v3520_v48 = vrot.slane %v3518_v37, 5  ;;  %v8337_v42 = vsel %vm7315_vm11, %v5592_v8, %v3792_v6  ;;  %v3796_v56 = vrot.slane %v8155_v24, 5  ;;  %v8343_v5 = vld [vmem:[#allocation2 + $0x8c] sm:$0x1] }
 0x22b   :  { %6402 = vmatprep.subr.bf16.mxu0 %v6713_v40  ;;  %v3529_v28 = vshrl.u32 %v8239_v59, 16  ;;  %v3532_v32 = vshll.u32 %v8239_v59, 16  ;;  %v3526_v34 = vrot.slane %v3524_v29, 5  ;;  %v3538_v16 = vshll.u32 %v8329_v1, 16 }
 0x22c   :  { %9073 = vst [vmem:[#allocation22_spill] sm:$0xff] %v8333_v31  ;;  %6353 = vmatmul.mubr.bf16.gmra.mxu0 %v8333_v31  ;;  %v3521_v51 = vor.u32 %v3520_v48, %v3517_v13  ;;  %v3543_v26 = vshrl.u32 %v8246_v15, 16  ;;  %v8349_v37 = vsel %vm7315_vm11, %v5593_v43, %v3796_v56  ;;  %v3546_v6 = vshll.u32 %v8246_v15, 16  ;;  %v6717_v31 = vld [vmem:[#allocation12 + $0x130] sm:$0xff]  }
 0x22d   :  { %v3531_v24 = vrot.slane %v3529_v28, 4  ;;  %v3534_v8 = vrot.slane %v3532_v32, 5  ;;  %v8354_v45 = vsel %vm7033_vm8, %v3508_v39, %v3512_v30  ;;  %v8358_v29 = vcombine.low %v8337_v42, %v8349_v37  ;;  %v6718_v28 = vld [vmem:[#allocation12 + $0xc0] sm:$0xff]  }
 0x22e   :  { %v3522_v13 = vrot.slane %v3521_v51, 4  ;;  %6403 = vmatpush3.bf16.msra.mxu0 %v6713_v40  ;;  %v3545_v48 = vrot.slane %v3543_v26, 4  ;;  %v3548_v57 = vrot.slane %v3546_v6, 5  ;;  %v3552_v43 = vshll.u32 %v8343_v5, 16  ;;  %v6719_v6 = vld [vmem:[#allocation12 + $0x128] sm:$0xff]  }
 0x22f   :  { %v3535_v7 = vor.u32 %v3534_v8, %v3531_v24  ;;  %v5594_v56 = vrot.slane %v8114_v4, 9  ;;  %6404 = vmatprep.subr.bf16.mxu0 %v6715_v23  ;;  %6377 = vmatmul.mubr.bf16.vlgmr.msra.gmra.mxu1 %v8358_v29  ;;  %v3800_v40 = vrot.slane %v8167_v3, 5  ;;  %v5595_v30 = vrot.slane %v8105_v9, 9 }
 0x230   :  { %v8364_v39 = vsel %vm7033_vm8, %v3522_v13, %v3526_v34  ;;  %v3804_v32 = vrot.slane %v8185_v63, 5  ;;  %v3540_v24 = vrot.slane %v3538_v16, 5  ;;  %v3549_v8 = vor.u32 %v3548_v57, %v3545_v48  ;;  %6425 = vmatpush3.bf16.msra.mxu1 %v8262_v52  ;;  %v6721_v13 = vld [vmem:[#allocation12 + $0x178] sm:$0xff]  }
 0x231   :  { %v8372_v51 = vcombine.low %v8354_v45, %v8364_v39  ;;  %v3536_v26 = vrot.slane %v3535_v7, 4  ;;  %v8377_v34 = vsel %vm7315_vm11, %v5594_v56, %v3800_v40  ;;  %6426 = vmatprep.subr.bf16.mxu1 %v6717_v31  ;;  %v5596_v63 = vrot.slane %v8126_v58, 9 }
 0x232   :  { %v8381_v3 = vsel %vm7315_vm11, %v5595_v30, %v3804_v32  ;;  %6405 = vmatpush3.bf16.msra.mxu0 %v6715_v23  ;;  %v3550_v52 = vrot.slane %v3549_v8, 4  ;;  %v3554_v57 = vrot.slane %v3552_v43, 5  ;;  %v3808_v23 = vrot.slane %v8198_v19, 5 }
 0x233   :  { %6356 = vmatprep.mubr.bf16.mxu0 %v8372_v51  ;;  %v8387_v7 = vsel %vm7033_vm8, %v3536_v26, %v3540_v24  ;;  %v8391_v16 = vcombine.low %v8377_v34, %v8381_v3  ;;  %6406 = vmatprep.subr.bf16.mxu0 %v6718_v28  ;;  %v5597_v48 = vrot.slane %v8138_v33, 9  ;;  %v3812_v56 = vrot.slane %v8211_v38, 5 }
 0x234   :  { %v8398_v40 = vsel %vm7033_vm8, %v3550_v52, %v3554_v57  ;;  %6427 = vmatpush3.bf16.msra.mxu1 %v6717_v31  ;;  %v9074_v43 = vrot.slane %v8272_v27, 5  ;;  %v9075_v30 = vrot.slane %v9062_v49, 9  ;;  %v5599_v19 = vrot.slane %v8164_v55, 9 }
 0x235   :  { %6380 = vmatprep.mubr.bf16.mxu1 %v8391_v16  ;;  %v3820_v26 = vrot.slane %v8227_v17, 5  ;;  %v8411_v38 = vcombine.low %v8387_v7, %v8398_v40  ;;  %v8415_v24 = vsel %vm7315_vm11, %v5596_v63, %v3808_v23  ;;  %v8419_v27 = vsel %vm7315_vm11, %v5597_v48, %v3812_v56  ;;  %6428 = vmatprep.subr.bf16.mxu1 %v6719_v6  ;;  %v6725_v48 = vld [vmem:[#allocation12 + $0x118] sm:$0xff]  }
 0x236   :  { %v3817_v32 = vsel %vm7315_vm11, %v9075_v30, %v9074_v43  ;;  %6407 = vmatpush3.bf16.msra.mxu0 %v6718_v28  ;;  %v5622_v49 = vcombine.low %v8083_v46, %v8102_v36  ;;  %v8425_v17 = vcombine.low %v8415_v24, %v8419_v27  ;;  %v6723_v28 = vld [vmem:[#allocation12 + $0x120] sm:$0xff]   ;;  %v5600_v63 = vrot.slane %v8191_v41, 9 }
 0x237   :  { %v8429_v31 = vsel %vm7315_vm11, %v5599_v19, %v3820_v26  ;;  %6456 = vmatprep.subr.bf16.mxu0 %v6721_v13  ;;  %6357 = vmatmul.mubr.bf16.gmra.mxu0 %v8411_v38  ;;  %v3824_v46 = vrot.slane %v8255_v47, 5  ;;  %v5603_v36 = vrot.slane %v8223_v0, 9  ;;  %v3836_v52 = vrot.slane %v8305_v21, 5  ;;  %v8472_v26 = vld [vmem:[#allocation2 + $0x40] sm:$0xf] }
 0x238   :  { %v5610_v8 = vcombine.low %v3817_v32, %v8429_v31  ;;  %6408 = vmatprep.mubr.bf16.mxu0 %v5622_v49  ;;  %6381 = vmatmul.mubr.bf16.gmra.mxu1 %v8425_v17  ;;  %v5601_v57 = vrot.slane %v8201_v18, 9  ;;  %v3828_v23 = vrot.slane %v8269_v25, 5  ;;  %v5602_v56 = vrot.slane %v8229_v62, 9  ;;  %v6727_v49 = vld [vmem:[#allocation12 + $0x168] sm:$0xff]  }
 0x239   :  { %6429 = vmatpush3.bf16.msra.mxu1 %v6719_v6  ;;  %v3832_v43 = vrot.slane %v8287_v20, 5  ;;  %v8444_v30 = vsel %vm7315_vm11, %v5600_v63, %v3824_v46  ;;  %v5623_v47 = vcombine.low %v8107_v35, %v8114_v4  ;;  %v6724_v6 = vld [vmem:[#allocation12 + $0x170] sm:$0xff]   ;;  %v8450_v21 = vsel %vm7315_vm11, %v5603_v36, %v3836_v52  ;;  %v6730_v52 = vld [vmem:[#allocation12 + $0x160] sm:$0xff]  }
 0x23a   :  { %6384 = vmatprep.mubr.bf16.mxu1 %v5610_v8  ;;  %6430 = vmatprep.subr.bf16.mxu1 %v6723_v28  ;;  %v5624_v25 = vcombine.low %v8105_v9, %v8126_v58  ;;  %v8456_v32 = vsel %vm7315_vm11, %v5601_v57, %v3828_v23  ;;  %v6729_v4 = vld [vmem:[#allocation12 + $0x110] sm:$0xff]   ;;  %v5604_v58 = vrot.slane %v8239_v59, 9  ;;  %v3840_v19 = vrot.slane %v8329_v1, 5  ;;  %v6731_v8 = vld [vmem:[#allocation12 + $0x108] sm:$0xff]  }
 0x23b   :  { %v8460_v20 = vcombine.low %v8444_v30, %v8456_v32  ;;  %v8464_v35 = vsel %vm7315_vm11, %v5602_v56, %v3832_v43  ;;  %v4255_v1 = vshrl.u32 %v8472_v26, 16  ;;  %v4258_v46 = vshll.u32 %v8472_v26, 16 }
 0x23c   :  { %v8468_v9 = vcombine.low %v8464_v35, %v8450_v21  ;;  %v8480_v63 = vsel %vm7315_vm11, %v5604_v58, %v3840_v19  ;;  %v5625_v36 = vcombine.low %v8138_v33, %v8472_v26  ;;  %v5626_v57 = vcombine.low %v8164_v55, %v8191_v41  ;;  %v6733_v55 = vld [vmem:[#allocation12 + $0x158] sm:$0xff]   ;;  %v8499_v41 = vld [vmem:[#allocation2 + $0x44] sm:$0x1]  ;;  %v6740_v19 = vld [vmem:[#allocation12 + $0x1b0] sm:$0xff]  }
 0x23d   :  { %6431 = vmatpush3.bf16.msra.mxu1 %v6723_v28  ;;  %v5605_v28 = vrot.slane %v8246_v15, 9  ;;  %v5638_v33 = vcombine.low %v8175_v11, %v8195_v61  ;;  %v4257_v56 = vrot.slane %v4255_v1, 4  ;;  %v4260_v43 = vrot.slane %v4258_v46, 5  ;;  %v6744_v46 = vld [vmem:[#allocation12 + $0x1a0] sm:$0xff]  }
 0x23e   :  { %6432 = vmatprep.subr.bf16.mxu1 %v6725_v48  ;;  %v5628_v11 = vcombine.low %v8223_v0, %v8239_v59  ;;  %v4264_v61 = vshll.u32 %v8499_v41, 16  ;;  %v5639_v58 = vcombine.low %v8205_v44, %v8233_v10  ;;  %v6739_v0 = vld [vmem:[#allocation12 + $0x148] sm:$0xff]  }
 0x23f   :  { %6409 = vmatmul.mubr.bf16.vlgmr.msra.gmra.mxu0 %v5623_v47  ;;  %v6737_v47 = vld [vmem:[#allocation12 + $0x1b8] sm:$0xff]  }
 0x240   :  { %6412 = vmatprep.mubr.bf16.mxu0 %v5624_v25  ;;  %6457 = vmatpush3.bf16.msra.mxu0 %v6721_v13  ;;  %v3844_v13 = vrot.slane %v8343_v5, 5  ;;  %v5627_v25 = vcombine.low %v8201_v18, %v8229_v62  ;;  %v8510_v62 = vld [vmem:[#allocation2 + $0x90] sm:$0xf]  ;;  %v4266_v59 = vrot.slane %v4264_v61, 5  ;;  %v6752_v61 = vld [vmem:[#allocation12 + $0x180] sm:$0xff]  }
 0x241   :  { %6458 = vmatprep.subr.bf16.mxu0 %v6724_v6  ;;  %6385 = vmatmul.mubr.bf16.gmra.mxu1 %v8460_v20  ;;  %v4269_v10 = vshrl.u32 %v8510_v62, 16 }
 0x242   :  { %6388 = vmatprep.mubr.bf16.mxu1 %v8468_v9  ;;  %6433 = vmatpush3.bf16.msra.mxu1 %v6725_v48  ;;  %v8490_v5 = vsel %vm7315_vm11, %v5605_v28, %v3844_v13  ;;  %v6735_v48 = vld [vmem:[#allocation12 + $0x100] sm:$0xff]   ;;  %v6742_v28 = vld [vmem:[#allocation12 + $0x1a8] sm:$0xff]  }
 0x243   :  { %6434 = vmatprep.subr.bf16.mxu1 %v6729_v4  ;;  %v8494_v23 = vcombine.low %v8480_v63, %v8490_v5  ;;  %v6741_v13 = vld [vmem:[#allocation12 + $0x140] sm:$0xff]  }
 0x244   :  { %6459 = vmatpush3.bf16.msra.mxu0 %v6724_v6  ;;  %v4261_v6 = vor.u32 %v4260_v43, %v4257_v56  ;;  %v5658_v56 = vcombine.low %v8381_v3, %v8415_v24 }
 0x245   :  { %6460 = vmatprep.subr.bf16.mxu0 %v6727_v49 }
 0x246   :  { %6435 = vmatpush3.bf16.msra.mxu1 %v6729_v4  ;;  %v6736_v4 = vld [vmem:[#allocation12 + $0x150] sm:$0xff]   ;;  %v4262_v18 = vrot.slane %v4261_v6, 4 }
 0x247   :  { %6413 = vmatmul.mubr.bf16.gmra.mxu0 %v5625_v36  ;;  %6436 = vmatprep.subr.bf16.mxu1 %v6731_v8  ;;  %v5642_v36 = vcombine.low %v8299_v22, %v8317_v12  ;;  %v5654_v22 = vrot.slane %v8472_v26, 9  ;;  %v4482_v12 = vrot.slane %v8499_v41, 5  ;;  %v6748_v6 = vld [vmem:[#allocation12 + $0x190] sm:$0xff]   ;;  %v6747_v41 = vld [vmem:[#allocation12 + $0x1e8] sm:$0xff]  }
 0x248   :  { %6416 = vmatprep.mubr.bf16.mxu0 %v5626_v57  ;;  %6461 = vmatpush3.bf16.msra.mxu0 %v6727_v49  ;;  %v5640_v49 = vcombine.low %v8243_v50, %v8267_v14  ;;  %v8514_v44 = vsel %vm7033_vm8, %v4262_v18, %v4266_v59  ;;  %v4272_v50 = vshll.u32 %v8510_v62, 16  ;;  %v5629_v14 = vcombine.low %v8246_v15, %v8510_v62  ;;  %v6743_v15 = vld [vmem:[#allocation12 + $0x1f8] sm:$0xff]   ;;  %v6756_v59 = vld [vmem:[#allocation12 + $0x230] sm:$0xff]  }
 0x249   :  { %6462 = vmatprep.subr.bf16.mxu0 %v6730_v52  ;;  %6389 = vmatmul.mubr.bf16.gmra.mxu1 %v8494_v23  ;;  %v5641_v1 = vcombine.low %v8277_v2, %v8514_v44  ;;  %v8541_v3 = vsel %vm7315_vm11, %v5654_v22, %v4482_v12  ;;  %v5662_v18 = vcombine.low %v8450_v21, %v8480_v63  ;;  %v9079_v63 = vld [vmem:[#allocation34_spill] sm:$0xff] }
 0x24a   :  { %6437 = vmatpush3.bf16.msra.mxu1 %v6731_v8  ;;  %6440 = vmatprep.mubr.bf16.mxu1 %v5638_v33  ;;  %v5656_v8 = vcombine.low %v8303_v53, %v8337_v42  ;;  %v4274_v57 = vrot.slane %v4272_v50, 5  ;;  %v8526_v53 = vld [vmem:[#allocation2 + $0x94] sm:$0x1]  ;;  %v6746_v42 = vld [vmem:[#allocation12 + $0x198] sm:$0xff]   ;;  %v6759_v50 = vld [vmem:[#allocation12 + $0x228] sm:$0xff]  }
 0x24b   :  { %6438 = vmatprep.subr.bf16.mxu1 %v6735_v48  ;;  %v6745_v33 = vld [vmem:[#allocation12 + $0x1f0] sm:$0xff]   ;;  %v4278_v43 = vshll.u32 %v8526_v53, 16 }
 0x24c   :  { %6463 = vmatpush3.bf16.msra.mxu0 %v6730_v52  ;;  %v4271_v52 = vrot.slane %v4269_v10, 4  ;;  %v6762_v22 = vld [vmem:[#allocation12 + $0x210] sm:$0xff]  }
 0x24d   :  { %6464 = vmatprep.subr.bf16.mxu0 %v6733_v55  ;;  %v4280_v24 = vrot.slane %v4278_v43, 5  ;;  %v9083_v12 = vld [vmem:[#allocation38_spill] sm:$0xff] }
 0x24e   :  { %6439 = vmatpush3.bf16.msra.mxu1 %v6735_v48  ;;  %v4275_v2 = vor.u32 %v4274_v57, %v4271_v52  ;;  %v5657_v48 = vcombine.low %v8349_v37, %v8377_v34  ;;  %v5644_v37 = vcombine.low %v8364_v39, %v8387_v7  ;;  %v5659_v39 = vcombine.low %v8419_v27, %v8541_v3  ;;  %v6749_v7 = vld [vmem:[#allocation12 + $0x1e0] sm:$0xff]   ;;  %v6754_v27 = vld [vmem:[#allocation12 + $0x238] sm:$0xff]   ;;  %v3079_v57 = vld [vmem:[#allocation2 + $0x4c] sm:$0x1] }
 0x24f   :  { %6417 = vmatmul.mubr.bf16.gmra.mxu0 %v5627_v25  ;;  %6488 = vmatprep.subr.bf16.mxu1 %v6737_v47  ;;  %v9080_v52 = vld [vmem:[#allocation28_spill] sm:$0xff] }
 0x250   :  { %6420 = vmatprep.mubr.bf16.mxu0 %v5628_v11  ;;  %6465 = vmatpush3.bf16.msra.mxu0 %v6733_v55  ;;  %v9076_v55 = vld [vmem:[#allocation40_spill] sm:$0xff]  ;;  %v4276_v34 = vrot.slane %v4275_v2, 4 }
 0x251   :  { %6466 = vmatprep.subr.bf16.mxu0 %v6736_v4  ;;  %6441 = vmatmul.mubr.bf16.vlgmr.msra.gmra.mxu1 %v5639_v58  ;;  %v6751_v58 = vld [vmem:[#allocation12 + $0x1d8] sm:$0xff]  }
 0x252   :  { %6444 = vmatprep.mubr.bf16.mxu1 %v5640_v49  ;;  %6489 = vmatpush3.bf16.msra.mxu1 %v6737_v47  ;;  %v5643_v47 = vcombine.low %v9076_v55, %v8354_v45  ;;  %v6750_v45 = vld [vmem:[#allocation12 + $0x188] sm:$0xff]   ;;  %v8545_v25 = vsel %vm7033_vm8, %v4276_v34, %v4280_v24  ;;  %v4486_v49 = vrot.slane %v8526_v53, 5  ;;  %v4880_v53 = vshll.u32 %v3079_v57, 16 }
 0x253   :  { %6490 = vmatprep.subr.bf16.mxu1 %v6740_v19  ;;  %v5645_v11 = vcombine.low %v8398_v40, %v8545_v25  ;;  %v5655_v40 = vrot.slane %v8510_v62, 9 }
 0x254   :  { %6467 = vmatpush3.bf16.msra.mxu0 %v6736_v4  ;;  %v5660_v4 = vcombine.low %v8429_v31, %v8444_v30  ;;  %v5661_v31 = vcombine.low %v8456_v32, %v8464_v35  ;;  %v6753_v30 = vld [vmem:[#allocation12 + $0x1d0] sm:$0xff]   ;;  %v6755_v32 = vld [vmem:[#allocation12 + $0x1c8] sm:$0xff]  }
 0x255   :  { %6468 = vmatprep.subr.bf16.mxu0 %v6739_v0  ;;  %v8565_v35 = vsel %vm7315_vm11, %v5655_v40, %v4486_v49 }
 0x256   :  { %6491 = vmatpush3.bf16.msra.mxu1 %v6740_v19  ;;  %v9077_v19 = vld [vmem:[#allocation24_spill] sm:$0xff] }
 0x257   :  { %6421 = vmatmul.mubr.bf16.gmra.mxu0 %v5629_v14  ;;  %6492 = vmatprep.subr.bf16.mxu1 %v6742_v28  ;;  %v5663_v14 = vcombine.low %v8490_v5, %v8565_v35  ;;  %v9081_v5 = vld [vmem:[#allocation35_spill] sm:$0xff] }
 0x258   :  { %6469 = vmatpush3.bf16.msra.mxu0 %v6739_v0  ;;  %6472 = vmatprep.mubr.bf16.mxu0 %v5656_v8  ;;  %v8560_v0 = vld [vmem:[#allocation2 + $0x48] sm:$0xf] }
 0x259   :  { %6470 = vmatprep.subr.bf16.mxu0 %v6741_v13  ;;  %6445 = vmatmul.mubr.bf16.gmra.mxu1 %v5641_v1  ;;  %v4871_v10 = vshrl.u32 %v8560_v0, 16  ;;  %v4874_v21 = vshll.u32 %v8560_v0, 16 }
 0x25a   :  { %6448 = vmatprep.mubr.bf16.mxu1 %v5642_v36  ;;  %6493 = vmatpush3.bf16.msra.mxu1 %v6742_v28  ;;  %v9078_v28 = vld [vmem:[#allocation33_spill] sm:$0xff]  ;;  %v6760_v36 = vld [vmem:[#allocation12 + $0x220] sm:$0xff]  }
 0x25b   :  { %6494 = vmatprep.subr.bf16.mxu1 %v6744_v46  ;;  %v4873_v8 = vrot.slane %v4871_v10, 4  ;;  %v4876_v1 = vrot.slane %v4874_v21, 5 }
 0x25c   :  { %6471 = vmatpush3.bf16.msra.mxu0 %v6741_v13  ;;  %v6757_v13 = vld [vmem:[#allocation12 + $0x1c0] sm:$0xff]  }
 0x25d   :  { %6520 = vmatprep.subr.bf16.mxu0 %v6743_v15 }
 0x25e   :  { %6495 = vmatpush3.bf16.msra.mxu1 %v6744_v46  ;;  %v5672_v46 = vcombine.low %v8472_v26, %v8560_v0  ;;  %v3098_v26 = vld [vmem:[#allocation2 + $0x98] sm:$0xf] }
 0x25f   :  { %6473 = vmatmul.mubr.bf16.vlgmr.msra.gmra.mxu0 %v5657_v48  ;;  %6496 = vmatprep.subr.bf16.mxu1 %v6746_v42  ;;  %v4882_v48 = vrot.slane %v4880_v53, 5  ;;  %v4885_v55 = vshrl.u32 %v3098_v26, 16 }
 0x260   :  { %6476 = vmatprep.mubr.bf16.mxu0 %v5658_v56  ;;  %6521 = vmatpush3.bf16.msra.mxu0 %v6743_v15  ;;  %v4877_v15 = vor.u32 %v4876_v1, %v4873_v8  ;;  %v9084_v56 = vld [vmem:[#allocation23_spill] sm:$0xff] }
 0x261   :  { %6522 = vmatprep.subr.bf16.mxu0 %v6745_v33  ;;  %6449 = vmatmul.mubr.bf16.gmra.mxu1 %v5643_v47  ;;  %v4888_v47 = vshll.u32 %v3098_v26, 16 }
 0x262   :  { %6452 = vmatprep.mubr.bf16.mxu1 %v5644_v37  ;;  %6497 = vmatpush3.bf16.msra.mxu1 %v6746_v42  ;;  %v6761_v42 = vld [vmem:[#allocation12 + $0x218] sm:$0xff]   ;;  %v4878_v2 = vrot.slane %v4877_v15, 4  ;;  %v6764_v37 = vld [vmem:[#allocation12 + $0x208] sm:$0xff]  }
 0x263   :  { %6498 = vmatprep.subr.bf16.mxu1 %v6748_v6  ;;  %v4890_v24 = vrot.slane %v4888_v47, 5 }
 0x264   :  { %6523 = vmatpush3.bf16.msra.mxu0 %v6745_v33  ;;  %v9082_v33 = vld [vmem:[#allocation31_spill] sm:$0xff]  ;;  %v4883_v43 = vsel %vm7033_vm8, %v4878_v2, %v4882_v48 }
 0x265   :  { %6524 = vmatprep.subr.bf16.mxu0 %v6747_v41  ;;  %v5682_v34 = vcombine.low %v8514_v44, %v4883_v43 }
 0x266   :  { %6499 = vmatpush3.bf16.msra.mxu1 %v6748_v6  ;;  %v9085_v6 = vld [vmem:[#allocation27_spill] sm:$0xff] }
 0x267   :  { %6477 = vmatmul.mubr.bf16.gmra.mxu0 %v5659_v39  ;;  %6500 = vmatprep.subr.bf16.mxu1 %v6750_v45  ;;  %v6765_v39 = vld [vmem:[#allocation12 + $0x200] sm:$0xff]  }
 0x268   :  { %6480 = vmatprep.mubr.bf16.mxu0 %v5660_v4  ;;  %6525 = vmatpush3.bf16.msra.mxu0 %v6747_v41  ;;  %v4887_v41 = vrot.slane %v4885_v55, 4  ;;  %v3099_v4 = vld [vmem:[#allocation2 + $0x9c] sm:$0x1] }
 0x269   :  { %6526 = vmatprep.subr.bf16.mxu0 %v6749_v7  ;;  %6453 = vmatmul.mubr.bf16.gmra.mxu1 %v5645_v11 }
 0x26a   :  { %6501 = vmatpush3.bf16.msra.mxu1 %v6750_v45  ;;  %6504 = vmatprep.mubr.bf16.mxu1 %v9077_v19  ;;  %v5673_v45 = vcombine.low %v8510_v62, %v3098_v26  ;;  %v4891_v11 = vor.u32 %v4890_v24, %v4887_v41  ;;  %v5692_v62 = vrot.slane %v8560_v0, 9  ;;  %v5086_v19 = vrot.slane %v3079_v57, 5 }
 0x26b   :  { %6502 = vmatprep.subr.bf16.mxu1 %v6752_v61 }
 0x26c   :  { %6527 = vmatpush3.bf16.msra.mxu0 %v6749_v7  ;;  %v9086_v7 = vld [vmem:[#allocation22_spill] sm:$0xff] }
 0x26d   :  { %6528 = vmatprep.subr.bf16.mxu0 %v6751_v58 }
 0x26e   :  { %6503 = vmatpush3.bf16.msra.mxu1 %v6752_v61  ;;  %v4894_v61 = vshll.u32 %v3099_v4, 16 }
 0x26f   :  { %6481 = vmatmul.mubr.bf16.gmra.mxu0 %v5661_v31  ;;  %6552 = vmatprep.subr.bf16.mxu1 %v6754_v27 }
 0x270   :  { %6484 = vmatprep.mubr.bf16.mxu0 %v5662_v18  ;;  %6529 = vmatpush3.bf16.msra.mxu0 %v6751_v58  ;;  %v4892_v58 = vrot.slane %v4891_v11, 4  ;;  %v4896_v44 = vrot.slane %v4894_v61, 5 }
 0x271   :  { %6530 = vmatprep.subr.bf16.mxu0 %v6753_v30  ;;  %6505 = vmatmul.mubr.bf16.vlgmr.msra.gmra.mxu1 %v9078_v28 }
 0x272   :  { %6508 = vmatprep.mubr.bf16.mxu1 %v9079_v63  ;;  %6553 = vmatpush3.bf16.msra.mxu1 %v6754_v27  ;;  %v4897_v27 = vsel %vm7033_vm8, %v4892_v58, %v4896_v44 }
 0x273   :  { %6554 = vmatprep.subr.bf16.mxu1 %v6756_v59  ;;  %v5683_v31 = vcombine.low %v8545_v25, %v4897_v27 }
 0x274   :  { %6531 = vmatpush3.bf16.msra.mxu0 %v6753_v30  ;;  %v5090_v30 = vrot.slane %v3099_v4, 5 }
 0x275   :  { %6532 = vmatprep.subr.bf16.mxu0 %v6755_v32 }
 0x276   :  { %6555 = vmatpush3.bf16.msra.mxu1 %v6756_v59 }
 0x277   :  { %6485 = vmatmul.mubr.bf16.gmra.mxu0 %v5663_v14  ;;  %6556 = vmatprep.subr.bf16.mxu1 %v6759_v50 }
 0x278   :  { %6533 = vmatpush3.bf16.msra.mxu0 %v6755_v32  ;;  %6536 = vmatprep.mubr.bf16.mxu0 %v9080_v52 }
 0x279   :  { %6534 = vmatprep.subr.bf16.mxu0 %v6757_v13  ;;  %6509 = vmatmul.mubr.bf16.gmra.mxu1 %v5672_v46 }
 0x27a   :  { %6512 = vmatprep.mubr.bf16.mxu1 %v9081_v5  ;;  %6557 = vmatpush3.bf16.msra.mxu1 %v6759_v50 }
 0x27b   :  { %6558 = vmatprep.subr.bf16.mxu1 %v6760_v36 }
 0x27c   :  { %6535 = vmatpush3.bf16.msra.mxu0 %v6757_v13 }
 0x27e   :  { %6559 = vmatpush3.bf16.msra.mxu1 %v6760_v36 }
 0x27f   :  { %6537 = vmatmul.mubr.bf16.vlgmr.msra.gmra.mxu0 %v9082_v33  ;;  %6560 = vmatprep.subr.bf16.mxu1 %v6761_v42 }
 0x280   :  { %6540 = vmatprep.mubr.bf16.mxu0 %v9083_v12 }
 0x281   :  { %6513 = vmatmul.mubr.bf16.gmra.mxu1 %v9084_v56 }
 0x282   :  { %6516 = vmatprep.mubr.bf16.mxu1 %v9085_v6  ;;  %6561 = vmatpush3.bf16.msra.mxu1 %v6761_v42 }
 0x283   :  { %6562 = vmatprep.subr.bf16.mxu1 %v6762_v22 }
 0x286   :  { %6563 = vmatpush3.bf16.msra.mxu1 %v6762_v22 }
 0x287   :  { %6541 = vmatmul.mubr.bf16.gmra.mxu0 %v5682_v34  ;;  %6564 = vmatprep.subr.bf16.mxu1 %v6764_v37 }
 0x288   :  { %6544 = vmatprep.mubr.bf16.mxu0 %v9086_v7 }
 0x289   :  { %6517 = vmatmul.mubr.bf16.gmra.mxu1 %v5673_v45 }
 0x28a   :  { %6565 = vmatpush3.bf16.msra.mxu1 %v6764_v37  ;;  %6568 = vmatprep.mubr.bf16.mxu1 %v8358_v29  ;;  %v5087_v29 = vsel %vm7315_vm11, %v5692_v62, %v5086_v19 }
 0x28b   :  { %6566 = vmatprep.subr.bf16.mxu1 %v6765_v39 }
 0x28e   :  { %6567 = vmatpush3.bf16.msra.mxu1 %v6765_v39 }
 0x28f   :  { %6545 = vmatmul.mubr.bf16.gmra.mxu0 %v8372_v51  ;;  %v5694_v51 = vcombine.low %v8541_v3, %v5087_v29 }
 0x290   :  { %6548 = vmatprep.mubr.bf16.mxu0 %v8411_v38  ;;  %v5693_v38 = vrot.slane %v3098_v26, 9 }
 0x291   :  { %6569 = vmatmul.mubr.bf16.vlgmr.msra.gmra.mxu1 %v8391_v16 }
 0x292   :  { %6572 = vmatprep.mubr.bf16.mxu1 %v8425_v17  ;;  %v5091_v60 = vsel %vm7315_vm11, %v5693_v38, %v5090_v30 }
 0x293   :  { %v5695_v16 = vcombine.low %v8565_v35, %v5091_v60 }
 0x297   :  { %6549 = vmatmul.mubr.bf16.gmra.mxu0 %v5683_v31 }
 0x299   :  { %6573 = vmatmul.mubr.bf16.gmra.mxu1 %v5694_v51 }
 0x29a   :  { %6576 = vmatprep.mubr.bf16.mxu1 %v8460_v20 }
 0x2a1   :  { %6577 = vmatmul.mubr.bf16.gmra.mxu1 %v8468_v9  ;;  %v8606_v9 = vld [vmem:[%s8924_s6] ss:$0 sm:$0xff]  ;;  %s5393_s6 = sld [smem:[#allocation13 + $0x1]] }
 0x2a2   :  { %6580 = vmatprep.mubr.bf16.mxu1 %v8494_v23 }
 0x2a9   :  { %6581 = vmatmul.mubr.bf16.gmra.mxu1 %v5695_v16 }
 0x2c2   :  { %v6314_v17 = vpop.f32.mrf.mxu1 }
 0x2c3   :  { %v3318_v23 = vadd.f32 %v6314_v17, %v8606_v9 }
 0x2c4   :  { %v3247_v25 = vpop.f32.mrf.mxu1 }
 0x2c5   :  { %v3316_v28 = vadd.f32 %v8606_v9, %v3247_v25 }
 0x2c6   :  { %v6315_v40 = vpop.f32.mrf.mxu1 }
 0x2c7   :  { %v3319_v21 = vadd.f32 %v6315_v40, %v8606_v9 }
 0x2c8   :  { %v3250_v49 = vpop.f32.mrf.mxu1 }
 0x2c9   :  { %v3317_v13 = vadd.f32 %v8606_v9, %v3250_v49 }
 0x2ca   :  { %v6318_v3 = vpop.f32.mrf.mxu1 }
 0x2cb   :  { %v3322_v57 = vadd.f32 %v6318_v3, %v8606_v9 }
 0x2cc   :  { %v3263_v18 = vpop.f32.mrf.mxu1 }
 0x2cd   :  { %v3320_v53 = vadd.f32 %v8606_v9, %v3263_v18 }
 0x2ce   :  { %v6319_v0 = vpop.f32.mrf.mxu1 }
 0x2cf   :  { %v3323_v48 = vadd.f32 %v6319_v0, %v8606_v9 }
 0x2d0   :  { %v3266_v20 = vpop.f32.mrf.mxu1 }
 0x2d1   :  { %v3321_v22 = vadd.f32 %v8606_v9, %v3266_v20 }
 0x2d8   :  { %v6322_v54 = vpop.f32.mrf.mxu1 }
 0x2d9   :  { %v6346_v59 = vpop.f32.mrf.mxu0  ;;  %v3326_v47 = vadd.f32 %v6322_v54, %v8606_v9 }
 0x2da   :  { %v3752_v32 = vadd.f32 %v6346_v59, %v3318_v23  ;;  %v3279_v35 = vpop.f32.mrf.mxu1 }
 0x2db   :  { %v3687_v10 = vpop.f32.mrf.mxu0  ;;  %v3324_v34 = vadd.f32 %v8606_v9, %v3279_v35 }
 0x2dc   :  { %v3750_v63 = vadd.f32 %v3687_v10, %v3316_v28  ;;  %v6323_v50 = vpop.f32.mrf.mxu1 }
 0x2dd   :  { %v6347_v14 = vpop.f32.mrf.mxu0  ;;  %v3327_v45 = vadd.f32 %v6323_v50, %v8606_v9 }
 0x2de   :  { %v3753_v8 = vadd.f32 %v6347_v14, %v3319_v21  ;;  %v3282_v1 = vpop.f32.mrf.mxu1 }
 0x2df   :  { %v3690_v46 = vpop.f32.mrf.mxu0  ;;  %v3325_v11 = vadd.f32 %v8606_v9, %v3282_v1 }
 0x2e0   :  { %v3751_v36 = vadd.f32 %v3690_v46, %v3317_v13  ;;  %v6326_v52 = vpop.f32.mrf.mxu1 }
 0x2e1   :  { %v3330_v38 = vadd.f32 %v6326_v52, %v8606_v9 }
 0x2e2   :  { %v3295_v42 = vpop.f32.mrf.mxu1 }
 0x2e3   :  { %v6350_v15 = vpop.f32.mrf.mxu0  ;;  %v3328_v16 = vadd.f32 %v8606_v9, %v3295_v42 }
 0x2e4   :  { %v3756_v5 = vadd.f32 %v6350_v15, %v3322_v57  ;;  %v6327_v56 = vpop.f32.mrf.mxu1 }
 0x2e5   :  { %v3703_v2 = vpop.f32.mrf.mxu0  ;;  %v3331_v3 = vadd.f32 %v6327_v56, %v8606_v9 }
 0x2e6   :  { %v3754_v26 = vadd.f32 %v3703_v2, %v3320_v53  ;;  %v3298_v37 = vpop.f32.mrf.mxu1 }
 0x2e7   :  { %v6351_v33 = vpop.f32.mrf.mxu0  ;;  %v3329_v54 = vadd.f32 %v8606_v9, %v3298_v37 }
 0x2e8   :  { %v3757_v12 = vadd.f32 %v6351_v33, %v3323_v48 }
 0x2e9   :  { %v3706_v43 = vpop.f32.mrf.mxu0 }
 0x2ea   :  { %v3755_v55 = vadd.f32 %v3706_v43, %v3321_v22 }
 0x2ec   :  { %v6354_v6 = vpop.f32.mrf.mxu0 }
 0x2ed   :  { %v3760_v41 = vadd.f32 %v6354_v6, %v3326_v47 }
 0x2ee   :  { %v3719_v24 = vpop.f32.mrf.mxu0 }
 0x2ef   :  { %v3758_v39 = vadd.f32 %v3719_v24, %v3324_v34  ;;  %v6378_v4 = vpop.f32.mrf.mxu1 }
 0x2f0   :  { %v6355_v7 = vpop.f32.mrf.mxu0  ;;  %v8620_v58 = vadd.f32 %v6378_v4, %v3752_v32 }
 0x2f1   :  { %v3761_v61 = vadd.f32 %v6355_v7, %v3327_v45  ;;  %v3977_v62 = vpop.f32.mrf.mxu1 }
 0x2f2   :  { %v3722_v44 = vpop.f32.mrf.mxu0  ;;  %v8622_v27 = vadd.f32 %v3977_v62, %v3750_v63 }
 0x2f3   :  { %v3759_v19 = vadd.f32 %v3722_v44, %v3325_v11  ;;  %v6379_v29 = vpop.f32.mrf.mxu1 }
 0x2f4   :  { %v8624_v31 = vadd.f32 %v6379_v29, %v3753_v8 }
 0x2f5   :  { %v3980_v51 = vpop.f32.mrf.mxu1 }
 0x2f6   :  { %v8627_v30 = vadd.f32 %v3980_v51, %v3751_v36 }
 0x2f7   :  { %v6358_v60 = vpop.f32.mrf.mxu0 }
 0x2f8   :  { %v3764_v17 = vadd.f32 %v6358_v60, %v3330_v38  ;;  %v6382_v25 = vpop.f32.mrf.mxu1 }
 0x2f9   :  { %v3735_v40 = vpop.f32.mrf.mxu0  ;;  %v8630_v49 = vadd.f32 %v6382_v25, %v3756_v5 }
 0x2fa   :  { %v3762_v18 = vadd.f32 %v3735_v40, %v3328_v16  ;;  %v3993_v0 = vpop.f32.mrf.mxu1 }
 0x2fb   :  { %v6359_v20 = vpop.f32.mrf.mxu0  ;;  %v8633_v23 = vadd.f32 %v3993_v0, %v3754_v26 }
 0x2fc   :  { %v3765_v59 = vadd.f32 %v6359_v20, %v3331_v3  ;;  %v6383_v28 = vpop.f32.mrf.mxu1 }
 0x2fd   :  { %v3738_v32 = vpop.f32.mrf.mxu0  ;;  %v8636_v35 = vadd.f32 %v6383_v28, %v3757_v12 }
 0x2fe   :  { %v3763_v10 = vadd.f32 %v3738_v32, %v3329_v54  ;;  %v3996_v21 = vpop.f32.mrf.mxu1 }
 0x2ff   :  { %v8638_v63 = vpop.f32.mrf.mxu0  ;;  %v8640_v50 = vadd.f32 %v3996_v21, %v3755_v55 }
 0x301   :  { %v8642_v14 = vpop.f32.mrf.mxu0  ;;  %v6386_v13 = vpop.f32.mrf.mxu1 }
 0x302   :  { %v8644_v8 = vadd.f32 %v6386_v13, %v3760_v41 }
 0x303   :  { %v8646_v1 = vpop.f32.mrf.mxu0  ;;  %v4009_v46 = vpop.f32.mrf.mxu1 }
 0x304   :  { %v8648_v9 = vadd.f32 %v4009_v46, %v3758_v39 }
 0x305   :  { %v8650_v36 = vpop.f32.mrf.mxu0  ;;  %v6387_v52 = vpop.f32.mrf.mxu1 }
 0x306   :  { %v8652_v57 = vadd.f32 %v6387_v52, %v3761_v61 }
 0x307   :  { %v8654_v15 = vpop.f32.mrf.mxu0  ;;  %v4012_v53 = vpop.f32.mrf.mxu1 }
 0x308   :  { %v8656_v5 = vadd.f32 %v4012_v53, %v3759_v19 }
 0x309   :  { %v8658_v42 = vpop.f32.mrf.mxu0  ;;  %v6390_v2 = vpop.f32.mrf.mxu1 }
 0x30a   :  { %v8660_v48 = vadd.f32 %v6390_v2, %v3764_v17 }
 0x30b   :  { %v8662_v26 = vpop.f32.mrf.mxu0  ;;  %v4025_v33 = vpop.f32.mrf.mxu1 }
 0x30c   :  { %v8664_v22 = vadd.f32 %v4025_v33, %v3762_v18 }
 0x30d   :  { %v8666_v12 = vpop.f32.mrf.mxu0  ;;  %v6391_v56 = vpop.f32.mrf.mxu1 }
 0x30e   :  { %v8668_v43 = vadd.f32 %v6391_v56, %v3765_v59 }
 0x30f   :  { %v8670_v55 = vpop.f32.mrf.mxu0  ;;  %v4028_v47 = vpop.f32.mrf.mxu1 }
 0x310   :  { %v8672_v6 = vadd.f32 %v4028_v47, %v3763_v10 }
 0x311   :  { %v8674_v37 = vpop.f32.mrf.mxu0  ;;  %v6442_v34 = vpop.f32.mrf.mxu1 }
 0x313   :  { %v8676_v41 = vpop.f32.mrf.mxu0  ;;  %v8678_v24 = vpop.f32.mrf.mxu1 }
 0x315   :  { %v8680_v45 = vpop.f32.mrf.mxu0  ;;  %v8682_v39 = vpop.f32.mrf.mxu1 }
 0x317   :  { %v8684_v7 = vpop.f32.mrf.mxu0  ;;  %v8686_v4 = vpop.f32.mrf.mxu1 }
 0x319   :  { %v8688_v11 = vpop.f32.mrf.mxu0  ;;  %v8690_v61 = vpop.f32.mrf.mxu1 }
 0x31b   :  { %v8692_v44 = vpop.f32.mrf.mxu0  ;;  %v8694_v62 = vpop.f32.mrf.mxu1 }
 0x31d   :  { %v8696_v19 = vpop.f32.mrf.mxu0  ;;  %v8698_v29 = vpop.f32.mrf.mxu1 }
 0x31f   :  { %v6474_v51 = vpop.f32.mrf.mxu0  ;;  %v8700_v38 = vpop.f32.mrf.mxu1 }
 0x321   :  { %v8702_v60 = vpop.f32.mrf.mxu0  ;;  %v8704_v16 = vpop.f32.mrf.mxu1 }
 0x323   :  { %v8706_v17 = vpop.f32.mrf.mxu0  ;;  %v8708_v25 = vpop.f32.mrf.mxu1 }
 0x325   :  { %v8710_v40 = vpop.f32.mrf.mxu0  ;;  %v8712_v3 = vpop.f32.mrf.mxu1 }
 0x327   :  { %v8714_v18 = vpop.f32.mrf.mxu0  ;;  %v8716_v0 = vpop.f32.mrf.mxu1 }
 0x329   :  { %v8718_v20 = vpop.f32.mrf.mxu0  ;;  %v8720_v54 = vpop.f32.mrf.mxu1 }
 0x32a   :  { %9087 = vst [vmem:[#allocation32_spill] sm:$0xff] %v8720_v54 }
 0x32b   :  { %v8722_v59 = vpop.f32.mrf.mxu0  ;;  %v8724_v28 = vpop.f32.mrf.mxu1 }
 0x32c   :  { %9088 = vst [vmem:[#allocation36_spill] sm:$0xff] %v8722_v59  ;;  %9089 = vst [vmem:[#allocation43_spill] sm:$0xff] %v8724_v28 }
 0x32d   :  { %v8726_v32 = vpop.f32.mrf.mxu0  ;;  %v8728_v10 = vpop.f32.mrf.mxu1 }
 0x32e   :  { %9090 = vst [vmem:[#allocation45_spill] sm:$0xff] %v8726_v32  ;;  %9091 = vst [vmem:[#allocation25_spill] sm:$0xff] %v8728_v10 }
 0x32f   :  { %v8730_v21 = vpop.f32.mrf.mxu0  ;;  %v8732_v13 = vpop.f32.mrf.mxu1 }
 0x330   :  { %9092 = vst [vmem:[#allocation37_spill] sm:$0xff] %v8730_v21  ;;  %9093 = vst [vmem:[#allocation30_spill] sm:$0xff] %v8732_v13 }
 0x331   :  { %v8734_v46 = vpop.f32.mrf.mxu0  ;;  %v6506_v52 = vpop.f32.mrf.mxu1 }
 0x332   :  { %9094 = vst [vmem:[#allocation39_spill] sm:$0xff] %v8734_v46 }
 0x333   :  { %v8736_v53 = vpop.f32.mrf.mxu0  ;;  %v4791_v2 = vpop.f32.mrf.mxu1 }
 0x334   :  { %9095 = vst [vmem:[#allocation29_spill] sm:$0xff] %v8736_v53 }
 0x335   :  { %v8738_v33 = vpop.f32.mrf.mxu0  ;;  %v8740_v56 = vpop.f32.mrf.mxu1 }
 0x336   :  { %9096 = vst [vmem:[#allocation41_spill] sm:$0xff] %v8738_v33  ;;  %9097 = vst [vmem:[#allocation44_spill] sm:$0xff] %v8740_v56 }
 0x337   :  { %v8742_v47 = vpop.f32.mrf.mxu0  ;;  %v8744_v28 = vpop.f32.mrf.mxu1 }
 0x338   :  { %9098 = vst [vmem:[#allocation46_spill] sm:$0xff] %v8742_v47  ;;  %9099 = vst [vmem:[#allocation20_spill] sm:$0xff] %v8744_v28 }
 0x339   :  { %v8746_v32 = vpop.f32.mrf.mxu0  ;;  %v8748_v10 = vpop.f32.mrf.mxu1 }
 0x33a   :  { %9100 = vst [vmem:[#allocation21_spill] sm:$0xff] %v8746_v32  ;;  %9101 = vst [vmem:[#allocation42_spill] sm:$0xff] %v8748_v10 }
 0x33b   :  { %v8750_v21 = vpop.f32.mrf.mxu0  ;;  %v8752_v13 = vpop.f32.mrf.mxu1 }
 0x33c   :  { %9102 = vst [vmem:[#allocation26_spill] sm:$0xff] %v8750_v21  ;;  %9103 = vst [vmem:[#allocation40_spill] sm:$0xff] %v8752_v13 }
 0x33d   :  { %v8754_v46 = vpop.f32.mrf.mxu0  ;;  %v8756_v53 = vpop.f32.mrf.mxu1 }
 0x33e   :  { %9104 = vst [vmem:[#allocation24_spill] sm:$0xff] %v8754_v46  ;;  %9105 = vst [vmem:[#allocation33_spill] sm:$0xff] %v8756_v53  ;;  %v4240_v53 = vadd.f32 %v8638_v63, %v8620_v58  ;;  %v4242_v58 = vadd.f32 %v8658_v42, %v8633_v23  ;;  %v4245_v63 = vadd.f32 %v8662_v26, %v8636_v35 }
 0x33f   :  { %v6538_v54 = vpop.f32.mrf.mxu0  ;;  %v8758_v33 = vpop.f32.mrf.mxu1  ;;  %v4249_v23 = vadd.f32 %v8676_v41, %v8652_v57  ;;  %v4247_v35 = vadd.f32 %v8680_v45, %v8656_v5  ;;  %v4250_v57 = vadd.f32 %v8688_v11, %v8664_v22  ;;  %v4253_v5 = vadd.f32 %v8692_v44, %v8668_v43  ;;  %v5278_v11 = vld [vmem:[#allocation7 + $0x10] sm:$0xff] }
 0x340   :  { %9106 = vst [vmem:[#allocation34_spill] sm:$0xff] %v8758_v33  ;;  %v4469_v41 = vadd.f32 %v8698_v29, %v4245_v63 }
 0x341   :  { %v5003_v59 = vpop.f32.mrf.mxu0  ;;  %v8760_v56 = vpop.f32.mrf.mxu1  ;;  %v4473_v44 = vadd.f32 %v8712_v3, %v4249_v23 }
 0x342   :  { %9107 = vst [vmem:[#allocation28_spill] sm:$0xff] %v8760_v56  ;;  %v4238_v56 = vadd.f32 %v8642_v14, %v8622_v27  ;;  %v4248_v14 = vadd.f32 %v8670_v55, %v8644_v8  ;;  %v4252_v8 = vadd.f32 %v8684_v7, %v8660_v48  ;;  %v4466_v55 = vadd.f32 %v8694_v62, %v4242_v58  ;;  %v9121_v58 = vld [vmem:[#allocation42_spill] sm:$0xff] }
 0x343   :  { %v8762_v47 = vpop.f32.mrf.mxu0  ;;  %v8764_v32 = vpop.f32.mrf.mxu1  ;;  %v8830_v48 = vadd.f32 %v8696_v19, %v8672_v6 }
 0x344   :  { %9108 = vst [vmem:[#allocation35_spill] sm:$0xff] %v8762_v47  ;;  %9109 = vst [vmem:[#allocation31_spill] sm:$0xff] %v8764_v32  ;;  %v4241_v32 = vadd.f32 %v8646_v1, %v8624_v31  ;;  %v8784_v47 = vstv %s5393_s6  ;;  %v4243_v31 = vadd.f32 %v8666_v12, %v8640_v50 }
 0x345   :  { %v8766_v10 = vpop.f32.mrf.mxu0  ;;  %v8768_v21 = vpop.f32.mrf.mxu1 }
 0x346   :  { %9110 = vst [vmem:[#allocation38_spill] sm:$0xff] %v8766_v10  ;;  %9111 = vst [vmem:[#allocation23_spill] sm:$0xff] %v8768_v21  ;;  %v4464_v10 = vadd.f32 %v6442_v34, %v4240_v53  ;;  %v4239_v21 = vadd.f32 %v8650_v36, %v8627_v30  ;;  %v4462_v30 = vadd.f32 %v8678_v24, %v4238_v56 }
 0x347   :  { %v8770_v13 = vpop.f32.mrf.mxu0  ;;  %v8772_v46 = vpop.f32.mrf.mxu1  ;;  %v4465_v36 = vadd.f32 %v8682_v39, %v4241_v32  ;;  %v4467_v43 = vadd.f32 %v8700_v38, %v4243_v31  ;;  %v4472_v39 = vadd.f32 %v8704_v16, %v4248_v14  ;;  %v8844_v38 = vadd.f32 %v8716_v0, %v4247_v35  ;;  %v9123_v35 = vld [vmem:[#allocation40_spill] sm:$0xff] }
 0x348   :  { %9112 = vst [vmem:[#allocation27_spill] sm:$0xff] %v8772_v46  ;;  %v4244_v46 = vadd.f32 %v8654_v15, %v8630_v49  ;;  %v4670_v1 = vadd.f32 %v6474_v51, %v4464_v10  ;;  %v4246_v49 = vadd.f32 %v8674_v37, %v8648_v9  ;;  %v4463_v42 = vadd.f32 %v8686_v4, %v4239_v21  ;;  %v9117_v21 = vld [vmem:[#allocation45_spill] sm:$0xff] }
 0x349   :  { %v8776_v33 = vpop.f32.mrf.mxu0  ;;  %v8778_v28 = vpop.f32.mrf.mxu1  ;;  %v4668_v26 = vadd.f32 %v8702_v60, %v4462_v30  ;;  %v4671_v22 = vadd.f32 %v8706_v17, %v4465_v36  ;;  %v4672_v51 = vadd.f32 %v8718_v20, %v4466_v55  ;;  %v9114_v60 = vld [vmem:[#allocation44_spill] sm:$0xff] }
 0x34a   :  { %9113 = vst [vmem:[#allocation22_spill] sm:$0xff] %v8778_v28  ;;  %v4856_v9 = vadd.f32 %v6506_v52, %v4670_v1  ;;  %v4468_v12 = vadd.f32 %v8690_v61, %v4244_v46  ;;  %v4470_v7 = vadd.f32 %v8708_v25, %v4246_v49  ;;  %v4669_v61 = vadd.f32 %v8710_v40, %v4463_v42  ;;  %v5276_v25 = vld [vmem:[#allocation7] sm:$0xff]  ;;  %v9118_v52 = vld [vmem:[#allocation43_spill] sm:$0xff]  ;;  %v9122_v49 = vld [vmem:[#allocation25_spill] sm:$0xff] }
 0x34b   :  { %v8794_v28 = vpop.f32.mrf.mxu0  ;;  %v8796_v27 = vpop.f32.mrf.mxu1  ;;  %v4854_v24 = vadd.f32 %v4791_v2, %v4668_v26  ;;  %v4857_v16 = vadd.f32 %v9114_v60, %v4671_v22  ;;  %v9116_v40 = vld [vmem:[#allocation32_spill] sm:$0xff]  ;;  %v4673_v46 = vadd.f32 %v9117_v21, %v4467_v43  ;;  %v9120_v0 = vld [vmem:[#allocation35_spill] sm:$0xff]  ;;  %v8862_v23 = vadd.f32 %v9122_v49, %v4253_v5 }
 0x34c   :  { %v5068_v45 = vadd.f32 %v6538_v54, %v4856_v9  ;;  %v4674_v29 = vadd.f32 %v8714_v18, %v4468_v12  ;;  %v9115_v54 = vld [vmem:[#allocation36_spill] sm:$0xff]  ;;  %v8849_v10 = vadd.f32 %v9116_v40, %v4252_v8  ;;  %v8853_v18 = vadd.f32 %v9118_v52, %v4250_v57  ;;  %v5279_v1 = vld [vmem:[#allocation7 + $0x18] sm:$0xff]  ;;  %v9129_v40 = vld [vmem:[#allocation34_spill] sm:$0xff] }
 0x34d   :  { %v8810_v15 = vpop.f32.mrf.mxu0  ;;  %v8812_v50 = vpop.f32.mrf.mxu1  ;;  %v5066_v6 = vadd.f32 %v5003_v59, %v4854_v24  ;;  %v4675_v32 = vadd.f32 %v9115_v54, %v4469_v41  ;;  %v9119_v20 = vld [vmem:[#allocation20_spill] sm:$0xff]  ;;  %v5069_v2 = vadd.f32 %v9120_v0, %v4857_v16  ;;  %v4858_v36 = vadd.f32 %v9123_v35, %v4672_v51  ;;  %v9124_v8 = vld [vmem:[#allocation38_spill] sm:$0xff]  ;;  %v5277_v41 = vld [vmem:[#allocation7 + $0x8] sm:$0xff] }
 0x34e   :  { %v4855_v53 = vadd.f32 %v9119_v20, %v4669_v61  ;;  %v4860_v63 = vadd.f32 %v9121_v58, %v4674_v29  ;;  %v9125_v24 = vld [vmem:[#allocation37_spill] sm:$0xff]  ;;  %v9126_v22 = vld [vmem:[#allocation39_spill] sm:$0xff]  ;;  %v5282_v61 = vld [vmem:[#allocation7 + $0x30] sm:$0xff] }
 0x34f   :  { %v8824_v37 = vpop.f32.mrf.mxu0  ;;  %v8826_v34 = vpop.f32.mrf.mxu1  ;;  %v4676_v43 = vadd.f32 %v9126_v22, %v4470_v7  ;;  %v5070_v29 = vadd.f32 %v8776_v33, %v4858_v36  ;;  %v9128_v16 = vld [vmem:[#allocation33_spill] sm:$0xff]  ;;  %v5280_v54 = vld [vmem:[#allocation7 + $0x20] sm:$0xff] }
 0x350   :  { %v5067_v42 = vadd.f32 %v9124_v8, %v4855_v53  ;;  %v5072_v57 = vadd.f32 %v8770_v13, %v4860_v63  ;;  %v9131_v63 = vld [vmem:[#allocation31_spill] sm:$0xff]  ;;  %v5281_v35 = vld [vmem:[#allocation7 + $0x28] sm:$0xff] }
 0x351   :  { %v6570_v4 = vpop.f32.mrf.mxu1  ;;  %v8839_v62 = vpop.f32.mrf.mxu0 }
 0x352   :  { %v5262_v19 = vadd.f32 %v6570_v4, %v5068_v45  ;;  %v4678_v45 = vadd.f32 %v9125_v24, %v4472_v39  ;;  %v5286_v24 = vld [vmem:[#allocation7 + $0x50] sm:$0xff] }
 0x353   :  { %v5197_v17 = vpop.f32.mrf.mxu1  ;;  %v8858_v31 = vpop.f32.mrf.mxu0 }
 0x354   :  { %v5294_v3 = vadd.f32 %v5278_v11, %v5262_v19  ;;  %v5260_v59 = vadd.f32 %v5197_v17, %v5066_v6  ;;  %v9127_v6 = vld [vmem:[#allocation29_spill] sm:$0xff]  ;;  %v4861_v17 = vadd.f32 %v9128_v16, %v4675_v32 }
 0x355   :  { %v6571_v56 = vpop.f32.mrf.mxu1  ;;  %v4679_v19 = vadd.f32 %v9127_v6, %v4473_v44  ;;  %v5038_v51 = vpop.f32.mrf.mxu0  ;;  %v9136_v6 = vld [vmem:[#allocation27_spill] sm:$0xff] }
 0x356   :  { %vm5310_vm3 = vcmp.gt.f32.partialorder %v5294_v3, 0.0  ;;  %v5327_v14 = vmul.f32 %v8784_v47, %v5294_v3  ;;  %v5292_v30 = vadd.f32 %v5276_v25, %v5260_v59  ;;  %v5263_v26 = vadd.f32 %v6571_v56, %v5069_v2  ;;  %v9130_v59 = vld [vmem:[#allocation28_spill] sm:$0xff] }
 0x357   :  { %v5200_v9 = vpop.f32.mrf.mxu1  ;;  %v4864_v21 = vadd.f32 %v9130_v59, %v4678_v45  ;;  %v5073_v33 = vadd.f32 %v8794_v28, %v4861_v17  ;;  %v6550_v2 = vpop.f32.mrf.mxu0 }
 0x358   :  { %v5343_v12 = vsel %vm5310_vm3, %v5294_v3, %v5327_v14  ;;  %vm5308_vm5 = vcmp.gt.f32.partialorder %v5292_v30, 0.0  ;;  %v5325_v55 = vmul.f32 %v8784_v47, %v5292_v30  ;;  %v5295_v5 = vadd.f32 %v5279_v1, %v5263_v26 }
 0x359   :  { %5359 = vst [vmem:[#allocation14 + $0x10] sm:$0xff] %v5343_v12  ;;  %v5261_v4 = vadd.f32 %v5200_v9, %v5067_v42  ;;  %v6574_v11 = vpop.f32.mrf.mxu1  ;;  %v4859_v3 = vadd.f32 %v9129_v40, %v4673_v46  ;;  %v5283_v46 = vld [vmem:[#allocation7 + $0x38] sm:$0xff]  ;;  %v4862_v14 = vadd.f32 %v9131_v63, %v4676_v43  ;;  %v9132_v42 = vld [vmem:[#allocation41_spill] sm:$0xff]  ;;  %v9133_v9 = vld [vmem:[#allocation46_spill] sm:$0xff]  ;;  %v5051_v22 = vpop.f32.mrf.mxu0 }
 0x35a   :  { %v5341_v13 = vsel %vm5308_vm5, %v5292_v30, %v5325_v55  ;;  %v5266_v60 = vadd.f32 %v6574_v11, %v5072_v57  ;;  %vm5311_vm8 = vcmp.gt.f32.partialorder %v5295_v5, 0.0  ;;  %v5328_v39 = vmul.f32 %v8784_v47, %v5295_v5  ;;  %v9134_v12 = vld [vmem:[#allocation21_spill] sm:$0xff]  ;;  %v9135_v11 = vld [vmem:[#allocation23_spill] sm:$0xff]  ;;  %v9140_v63 = vld [vmem:[#allocation24_spill] sm:$0xff] }
 0x35b   :  { %5357 = vst [vmem:[#allocation14] sm:$0xff] %v5341_v13  ;;  %v5293_v25 = vadd.f32 %v5277_v41, %v5261_v4  ;;  %v5213_v7 = vpop.f32.mrf.mxu1  ;;  %v5071_v0 = vadd.f32 %v8810_v15, %v4859_v3  ;;  %v5076_v30 = vadd.f32 %v8824_v37, %v4864_v21  ;;  %v4677_v26 = vadd.f32 %v9132_v42, %v8844_v38  ;;  %v5287_v21 = vld [vmem:[#allocation7 + $0x58] sm:$0xff]  ;;  %v5288_v42 = vld [vmem:[#allocation7 + $0x60] sm:$0xff] }
 0x35c   :  { %v5298_v52 = vadd.f32 %v5282_v61, %v5266_v60  ;;  %v5264_v44 = vadd.f32 %v5213_v7, %v5070_v29  ;;  %v5344_v20 = vsel %vm5311_vm8, %v5295_v5, %v5328_v39  ;;  %v4682_v57 = vadd.f32 %v9133_v9, %v8849_v10 }
 0x35d   :  { %vm5309_vm11 = vcmp.gt.f32.partialorder %v5293_v25, 0.0  ;;  %v5326_v53 = vmul.f32 %v8784_v47, %v5293_v25  ;;  %v6575_v32 = vpop.f32.mrf.mxu1  ;;  %5360 = vst [vmem:[#allocation14 + $0x18] sm:$0xff] %v5344_v20  ;;  %v4680_v55 = vadd.f32 %v9134_v12, %v8853_v18  ;;  %v5074_v45 = vadd.f32 %v8839_v62, %v4862_v14  ;;  %v5284_v18 = vld [vmem:[#allocation7 + $0x40] sm:$0xff]  ;;  %v9137_v62 = vld [vmem:[#allocation22_spill] sm:$0xff] }
 0x35e   :  { %vm5314_vm0 = vcmp.gt.f32.partialorder %v5298_v52, 0.0  ;;  %v5331_v56 = vmul.f32 %v8784_v47, %v5298_v52  ;;  %v5296_v58 = vadd.f32 %v5280_v54, %v5264_v44  ;;  %v5267_v28 = vadd.f32 %v6575_v32, %v5073_v33  ;;  %v6551_v54 = vpop.f32.mrf.mxu0 }
 0x35f   :  { %v5342_v1 = vsel %vm5309_vm11, %v5293_v25, %v5326_v53  ;;  %v5216_v49 = vpop.f32.mrf.mxu1  ;;  %v4865_v61 = vadd.f32 %v9135_v11, %v4679_v19  ;;  %v4863_v38 = vadd.f32 %v9136_v6, %v4677_v26  ;;  %v4868_v17 = vadd.f32 %v9137_v62, %v4682_v57 }
 0x360   :  { %5358 = vst [vmem:[#allocation14 + $0x8] sm:$0xff] %v5342_v1  ;;  %v5347_v36 = vsel %vm5314_vm0, %v5298_v52, %v5331_v56  ;;  %vm5312_vm1 = vcmp.gt.f32.partialorder %v5296_v58, 0.0  ;;  %v5329_v15 = vmul.f32 %v8784_v47, %v5296_v58  ;;  %v5265_v8 = vadd.f32 %v5216_v49, %v5071_v0  ;;  %v9138_v52 = vld [vmem:[#allocation30_spill] sm:$0xff] }
 0x361   :  { %5363 = vst [vmem:[#allocation14 + $0x30] sm:$0xff] %v5347_v36  ;;  %v5299_v37 = vadd.f32 %v5283_v46, %v5267_v28  ;;  %v6578_v41 = vpop.f32.mrf.mxu1  ;;  %v5077_v39 = vadd.f32 %v8858_v31, %v4865_v61  ;;  %v5075_v25 = vadd.f32 %v5038_v51, %v4863_v38  ;;  %v4475_v44 = vadd.f32 %v9138_v52, %v8830_v48  ;;  %v5285_v51 = vld [vmem:[#allocation7 + $0x48] sm:$0xff]  ;;  %v5290_v1 = vld [vmem:[#allocation7 + $0x70] sm:$0xff] }
 0x362   :  { %v5345_v43 = vsel %vm5312_vm1, %v5296_v58, %v5329_v15  ;;  %v5297_v5 = vadd.f32 %v5281_v35, %v5265_v8  ;;  %v5270_v4 = vadd.f32 %v6578_v41, %v5076_v30  ;;  %v4866_v33 = vadd.f32 %v8796_v27, %v4680_v55  ;;  %v9139_v58 = vld [vmem:[#allocation26_spill] sm:$0xff] }
 0x363   :  { %5361 = vst [vmem:[#allocation14 + $0x20] sm:$0xff] %v5345_v43  ;;  %vm5315_vm2 = vcmp.gt.f32.partialorder %v5299_v37, 0.0  ;;  %v5332_v10 = vmul.f32 %v8784_v47, %v5299_v37  ;;  %v5229_v29 = vpop.f32.mrf.mxu1  ;;  %v5080_v20 = vadd.f32 %v6550_v2, %v4868_v17  ;;  %v4683_v46 = vadd.f32 %v9139_v58, %v8862_v23  ;;  %v5054_v2 = vpop.f32.mrf.mxu0 }
 0x364   :  { %vm5313_vm4 = vcmp.gt.f32.partialorder %v5297_v5, 0.0  ;;  %v5330_v13 = vmul.f32 %v8784_v47, %v5297_v5  ;;  %v5302_v60 = vadd.f32 %v5286_v24, %v5270_v4  ;;  %v5268_v16 = vadd.f32 %v5229_v29, %v5074_v45  ;;  %v5291_v45 = vld [vmem:[#allocation7 + $0x78] sm:$0xff] }
 0x365   :  { %v5348_v7 = vsel %vm5315_vm2, %v5299_v37, %v5332_v10  ;;  %v6579_v19 = vpop.f32.mrf.mxu1  ;;  %v4681_v14 = vadd.f32 %v9140_v63, %v4475_v44  ;;  %v5078_v27 = vadd.f32 %v5051_v22, %v4866_v33  ;;  %v4869_v36 = vadd.f32 %v8812_v50, %v4683_v46 }
 0x366   :  { %5364 = vst [vmem:[#allocation14 + $0x38] sm:$0xff] %v5348_v7  ;;  %v5346_v40 = vsel %vm5313_vm4, %v5297_v5, %v5330_v13  ;;  %vm5318_vm6 = vcmp.gt.f32.partialorder %v5302_v60, 0.0  ;;  %v5335_v3 = vmul.f32 %v8784_v47, %v5302_v60  ;;  %v5300_v59 = vadd.f32 %v5284_v18, %v5268_v16  ;;  %v5289_v5 = vld [vmem:[#allocation7 + $0x68] sm:$0xff] }
 0x367   :  { %5362 = vst [vmem:[#allocation14 + $0x28] sm:$0xff] %v5346_v40  ;;  %v5271_v53 = vadd.f32 %v6579_v19, %v5077_v39  ;;  %v5232_v31 = vpop.f32.mrf.mxu1  ;;  %v4867_v15 = vadd.f32 %v8826_v34, %v4681_v14  ;;  %v5081_v12 = vadd.f32 %v6551_v54, %v4869_v36 }
 0x368   :  { %v5351_v32 = vsel %vm5318_vm6, %v5302_v60, %v5335_v3  ;;  %vm5316_vm7 = vcmp.gt.f32.partialorder %v5300_v59, 0.0  ;;  %v5333_v0 = vmul.f32 %v8784_v47, %v5300_v59  ;;  %v5269_v56 = vadd.f32 %v5232_v31, %v5075_v25 }
 0x369   :  { %5367 = vst [vmem:[#allocation14 + $0x50] sm:$0xff] %v5351_v32  ;;  %v5303_v30 = vadd.f32 %v5287_v21, %v5271_v53  ;;  %v6582_v48 = vpop.f32.mrf.mxu1  ;;  %v5079_v55 = vadd.f32 %v5054_v2, %v4867_v15 }
 0x36a   :  { %v5349_v28 = vsel %vm5316_vm7, %v5300_v59, %v5333_v0  ;;  %v5301_v49 = vadd.f32 %v5285_v51, %v5269_v56  ;;  %v5274_v35 = vadd.f32 %v6582_v48, %v5080_v20 }
 0x36b   :  { %5365 = vst [vmem:[#allocation14 + $0x40] sm:$0xff] %v5349_v28  ;;  %vm5319_vm9 = vcmp.gt.f32.partialorder %v5303_v30, 0.0  ;;  %v5336_v8 = vmul.f32 %v8784_v47, %v5303_v30  ;;  %v5245_v23 = vpop.f32.mrf.mxu1 }
 0x36c   :  { %vm5317_vm10 = vcmp.gt.f32.partialorder %v5301_v49, 0.0  ;;  %v5334_v26 = vmul.f32 %v8784_v47, %v5301_v49  ;;  %v5306_v9 = vadd.f32 %v5290_v1, %v5274_v35  ;;  %v5272_v57 = vadd.f32 %v5245_v23, %v5078_v27 }
 0x36d   :  { %v5352_v37 = vsel %vm5319_vm9, %v5303_v30, %v5336_v8  ;;  %v6583_v41 = vpop.f32.mrf.mxu1 }
 0x36e   :  { %5368 = vst [vmem:[#allocation14 + $0x58] sm:$0xff] %v5352_v37  ;;  %v5350_v24 = vsel %vm5317_vm10, %v5301_v49, %v5334_v26  ;;  %vm5322_vm12 = vcmp.gt.f32.partialorder %v5306_v9, 0.0  ;;  %v5339_v50 = vmul.f32 %v8784_v47, %v5306_v9  ;;  %v5304_v34 = vadd.f32 %v5288_v42, %v5272_v57 }
 0x36f   :  { %5366 = vst [vmem:[#allocation14 + $0x48] sm:$0xff] %v5350_v24  ;;  %v5275_v22 = vadd.f32 %v6583_v41, %v5081_v12  ;;  %v5248_v43 = vpop.f32.mrf.mxu1 }
 0x370   :  { %v5355_v4 = vsel %vm5322_vm12, %v5306_v9, %v5339_v50  ;;  %vm5320_vm13 = vcmp.gt.f32.partialorder %v5304_v34, 0.0  ;;  %v5337_v11 = vmul.f32 %v8784_v47, %v5304_v34  ;;  %v5273_v61 = vadd.f32 %v5248_v43, %v5079_v55 }
 0x371   :  { %5371 = vst [vmem:[#allocation14 + $0x70] sm:$0xff] %v5355_v4  ;;  %v5307_v6 = vadd.f32 %v5291_v45, %v5275_v22 }
 0x372   :  { %v5353_v38 = vsel %vm5320_vm13, %v5304_v34, %v5337_v11  ;;  %v5305_v10 = vadd.f32 %v5289_v5, %v5273_v61 }
 0x373   :  { %5369 = vst [vmem:[#allocation14 + $0x60] sm:$0xff] %v5353_v38  ;;  %vm5323_vm14 = vcmp.gt.f32.partialorder %v5307_v6, 0.0  ;;  %v5340_v29 = vmul.f32 %v8784_v47, %v5307_v6 }
 0x374   :  { %vm5321_vm15 = vcmp.gt.f32.partialorder %v5305_v10, 0.0  ;;  %v5338_v18 = vmul.f32 %v8784_v47, %v5305_v10 }
 0x375   :  { %v5356_v13 = vsel %vm5323_vm14, %v5307_v6, %v5340_v29 }
 0x376   :  { %5372 = vst [vmem:[#allocation14 + $0x78] sm:$0xff] %v5356_v13  ;;  %v5354_v60 = vsel %vm5321_vm15, %v5305_v10, %v5338_v18 }
 0x377   :  { %5370 = vst [vmem:[#allocation14 + $0x68] sm:$0xff] %v5354_v60 }
 0x378   :  { %6891 = shalt.err (!%p6888_p6)
}
 0x379   :  { %5384 = dma.vmem_to_hbm [thread:$0]  %s5379_s18, 2048, %s8926_s8, [#allocation5], %s6911_s30, %s6911_s30, %s6912_s9  }
 0x37a   :  { %6908 = dma.done.wait [#allocation5], 2048  }
 0x37b   :  { %6909 = vsyncadd [#allocation5], 4294965248 }
 0x37c   :  { %5388 = vsyncpa [#allocation4], 1 }
 0x37d   :  { %5389 = vsyncpa [#allocation8], 1 }
 0x37e   :  { %5390 = vsyncpa [#allocation11], 1 }
 0x37f   :  { %5391 = vsyncpa [#allocation5], 1 }
 0x380   :  { %5392 = vsyncpa [#allocation6], 1 }

</bundles_post_ra>
